<compile_context>
chip_gen: v7x
topology: tpu7x:2x2x1
jax: 0.10.0
libtpu: 0.0.40
codegen_flags: <defaults>
</compile_context>

<pallas_src>
import jax
import jax.numpy as jnp
from jax.experimental import pallas as pl
from jax.experimental.pallas import tpu as pltpu


def _fused_basic_block_kernel(xp_ref, w1_ref, b1_ref, w2_ref, b2_ref,
                              o_ref, mid_ref):
    """One grid step computes out[n, h0:h0+Th, :, :].

    xp_ref : (1, H+4, W+2, Cin) zero-padded input for batch n (2-row / 1-col halo)
    w1_ref : (9, Cin, C)        conv1 taps (ky*3+kx), bn1 scale folded in
    b1_ref : (1, C)             bn1 folded bias
    w2_ref : (9, C, C)          conv2 taps, bn2 scale folded in
    b2_ref : (1, C)             bn2 folded bias
    o_ref  : (1, Th, W, C)      output row tile
    mid_ref: (Th+2, W+2, C)     VMEM scratch: conv1 output tile with zero halo
    """
    hb = pl.program_id(1)
    Th = o_ref.shape[1]
    W = o_ref.shape[2]
    C = o_ref.shape[3]
    Cin = xp_ref.shape[3]
    H = pl.num_programs(1) * Th
    h0 = pl.multiple_of(hb * Th, Th)

    # One dynamic-start load of the (Th+4)-row halo window of the resident
    # padded image; everything below is static slices of this value.
    xs = xp_ref[0, pl.ds(h0, Th + 4), :, :]                      # (Th+4, W+2, Cin)

    # ---- conv1 (+ folded bn1 scale) + bias + relu over Th+2 rows (1-row halo) ----
    M1 = (Th + 2) * W
    acc1 = jnp.zeros((M1, C), jnp.float32)
    for ky in range(3):
        for kx in range(3):
            patch = xs[ky:ky + Th + 2, kx:kx + W, :].reshape(M1, Cin)
            acc1 = acc1 + jnp.dot(patch, w1_ref[ky * 3 + kx],
                                  preferred_element_type=jnp.float32)
    mid = jnp.maximum(acc1 + b1_ref[...], 0.0).reshape(Th + 2, W, C)

    # Halo rows that fall outside the image must be zero: they are conv2's
    # vertical zero padding, not conv1 outputs.
    r = hb * Th - 1 + jax.lax.broadcasted_iota(jnp.int32, (Th + 2, 1, 1), 0)
    mid = jnp.where((r >= 0) & (r < H), mid, 0.0)

    # Stage the intermediate into VMEM with one zero column on each side
    # (conv2's horizontal zero padding). Never touches HBM.
    mid_ref[...] = jnp.zeros(mid_ref.shape, mid_ref.dtype)
    mid_ref[:, 1:W + 1, :] = mid

    # ---- conv2 (+ folded bn2 scale) + bias + residual + relu over Th rows ----
    M2 = Th * W
    acc2 = jnp.zeros((M2, C), jnp.float32)
    for ky in range(3):
        for kx in range(3):
            patch = mid_ref[ky:ky + Th, kx:kx + W, :].reshape(M2, C)
            acc2 = acc2 + jnp.dot(patch, w2_ref[ky * 3 + kx],
                                  preferred_element_type=jnp.float32)
    res = xs[2:2 + Th, 1:W + 1, :].astype(jnp.float32)           # identity (raw x)
    out = acc2.reshape(Th, W, C) + b2_ref[...] + res
    o_ref[0] = jnp.maximum(out, 0.0).astype(o_ref.dtype)


def _pick_tile_h(H):
    for th in (32, 16, 8, 4, 2, 1):
        if th <= H and H % th == 0:
            return th
    return 1


def basic_block_forward(x_nchw, params):
    """BasicBlock forward. Input/output in PyTorch NCHW layout."""
    x = jnp.transpose(x_nchw, (0, 2, 3, 1))                      # NCHW -> NHWC
    N, H, W, Cin = x.shape
    C = params["w1"].shape[-1]
    assert Cin == C, "no-downsample BasicBlock requires inplanes == planes"
    Th = _pick_tile_h(H)

    # Single pad of the input (2-row / 1-col halo): covers conv1's padding plus
    # the extra rows needed so conv2's halo rows of the conv1 output can be
    # computed in-kernel. The intermediate activation is never padded nor sent
    # to HBM.
    xp = jnp.pad(x, ((0, 0), (2, 2), (1, 1), (0, 0)))

    out = pl.pallas_call(
        _fused_basic_block_kernel,
        out_shape=jax.ShapeDtypeStruct((N, H, W, C), x.dtype),
        grid=(N, H // Th),
        in_specs=[
            pl.BlockSpec((1, H + 4, W + 2, Cin), lambda n, hb: (n, 0, 0, 0)),
            pl.BlockSpec((9, Cin, C), lambda n, hb: (0, 0, 0)),
            pl.BlockSpec((1, C), lambda n, hb: (0, 0)),
            pl.BlockSpec((9, C, C), lambda n, hb: (0, 0, 0)),
            pl.BlockSpec((1, C), lambda n, hb: (0, 0)),
        ],
        out_specs=pl.BlockSpec((1, Th, W, C), lambda n, hb: (n, hb, 0, 0)),
        scratch_shapes=[pltpu.VMEM((Th + 2, W + 2, C), jnp.float32)],
        compiler_params=pltpu.CompilerParams(
            dimension_semantics=("parallel", "parallel")),
    )(xp, params["w1"], params["bias1"], params["w2"], params["bias2"])
    return jnp.transpose(out, (0, 3, 1, 2))                      # NHWC -> NCHW


# ---------------------------------------------------------------------------
# Deterministic parameter construction (shapes from the module's __init__)
# ---------------------------------------------------------------------------
def make_params(key, inplanes, planes, eps=1e-3):
    ks = jax.random.split(key, 10)
    # PyTorch conv weights: (Cout, Cin, 3, 3), no bias
    w1_oihw = 0.1 * jax.random.normal(ks[0], (planes, inplanes, 3, 3), jnp.float32)
    w2_oihw = 0.1 * jax.random.normal(ks[1], (planes, planes, 3, 3), jnp.float32)

    def bn_fold(kg, kb, km, kv, c):
        gamma = 1.0 + 0.1 * jax.random.normal(kg, (c,), jnp.float32)
        beta = 0.1 * jax.random.normal(kb, (c,), jnp.float32)
        mean = 0.1 * jax.random.normal(km, (c,), jnp.float32)
        var = 0.5 + jax.random.uniform(kv, (c,), jnp.float32)
        scale = gamma / jnp.sqrt(var + eps)
        bias = beta - mean * scale
        return scale, bias

    s1, b1 = bn_fold(ks[2], ks[3], ks[4], ks[5], planes)
    s2, b2 = bn_fold(ks[6], ks[7], ks[8], ks[9], planes)

    def to_taps(w_oihw):
        # (Cout, Cin, ky, kx) -> (ky*3+kx, Cin, Cout)
        cout, cin = w_oihw.shape[0], w_oihw.shape[1]
        return jnp.transpose(w_oihw, (2, 3, 1, 0)).reshape(9, cin, cout)

    params = {
        # BN scale folded directly into the conv weights (conv followed by a
        # per-output-channel scale == conv with scaled weights).
        "w1": to_taps(w1_oihw) * s1[None, None, :],
        "bias1": b1.reshape(1, -1),
        "w2": to_taps(w2_oihw) * s2[None, None, :],
        "bias2": b2.reshape(1, -1),
    }
    ref = {"w1": w1_oihw, "w2": w2_oihw, "s1": s1, "b1": b1, "s2": s2, "b2": b2}
    return params, ref


def reference_forward(x_nchw, ref):
    def conv(x, w):
        return jax.lax.conv_general_dilated(
            x, w, window_strides=(1, 1), padding=((1, 1), (1, 1)),
            dimension_numbers=("NCHW", "OIHW", "NCHW"))

    def bn(x, s, b):
        return x * s[None, :, None, None] + b[None, :, None, None]

    out = jnp.maximum(bn(conv(x_nchw, ref["w1"]), ref["s1"], ref["b1"]), 0.0)
    out = bn(conv(out, ref["w2"]), ref["s2"], ref["b2"])
    out = jnp.maximum(out + x_nchw, 0.0)
    return out


if __name__ == "__main__":
    key = jax.random.PRNGKey(0)
    kx, kp = jax.random.split(key)

    N, C, H, W = 2, 4, 16, 16          # inplanes = planes = 4
    x = jax.random.normal(kx, (N, C, H, W), jnp.float32)

    params, ref = make_params(kp, inplanes=C, planes=C)

    fwd = jax.jit(basic_block_forward)
    out = jax.block_until_ready(fwd(x, params))

    expected = reference_forward(x, ref)
    assert out.shape == (N, C, H, W)
    assert jnp.allclose(out, expected, atol=2e-4, rtol=2e-4), (
        float(jnp.max(jnp.abs(out - expected))))

    print("KERNEL_OK")
</pallas_src>

<mosaic_0001>
module attributes {stable_mosaic.version = 11 : i64} {
  func.func @_fused_basic_block_kernel(%arg0: i32, %arg1: i32, %arg2: memref<1x20x18x4xf32, #tpu.memory_space<vmem>>, %arg3: memref<9x4x4xf32, #tpu.memory_space<vmem>>, %arg4: memref<1x4xf32, #tpu.memory_space<vmem>>, %arg5: memref<9x4x4xf32, #tpu.memory_space<vmem>>, %arg6: memref<1x4xf32, #tpu.memory_space<vmem>>, %arg7: memref<1x16x16x4xf32, #tpu.memory_space<vmem>>, %arg8: memref<18x18x4xf32, #tpu.memory_space<vmem>>) attributes {dimension_semantics = [#tpu.dimension_semantics<parallel>, #tpu.dimension_semantics<parallel>], iteration_bounds = array<i64: 2, 1>, scalar_prefetch = 0 : i64, scratch_operands = 1 : i64, tpu.core_type = #tpu.core_type<tc>, window_params = [{transform_indices = @transform_0, window_bounds = array<i64: 1, 20, 18, 4>}, {pipeline_mode = #tpu.pipeline_mode<synchronous>, transform_indices = @transform_1, window_bounds = array<i64: 9, 4, 4>}, {pipeline_mode = #tpu.pipeline_mode<synchronous>, transform_indices = @transform_2, window_bounds = array<i64: 1, 4>}, {pipeline_mode = #tpu.pipeline_mode<synchronous>, transform_indices = @transform_3, window_bounds = array<i64: 9, 4, 4>}, {pipeline_mode = #tpu.pipeline_mode<synchronous>, transform_indices = @transform_4, window_bounds = array<i64: 1, 4>}, {transform_indices = @transform_5, window_bounds = array<i64: 1, 16, 16, 4>}]} {
    %c16_i32 = arith.constant 16 : i32
    %0 = arith.muli %arg1, %c16_i32 : i32
    %1 = tpu.assume_multiple %0, 16 : i32
    %c0 = arith.constant 0 : index
    %2 = arith.index_cast %1 : i32 to index
    %c0_0 = arith.constant 0 : index
    %c0_1 = arith.constant 0 : index
    %3 = vector.load %arg2[%c0, %2, %c0_0, %c0_1] : memref<1x20x18x4xf32, #tpu.memory_space<vmem>>, vector<1x20x18x4xf32>
    %4 = vector.shape_cast %3 : vector<1x20x18x4xf32> to vector<20x18x4xf32>
    %cst = arith.constant 0.000000e+00 : f32
    %5 = vector.broadcast %cst : f32 to vector<288x4xf32>
    %6 = vector.extract_strided_slice %4 {offsets = [0, 0, 0], sizes = [18, 16, 4], strides = [1, 1, 1]} : vector<20x18x4xf32> to vector<18x16x4xf32>
    %7 = vector.shape_cast %6 : vector<18x16x4xf32> to vector<288x4xf32>
    %c0_2 = arith.constant 0 : index
    %c0_3 = arith.constant 0 : index
    %c0_4 = arith.constant 0 : index
    %8 = vector.load %arg3[%c0_2, %c0_3, %c0_4] : memref<9x4x4xf32, #tpu.memory_space<vmem>>, vector<1x4x4xf32>
    %9 = vector.shape_cast %8 : vector<1x4x4xf32> to vector<4x4xf32>
    %cst_5 = arith.constant dense<0.000000e+00> : vector<288x4xf32>
    %10 = tpu.matmul %7, %9, %cst_5 {dimension_numbers = #tpu.dot_dimension_numbers<[1], [0], [0], [1], [0, 0, 1, 1], [], []>} : vector<288x4xf32>, vector<4x4xf32>, vector<288x4xf32> -> vector<288x4xf32>
    %11 = arith.addf %5, %10 : vector<288x4xf32>
    %12 = vector.extract_strided_slice %4 {offsets = [0, 1, 0], sizes = [18, 16, 4], strides = [1, 1, 1]} : vector<20x18x4xf32> to vector<18x16x4xf32>
    %13 = vector.shape_cast %12 : vector<18x16x4xf32> to vector<288x4xf32>
    %c1 = arith.constant 1 : index
    %c0_6 = arith.constant 0 : index
    %c0_7 = arith.constant 0 : index
    %14 = vector.load %arg3[%c1, %c0_6, %c0_7] : memref<9x4x4xf32, #tpu.memory_space<vmem>>, vector<1x4x4xf32>
    %15 = vector.shape_cast %14 : vector<1x4x4xf32> to vector<4x4xf32>
    %cst_8 = arith.constant dense<0.000000e+00> : vector<288x4xf32>
    %16 = tpu.matmul %13, %15, %cst_8 {dimension_numbers = #tpu.dot_dimension_numbers<[1], [0], [0], [1], [0, 0, 1, 1], [], []>} : vector<288x4xf32>, vector<4x4xf32>, vector<288x4xf32> -> vector<288x4xf32>
    %17 = arith.addf %11, %16 : vector<288x4xf32>
    %18 = vector.extract_strided_slice %4 {offsets = [0, 2, 0], sizes = [18, 16, 4], strides = [1, 1, 1]} : vector<20x18x4xf32> to vector<18x16x4xf32>
    %19 = vector.shape_cast %18 : vector<18x16x4xf32> to vector<288x4xf32>
    %c2 = arith.constant 2 : index
    %c0_9 = arith.constant 0 : index
    %c0_10 = arith.constant 0 : index
    %20 = vector.load %arg3[%c2, %c0_9, %c0_10] : memref<9x4x4xf32, #tpu.memory_space<vmem>>, vector<1x4x4xf32>
    %21 = vector.shape_cast %20 : vector<1x4x4xf32> to vector<4x4xf32>
    %cst_11 = arith.constant dense<0.000000e+00> : vector<288x4xf32>
    %22 = tpu.matmul %19, %21, %cst_11 {dimension_numbers = #tpu.dot_dimension_numbers<[1], [0], [0], [1], [0, 0, 1, 1], [], []>} : vector<288x4xf32>, vector<4x4xf32>, vector<288x4xf32> -> vector<288x4xf32>
    %23 = arith.addf %17, %22 : vector<288x4xf32>
    %24 = vector.extract_strided_slice %4 {offsets = [1, 0, 0], sizes = [18, 16, 4], strides = [1, 1, 1]} : vector<20x18x4xf32> to vector<18x16x4xf32>
    %25 = vector.shape_cast %24 : vector<18x16x4xf32> to vector<288x4xf32>
    %c3 = arith.constant 3 : index
    %c0_12 = arith.constant 0 : index
    %c0_13 = arith.constant 0 : index
    %26 = vector.load %arg3[%c3, %c0_12, %c0_13] : memref<9x4x4xf32, #tpu.memory_space<vmem>>, vector<1x4x4xf32>
    %27 = vector.shape_cast %26 : vector<1x4x4xf32> to vector<4x4xf32>
    %cst_14 = arith.constant dense<0.000000e+00> : vector<288x4xf32>
    %28 = tpu.matmul %25, %27, %cst_14 {dimension_numbers = #tpu.dot_dimension_numbers<[1], [0], [0], [1], [0, 0, 1, 1], [], []>} : vector<288x4xf32>, vector<4x4xf32>, vector<288x4xf32> -> vector<288x4xf32>
    %29 = arith.addf %23, %28 : vector<288x4xf32>
    %30 = vector.extract_strided_slice %4 {offsets = [1, 1, 0], sizes = [18, 16, 4], strides = [1, 1, 1]} : vector<20x18x4xf32> to vector<18x16x4xf32>
    %31 = vector.shape_cast %30 : vector<18x16x4xf32> to vector<288x4xf32>
    %c4 = arith.constant 4 : index
    %c0_15 = arith.constant 0 : index
    %c0_16 = arith.constant 0 : index
    %32 = vector.load %arg3[%c4, %c0_15, %c0_16] : memref<9x4x4xf32, #tpu.memory_space<vmem>>, vector<1x4x4xf32>
    %33 = vector.shape_cast %32 : vector<1x4x4xf32> to vector<4x4xf32>
    %cst_17 = arith.constant dense<0.000000e+00> : vector<288x4xf32>
    %34 = tpu.matmul %31, %33, %cst_17 {dimension_numbers = #tpu.dot_dimension_numbers<[1], [0], [0], [1], [0, 0, 1, 1], [], []>} : vector<288x4xf32>, vector<4x4xf32>, vector<288x4xf32> -> vector<288x4xf32>
    %35 = arith.addf %29, %34 : vector<288x4xf32>
    %36 = vector.extract_strided_slice %4 {offsets = [1, 2, 0], sizes = [18, 16, 4], strides = [1, 1, 1]} : vector<20x18x4xf32> to vector<18x16x4xf32>
    %37 = vector.shape_cast %36 : vector<18x16x4xf32> to vector<288x4xf32>
    %c5 = arith.constant 5 : index
    %c0_18 = arith.constant 0 : index
    %c0_19 = arith.constant 0 : index
    %38 = vector.load %arg3[%c5, %c0_18, %c0_19] : memref<9x4x4xf32, #tpu.memory_space<vmem>>, vector<1x4x4xf32>
    %39 = vector.shape_cast %38 : vector<1x4x4xf32> to vector<4x4xf32>
    %cst_20 = arith.constant dense<0.000000e+00> : vector<288x4xf32>
    %40 = tpu.matmul %37, %39, %cst_20 {dimension_numbers = #tpu.dot_dimension_numbers<[1], [0], [0], [1], [0, 0, 1, 1], [], []>} : vector<288x4xf32>, vector<4x4xf32>, vector<288x4xf32> -> vector<288x4xf32>
    %41 = arith.addf %35, %40 : vector<288x4xf32>
    %42 = vector.extract_strided_slice %4 {offsets = [2, 0, 0], sizes = [18, 16, 4], strides = [1, 1, 1]} : vector<20x18x4xf32> to vector<18x16x4xf32>
    %43 = vector.shape_cast %42 : vector<18x16x4xf32> to vector<288x4xf32>
    %c6 = arith.constant 6 : index
    %c0_21 = arith.constant 0 : index
    %c0_22 = arith.constant 0 : index
    %44 = vector.load %arg3[%c6, %c0_21, %c0_22] : memref<9x4x4xf32, #tpu.memory_space<vmem>>, vector<1x4x4xf32>
    %45 = vector.shape_cast %44 : vector<1x4x4xf32> to vector<4x4xf32>
    %cst_23 = arith.constant dense<0.000000e+00> : vector<288x4xf32>
    %46 = tpu.matmul %43, %45, %cst_23 {dimension_numbers = #tpu.dot_dimension_numbers<[1], [0], [0], [1], [0, 0, 1, 1], [], []>} : vector<288x4xf32>, vector<4x4xf32>, vector<288x4xf32> -> vector<288x4xf32>
    %47 = arith.addf %41, %46 : vector<288x4xf32>
    %48 = vector.extract_strided_slice %4 {offsets = [2, 1, 0], sizes = [18, 16, 4], strides = [1, 1, 1]} : vector<20x18x4xf32> to vector<18x16x4xf32>
    %49 = vector.shape_cast %48 : vector<18x16x4xf32> to vector<288x4xf32>
    %c7 = arith.constant 7 : index
    %c0_24 = arith.constant 0 : index
    %c0_25 = arith.constant 0 : index
    %50 = vector.load %arg3[%c7, %c0_24, %c0_25] : memref<9x4x4xf32, #tpu.memory_space<vmem>>, vector<1x4x4xf32>
    %51 = vector.shape_cast %50 : vector<1x4x4xf32> to vector<4x4xf32>
    %cst_26 = arith.constant dense<0.000000e+00> : vector<288x4xf32>
    %52 = tpu.matmul %49, %51, %cst_26 {dimension_numbers = #tpu.dot_dimension_numbers<[1], [0], [0], [1], [0, 0, 1, 1], [], []>} : vector<288x4xf32>, vector<4x4xf32>, vector<288x4xf32> -> vector<288x4xf32>
    %53 = arith.addf %47, %52 : vector<288x4xf32>
    %54 = vector.extract_strided_slice %4 {offsets = [2, 2, 0], sizes = [18, 16, 4], strides = [1, 1, 1]} : vector<20x18x4xf32> to vector<18x16x4xf32>
    %55 = vector.shape_cast %54 : vector<18x16x4xf32> to vector<288x4xf32>
    %c8 = arith.constant 8 : index
    %c0_27 = arith.constant 0 : index
    %c0_28 = arith.constant 0 : index
    %56 = vector.load %arg3[%c8, %c0_27, %c0_28] : memref<9x4x4xf32, #tpu.memory_space<vmem>>, vector<1x4x4xf32>
    %57 = vector.shape_cast %56 : vector<1x4x4xf32> to vector<4x4xf32>
    %cst_29 = arith.constant dense<0.000000e+00> : vector<288x4xf32>
    %58 = tpu.matmul %55, %57, %cst_29 {dimension_numbers = #tpu.dot_dimension_numbers<[1], [0], [0], [1], [0, 0, 1, 1], [], []>} : vector<288x4xf32>, vector<4x4xf32>, vector<288x4xf32> -> vector<288x4xf32>
    %59 = arith.addf %53, %58 : vector<288x4xf32>
    %c0_30 = arith.constant 0 : index
    %c0_31 = arith.constant 0 : index
    %60 = vector.load %arg4[%c0_30, %c0_31] : memref<1x4xf32, #tpu.memory_space<vmem>>, vector<1x4xf32>
    %61 = vector.broadcast %60 : vector<1x4xf32> to vector<288x4xf32>
    %62 = arith.addf %59, %61 : vector<288x4xf32>
    %cst_32 = arith.constant 0.000000e+00 : f32
    %63 = vector.broadcast %cst_32 : f32 to vector<288x4xf32>
    %64 = arith.maximumf %62, %63 : vector<288x4xf32>
    %65 = vector.shape_cast %64 : vector<288x4xf32> to vector<18x16x4xf32>
    %c16_i32_33 = arith.constant 16 : i32
    %66 = arith.muli %arg1, %c16_i32_33 : i32
    %c1_i32 = arith.constant 1 : i32
    %67 = arith.subi %66, %c1_i32 : i32
    %68 = tpu.iota {dimensions = array<i32: 0>} : vector<18x1x1xi32>
    %69 = vector.broadcast %67 : i32 to vector<18x1x1xi32>
    %70 = arith.addi %69, %68 : vector<18x1x1xi32>
    %c0_i32 = arith.constant 0 : i32
    %71 = vector.broadcast %c0_i32 : i32 to vector<18x1x1xi32>
    %72 = arith.cmpi sge, %70, %71 : vector<18x1x1xi32>
    %c16_i32_34 = arith.constant 16 : i32
    %73 = vector.broadcast %c16_i32_34 : i32 to vector<18x1x1xi32>
    %74 = arith.cmpi slt, %70, %73 : vector<18x1x1xi32>
    %75 = arith.andi %72, %74 : vector<18x1x1xi1>
    %cst_35 = arith.constant 0.000000e+00 : f32
    %76 = vector.shape_cast %75 : vector<18x1x1xi1> to vector<18x1x1xi1>
    %77 = vector.broadcast %76 : vector<18x1x1xi1> to vector<18x16x4xi1>
    %78 = vector.broadcast %cst_35 : f32 to vector<18x16x4xf32>
    %79 = arith.select %77, %65, %78 : vector<18x16x4xi1>, vector<18x16x4xf32>
    %cst_36 = arith.constant 0.000000e+00 : f32
    %80 = vector.broadcast %cst_36 : f32 to vector<18x18x4xf32>
    %c0_37 = arith.constant 0 : index
    %c0_38 = arith.constant 0 : index
    %c0_39 = arith.constant 0 : index
    %81 = vector.load %arg8[%c0_37, %c0_38, %c0_39] : memref<18x18x4xf32, #tpu.memory_space<vmem>>, vector<18x18x4xf32>
    tpu.vector_store %arg8[%c0_37, %c0_38, %c0_39], %80 {strides = array<i32>} : memref<18x18x4xf32, #tpu.memory_space<vmem>>, vector<18x18x4xf32>,
    %c0_40 = arith.constant 0 : index
    %c1_41 = arith.constant 1 : index
    %c0_42 = arith.constant 0 : index
    %82 = vector.load %arg8[%c0_40, %c1_41, %c0_42] : memref<18x18x4xf32, #tpu.memory_space<vmem>>, vector<18x16x4xf32>
    tpu.vector_store %arg8[%c0_40, %c1_41, %c0_42], %79 {strides = array<i32>} : memref<18x18x4xf32, #tpu.memory_space<vmem>>, vector<18x16x4xf32>,
    %cst_43 = arith.constant 0.000000e+00 : f32
    %83 = vector.broadcast %cst_43 : f32 to vector<256x4xf32>
    %c0_44 = arith.constant 0 : index
    %c0_45 = arith.constant 0 : index
    %c0_46 = arith.constant 0 : index
    %84 = vector.load %arg8[%c0_44, %c0_45, %c0_46] : memref<18x18x4xf32, #tpu.memory_space<vmem>>, vector<16x16x4xf32>
    %85 = vector.shape_cast %84 : vector<16x16x4xf32> to vector<256x4xf32>
    %c0_47 = arith.constant 0 : index
    %c0_48 = arith.constant 0 : index
    %c0_49 = arith.constant 0 : index
    %86 = vector.load %arg5[%c0_47, %c0_48, %c0_49] : memref<9x4x4xf32, #tpu.memory_space<vmem>>, vector<1x4x4xf32>
    %87 = vector.shape_cast %86 : vector<1x4x4xf32> to vector<4x4xf32>
    %cst_50 = arith.constant dense<0.000000e+00> : vector<256x4xf32>
    %88 = tpu.matmul %85, %87, %cst_50 {dimension_numbers = #tpu.dot_dimension_numbers<[1], [0], [0], [1], [0, 0, 1, 1], [], []>} : vector<256x4xf32>, vector<4x4xf32>, vector<256x4xf32> -> vector<256x4xf32>
    %89 = arith.addf %83, %88 : vector<256x4xf32>
    %c0_51 = arith.constant 0 : index
    %c1_52 = arith.constant 1 : index
    %c0_53 = arith.constant 0 : index
    %90 = vector.load %arg8[%c0_51, %c1_52, %c0_53] : memref<18x18x4xf32, #tpu.memory_space<vmem>>, vector<16x16x4xf32>
    %91 = vector.shape_cast %90 : vector<16x16x4xf32> to vector<256x4xf32>
    %c1_54 = arith.constant 1 : index
    %c0_55 = arith.constant 0 : index
    %c0_56 = arith.constant 0 : index
    %92 = vector.load %arg5[%c1_54, %c0_55, %c0_56] : memref<9x4x4xf32, #tpu.memory_space<vmem>>, vector<1x4x4xf32>
    %93 = vector.shape_cast %92 : vector<1x4x4xf32> to vector<4x4xf32>
    %cst_57 = arith.constant dense<0.000000e+00> : vector<256x4xf32>
    %94 = tpu.matmul %91, %93, %cst_57 {dimension_numbers = #tpu.dot_dimension_numbers<[1], [0], [0], [1], [0, 0, 1, 1], [], []>} : vector<256x4xf32>, vector<4x4xf32>, vector<256x4xf32> -> vector<256x4xf32>
    %95 = arith.addf %89, %94 : vector<256x4xf32>
    %c0_58 = arith.constant 0 : index
    %c2_59 = arith.constant 2 : index
    %c0_60 = arith.constant 0 : index
    %96 = vector.load %arg8[%c0_58, %c2_59, %c0_60] : memref<18x18x4xf32, #tpu.memory_space<vmem>>, vector<16x16x4xf32>
    %97 = vector.shape_cast %96 : vector<16x16x4xf32> to vector<256x4xf32>
    %c2_61 = arith.constant 2 : index
    %c0_62 = arith.constant 0 : index
    %c0_63 = arith.constant 0 : index
    %98 = vector.load %arg5[%c2_61, %c0_62, %c0_63] : memref<9x4x4xf32, #tpu.memory_space<vmem>>, vector<1x4x4xf32>
    %99 = vector.shape_cast %98 : vector<1x4x4xf32> to vector<4x4xf32>
    %cst_64 = arith.constant dense<0.000000e+00> : vector<256x4xf32>
    %100 = tpu.matmul %97, %99, %cst_64 {dimension_numbers = #tpu.dot_dimension_numbers<[1], [0], [0], [1], [0, 0, 1, 1], [], []>} : vector<256x4xf32>, vector<4x4xf32>, vector<256x4xf32> -> vector<256x4xf32>
    %101 = arith.addf %95, %100 : vector<256x4xf32>
    %c1_65 = arith.constant 1 : index
    %c0_66 = arith.constant 0 : index
    %c0_67 = arith.constant 0 : index
    %102 = vector.load %arg8[%c1_65, %c0_66, %c0_67] : memref<18x18x4xf32, #tpu.memory_space<vmem>>, vector<16x16x4xf32>
    %103 = vector.shape_cast %102 : vector<16x16x4xf32> to vector<256x4xf32>
    %c3_68 = arith.constant 3 : index
    %c0_69 = arith.constant 0 : index
    %c0_70 = arith.constant 0 : index
    %104 = vector.load %arg5[%c3_68, %c0_69, %c0_70] : memref<9x4x4xf32, #tpu.memory_space<vmem>>, vector<1x4x4xf32>
    %105 = vector.shape_cast %104 : vector<1x4x4xf32> to vector<4x4xf32>
    %cst_71 = arith.constant dense<0.000000e+00> : vector<256x4xf32>
    %106 = tpu.matmul %103, %105, %cst_71 {dimension_numbers = #tpu.dot_dimension_numbers<[1], [0], [0], [1], [0, 0, 1, 1], [], []>} : vector<256x4xf32>, vector<4x4xf32>, vector<256x4xf32> -> vector<256x4xf32>
    %107 = arith.addf %101, %106 : vector<256x4xf32>
    %c1_72 = arith.constant 1 : index
    %c1_73 = arith.constant 1 : index
    %c0_74 = arith.constant 0 : index
    %108 = vector.load %arg8[%c1_72, %c1_73, %c0_74] : memref<18x18x4xf32, #tpu.memory_space<vmem>>, vector<16x16x4xf32>
    %109 = vector.shape_cast %108 : vector<16x16x4xf32> to vector<256x4xf32>
    %c4_75 = arith.constant 4 : index
    %c0_76 = arith.constant 0 : index
    %c0_77 = arith.constant 0 : index
    %110 = vector.load %arg5[%c4_75, %c0_76, %c0_77] : memref<9x4x4xf32, #tpu.memory_space<vmem>>, vector<1x4x4xf32>
    %111 = vector.shape_cast %110 : vector<1x4x4xf32> to vector<4x4xf32>
    %cst_78 = arith.constant dense<0.000000e+00> : vector<256x4xf32>
    %112 = tpu.matmul %109, %111, %cst_78 {dimension_numbers = #tpu.dot_dimension_numbers<[1], [0], [0], [1], [0, 0, 1, 1], [], []>} : vector<256x4xf32>, vector<4x4xf32>, vector<256x4xf32> -> vector<256x4xf32>
    %113 = arith.addf %107, %112 : vector<256x4xf32>
    %c1_79 = arith.constant 1 : index
    %c2_80 = arith.constant 2 : index
    %c0_81 = arith.constant 0 : index
    %114 = vector.load %arg8[%c1_79, %c2_80, %c0_81] : memref<18x18x4xf32, #tpu.memory_space<vmem>>, vector<16x16x4xf32>
    %115 = vector.shape_cast %114 : vector<16x16x4xf32> to vector<256x4xf32>
    %c5_82 = arith.constant 5 : index
    %c0_83 = arith.constant 0 : index
    %c0_84 = arith.constant 0 : index
    %116 = vector.load %arg5[%c5_82, %c0_83, %c0_84] : memref<9x4x4xf32, #tpu.memory_space<vmem>>, vector<1x4x4xf32>
    %117 = vector.shape_cast %116 : vector<1x4x4xf32> to vector<4x4xf32>
    %cst_85 = arith.constant dense<0.000000e+00> : vector<256x4xf32>
    %118 = tpu.matmul %115, %117, %cst_85 {dimension_numbers = #tpu.dot_dimension_numbers<[1], [0], [0], [1], [0, 0, 1, 1], [], []>} : vector<256x4xf32>, vector<4x4xf32>, vector<256x4xf32> -> vector<256x4xf32>
    %119 = arith.addf %113, %118 : vector<256x4xf32>
    %c2_86 = arith.constant 2 : index
    %c0_87 = arith.constant 0 : index
    %c0_88 = arith.constant 0 : index
    %120 = vector.load %arg8[%c2_86, %c0_87, %c0_88] : memref<18x18x4xf32, #tpu.memory_space<vmem>>, vector<16x16x4xf32>
    %121 = vector.shape_cast %120 : vector<16x16x4xf32> to vector<256x4xf32>
    %c6_89 = arith.constant 6 : index
    %c0_90 = arith.constant 0 : index
    %c0_91 = arith.constant 0 : index
    %122 = vector.load %arg5[%c6_89, %c0_90, %c0_91] : memref<9x4x4xf32, #tpu.memory_space<vmem>>, vector<1x4x4xf32>
    %123 = vector.shape_cast %122 : vector<1x4x4xf32> to vector<4x4xf32>
    %cst_92 = arith.constant dense<0.000000e+00> : vector<256x4xf32>
    %124 = tpu.matmul %121, %123, %cst_92 {dimension_numbers = #tpu.dot_dimension_numbers<[1], [0], [0], [1], [0, 0, 1, 1], [], []>} : vector<256x4xf32>, vector<4x4xf32>, vector<256x4xf32> -> vector<256x4xf32>
    %125 = arith.addf %119, %124 : vector<256x4xf32>
    %c2_93 = arith.constant 2 : index
    %c1_94 = arith.constant 1 : index
    %c0_95 = arith.constant 0 : index
    %126 = vector.load %arg8[%c2_93, %c1_94, %c0_95] : memref<18x18x4xf32, #tpu.memory_space<vmem>>, vector<16x16x4xf32>
    %127 = vector.shape_cast %126 : vector<16x16x4xf32> to vector<256x4xf32>
    %c7_96 = arith.constant 7 : index
    %c0_97 = arith.constant 0 : index
    %c0_98 = arith.constant 0 : index
    %128 = vector.load %arg5[%c7_96, %c0_97, %c0_98] : memref<9x4x4xf32, #tpu.memory_space<vmem>>, vector<1x4x4xf32>
    %129 = vector.shape_cast %128 : vector<1x4x4xf32> to vector<4x4xf32>
    %cst_99 = arith.constant dense<0.000000e+00> : vector<256x4xf32>
    %130 = tpu.matmul %127, %129, %cst_99 {dimension_numbers = #tpu.dot_dimension_numbers<[1], [0], [0], [1], [0, 0, 1, 1], [], []>} : vector<256x4xf32>, vector<4x4xf32>, vector<256x4xf32> -> vector<256x4xf32>
    %131 = arith.addf %125, %130 : vector<256x4xf32>
    %c2_100 = arith.constant 2 : index
    %c2_101 = arith.constant 2 : index
    %c0_102 = arith.constant 0 : index
    %132 = vector.load %arg8[%c2_100, %c2_101, %c0_102] : memref<18x18x4xf32, #tpu.memory_space<vmem>>, vector<16x16x4xf32>
    %133 = vector.shape_cast %132 : vector<16x16x4xf32> to vector<256x4xf32>
    %c8_103 = arith.constant 8 : index
    %c0_104 = arith.constant 0 : index
    %c0_105 = arith.constant 0 : index
    %134 = vector.load %arg5[%c8_103, %c0_104, %c0_105] : memref<9x4x4xf32, #tpu.memory_space<vmem>>, vector<1x4x4xf32>
    %135 = vector.shape_cast %134 : vector<1x4x4xf32> to vector<4x4xf32>
    %cst_106 = arith.constant dense<0.000000e+00> : vector<256x4xf32>
    %136 = tpu.matmul %133, %135, %cst_106 {dimension_numbers = #tpu.dot_dimension_numbers<[1], [0], [0], [1], [0, 0, 1, 1], [], []>} : vector<256x4xf32>, vector<4x4xf32>, vector<256x4xf32> -> vector<256x4xf32>
    %137 = arith.addf %131, %136 : vector<256x4xf32>
    %138 = vector.extract_strided_slice %4 {offsets = [2, 1, 0], sizes = [16, 16, 4], strides = [1, 1, 1]} : vector<20x18x4xf32> to vector<16x16x4xf32>
    %139 = vector.shape_cast %137 : vector<256x4xf32> to vector<16x16x4xf32>
    %c0_107 = arith.constant 0 : index
    %c0_108 = arith.constant 0 : index
    %140 = vector.load %arg6[%c0_107, %c0_108] : memref<1x4xf32, #tpu.memory_space<vmem>>, vector<1x4xf32>
    %141 = vector.shape_cast %140 : vector<1x4xf32> to vector<1x1x4xf32>
    %142 = vector.broadcast %141 : vector<1x1x4xf32> to vector<16x16x4xf32>
    %143 = arith.addf %139, %142 : vector<16x16x4xf32>
    %144 = arith.addf %143, %138 : vector<16x16x4xf32>
    %cst_109 = arith.constant 0.000000e+00 : f32
    %145 = vector.broadcast %cst_109 : f32 to vector<16x16x4xf32>
    %146 = arith.maximumf %144, %145 : vector<16x16x4xf32>
    %c0_110 = arith.constant 0 : index
    %c0_111 = arith.constant 0 : index
    %c0_112 = arith.constant 0 : index
    %c0_113 = arith.constant 0 : index
    %147 = vector.load %arg7[%c0_110, %c0_111, %c0_112, %c0_113] : memref<1x16x16x4xf32, #tpu.memory_space<vmem>>, vector<1x16x16x4xf32>
    %148 = vector.shape_cast %147 : vector<1x16x16x4xf32> to vector<16x16x4xf32>
    %149 = vector.shape_cast %146 : vector<16x16x4xf32> to vector<1x16x16x4xf32>
    tpu.vector_store %arg7[%c0_110, %c0_111, %c0_112, %c0_113], %149 {strides = array<i32>} : memref<1x16x16x4xf32, #tpu.memory_space<vmem>>, vector<1x16x16x4xf32>,
    return
  }
  func.func @transform_0(%arg0: i32, %arg1: i32) -> (i32, i32, i32, i32) {
    %c0_i32 = arith.constant 0 : i32
    %c0_i32_0 = arith.constant 0 : i32
    %c0_i32_1 = arith.constant 0 : i32
    %c0_i32_2 = arith.constant 0 : i32
    return %arg0, %c0_i32, %c0_i32_0, %c0_i32_1 : i32, i32, i32, i32
  }
  func.func @transform_1(%arg0: i32, %arg1: i32) -> (i32, i32, i32) {
    %c0_i32 = arith.constant 0 : i32
    %c0_i32_0 = arith.constant 0 : i32
    %c0_i32_1 = arith.constant 0 : i32
    %c0_i32_2 = arith.constant 0 : i32
    return %c0_i32, %c0_i32_0, %c0_i32_1 : i32, i32, i32
  }
  func.func @transform_2(%arg0: i32, %arg1: i32) -> (i32, i32) {
    %c0_i32 = arith.constant 0 : i32
    %c0_i32_0 = arith.constant 0 : i32
    %c0_i32_1 = arith.constant 0 : i32
    return %c0_i32, %c0_i32_0 : i32, i32
  }
  func.func @transform_3(%arg0: i32, %arg1: i32) -> (i32, i32, i32) {
    %c0_i32 = arith.constant 0 : i32
    %c0_i32_0 = arith.constant 0 : i32
    %c0_i32_1 = arith.constant 0 : i32
    %c0_i32_2 = arith.constant 0 : i32
    return %c0_i32, %c0_i32_0, %c0_i32_1 : i32, i32, i32
  }
  func.func @transform_4(%arg0: i32, %arg1: i32) -> (i32, i32) {
    %c0_i32 = arith.constant 0 : i32
    %c0_i32_0 = arith.constant 0 : i32
    %c0_i32_1 = arith.constant 0 : i32
    return %c0_i32, %c0_i32_0 : i32, i32
  }
  func.func @transform_5(%arg0: i32, %arg1: i32) -> (i32, i32, i32, i32) {
    %c0_i32 = arith.constant 0 : i32
    %c0_i32_0 = arith.constant 0 : i32
    %c0_i32_1 = arith.constant 0 : i32
    return %arg0, %arg1, %c0_i32, %c0_i32_0 : i32, i32, i32, i32
  }
}

</mosaic_0001>

<bundles_post_ra>
// kernel: basic_block_forward.1
= control target key start
LH: loop header
LB: loop body
LE: loop exit
PB: predicated region body
PF: predicated region fallthrough
CT: control target
= control target key end

     0   :  { %s10177_s18 = smov 0   ;;  %s10179_s19 = smov 0   ;;  %s12519_s0 = inlined_call_operand.vmem [shape: f32[2,20,18,4], index: 0, kind: input, shape index: {}]   ;;  %s12520_s1 = inlined_call_operand.vmem [shape: f32[9,4,4], index: 1, kind: input, shape index: {}]   ;;  %s12521_s2 = inlined_call_operand.vmem [shape: f32[1,4], index: 2, kind: input, shape index: {}]   ;;  %s12522_s3 = inlined_call_operand.vmem [shape: f32[9,4,4], index: 3, kind: input, shape index: {}]   ;;  %s12523_s4 = inlined_call_operand.vmem [shape: f32[1,4], index: 4, kind: input, shape index: {}]   ;;  %s12524_s5 = inlined_call_operand.vmem [shape: f32[2,16,16,4], index: 5, kind: output, shape index: {}]  }
   0x1   :  { %s10181_s20 = smov 0  }
   0x2 LB: > { %s27_s21 = sadd.s32 1, %s10140_s19  ;;  %p7340_p0 = scmp.ge.s32.totalorder %s10144_s20, 1  ;;  %s10144_s20 = sphi %s10181_s20, %s15_s20   ;;  %s10140_s19 = sphi %s10179_s19, %s12967_s19   ;;  %s10136_s18 = sphi %s10177_s18, %s12966_s18  }
   0x3   : > { %p29_p1 = scmp.ge.s32.totalorder %s27_s21, 2  ;;  %p201_p2 = scmp.lt.s32.totalorder %s10144_s20, 3 }
   0x5   : > { %s12969_s21 = smov (%p29_p1, %s27_s21), 0  ;;  %p202_p3 = pnand %p7340_p0, %p201_p2 }
   0x7   : > { %205 = sbr.rel (%p202_p3) target bundleno = 1585 (0x631), region = 40 }
   0xe   : > { %v7344_v0 = vld [vmem:[%s12520_s1 + $0x4] sm:$0xf]  ;;  %vm534_vm0 = vcmask 1043456   ;;  %p234_p4 = scmp.lt.s32.totalorder %s10136_s18, 1  ;;  %v313_v1 = vld [vmem:[%s12520_s1] sm:$0xf] }
   0xf   : > { %8625 = vmatprep.subr.msk.mxu0 %vm534_vm0, %v7344_v0  ;;  %9579 = vmatprep.subr.msk.mxu1 %vm534_vm0, %v7344_v0  ;;  %vm368_vm1 = vcmask 1046528   ;;  %vm461_vm2 = vcmask 31744   ;;  %v10261_v24 = vld [vmem:[%s12520_s1 + $0x8] sm:$0xf]  ;;  %vm1103_vm3 = vcmask 1045504   ;;  %vm3544_vm4 = vcmask 25600  }
  0x10   : > { %8626 = vmatpush3.msk.msra.mxu0 %vm534_vm0, %v7344_v0  ;;  %s12971_s18 = smov (!%p234_p4, %s10136_s18), 1  ;;  %9580 = vmatpush3.msk.msra.mxu1 %vm534_vm0, %v7344_v0 }
  0x11   : > { %8681 = vmatprep.subr.msk.mxu0 %vm534_vm0, %v313_v1  ;;  %s10093_s26 = smul.u32 480, %s12971_s18  ;;  %s7994_s24 = sshll.u32 %s12971_s18, 8 }
  0x12   : > { %s12383_s27 = scalar_lea.vmem %s12524_s5, %s7994_s24 }
  0x13   : > { %s10212_s29 = scalar_lea.vmem %s12519_s0, %s10093_s26 }
  0x14   : > { %v10215_v2 = vld [vmem:[%s10212_s29] sm:$0xff]  ;;  %v10218_v3 = vld [vmem:[%s10212_s29 + $0x8] sm:$0xff]  ;;  %v255_v4 = vld [vmem:[%s10212_s29 + $0x10] sm:$0x3] }
  0x15   : > { %v369_v5 = vrot.slane %v10215_v2, 1  ;;  %v370_v6 = vrot.slane %v10218_v3, 1  ;;  %v372_v7 = vrot.slane %v255_v4, 1  ;;  %v10224_v8 = vld [vmem:[%s10212_s29 + $0x18] sm:$0xff]  ;;  %v10227_v9 = vld [vmem:[%s10212_s29 + $0x20] sm:$0xff]  ;;  %v10235_v13 = vld [vmem:[%s10212_s29 + $0x30] sm:$0xff] }
  0x16   : > { %v374_v10 = vrot.slane %v10224_v8, 1  ;;  %v375_v11 = vrot.slane %v10227_v9, 1  ;;  %v10232_v12 = vld [vmem:[%s10212_s29 + $0x28] sm:$0x3]  ;;  %v10238_v14 = vld [vmem:[%s10212_s29 + $0x38] sm:$0xff]  ;;  %v379_v18 = vrot.slane %v10235_v13, 1 }
  0x17   : > { %v371_v15 = vsel %vm368_vm1, %v369_v5, %v370_v6  ;;  %v373_v16 = vsel %vm368_vm1, %v370_v6, %v372_v7  ;;  %v377_v17 = vrot.slane %v10232_v12, 1  ;;  %v10245_v19 = vld [vmem:[%s10212_s29 + $0x40] sm:$0x3]  ;;  %v380_v21 = vrot.slane %v10238_v14, 1  ;;  %v10253_v22 = vld [vmem:[%s10212_s29 + $0x48] sm:$0xff]  ;;  %v10256_v23 = vld [vmem:[%s10212_s29 + $0x50] sm:$0xff] }
  0x18   : > { %8627 = vmatprep.mubr.msk.f32.mxu0 %vm461_vm2, %v371_v15  ;;  %v10249_v20 = vsel %vm368_vm1, %v374_v10, %v375_v11  ;;  %v382_v26 = vrot.slane %v10245_v19, 1  ;;  %v384_v28 = vrot.slane %v10253_v22, 1  ;;  %v385_v29 = vrot.slane %v10256_v23, 1  ;;  %v10277_v30 = vld [vmem:[%s10212_s29 + $0x58] sm:$0x3]  ;;  %v10282_v31 = vld [vmem:[%s10212_s29 + $0x60] sm:$0xff] }
  0x19   : > { %8628 = vmatmul.mubr.msk.f32.vlgmr.msra.gmra.mrb[0].mxu0 %vm461_vm2, %v373_v16  ;;  %v10268_v25 = vsel %vm368_vm1, %v375_v11, %v377_v17  ;;  %v10272_v27 = vsel %vm368_vm1, %v379_v18, %v380_v21  ;;  %v10285_v32 = vld [vmem:[%s10212_s29 + $0x68] sm:$0xff]  ;;  %v1107_v33 = vrot.slane %v255_v4, 2  ;;  %v387_v35 = vrot.slane %v10277_v30, 1  ;;  %v10301_v39 = vld [vmem:[%s10212_s29 + $0x70] sm:$0x3]  ;;  %v10304_v40 = vld [vmem:[%s10212_s29 + $0x78] sm:$0xff] }
  0x1a   : > { %8682 = vmatpush3.msk.msra.mxu0 %vm534_vm0, %v313_v1  ;;  %8630 = vmatprep.mubr.msk.f32.mxu0 %vm461_vm2, %v10249_v20  ;;  %12707 = vst [vmem:[#allocation3_spill] sm:$0xff] %v10272_v27  ;;  %v10292_v34 = vsel %vm368_vm1, %v380_v21, %v382_v26  ;;  %v10296_v36 = vsel %vm368_vm1, %v384_v28, %v385_v29  ;;  %v389_v37 = vrot.slane %v10282_v31, 1  ;;  %v390_v38 = vrot.slane %v10285_v32, 1  ;;  %v10307_v41 = vld [vmem:[%s10212_s29 + $0x80] sm:$0xff]  ;;  %v10331_v51 = vld [vmem:[%s10212_s29 + $0x88] sm:$0x3] }
  0x1b   : > { %8737 = vmatprep.subr.msk.mxu0 %vm534_vm0, %v10261_v24  ;;  %12708 = vst [vmem:[#allocation4_spill] sm:$0xff] %v10292_v34  ;;  %12709 = vst [vmem:[#allocation5_spill] sm:$0xff] %v10296_v36  ;;  %v1104_v42 = vrot.slane %v10215_v2, 2  ;;  %v1105_v43 = vrot.slane %v10218_v3, 2  ;;  %v10316_v44 = vsel %vm368_vm1, %v385_v29, %v387_v35  ;;  %v392_v45 = vrot.slane %v10301_v39, 1  ;;  %v10334_v52 = vld [vmem:[%s10212_s29 + $0x90] sm:$0xff] }
  0x1c   : > { %12710 = vst [vmem:[#allocation6_spill] sm:$0xff] %v10316_v44  ;;  %v10326_v48 = vsel %vm368_vm1, %v389_v37, %v390_v38  ;;  %v394_v49 = vrot.slane %v10304_v40, 1  ;;  %v395_v50 = vrot.slane %v10307_v41, 1  ;;  %v10337_v53 = vld [vmem:[%s10212_s29 + $0x98] sm:$0xff]  ;;  %v397_v55 = vrot.slane %v10331_v51, 1  ;;  %v10356_v60 = vld [vmem:[%s10212_s29 + $0xa8] sm:$0xff] }
  0x1d   : > { %8631 = vmatmul.mubr.msk.f32.gmra.mrb[2].mxu0 %vm461_vm2, %v10268_v25  ;;  %v10320_v46 = vsel %vm1103_vm3, %v1104_v42, %v1105_v43  ;;  %v10323_v47 = vsel %vm1103_vm3, %v1105_v43, %v1107_v33  ;;  %12711 = vst [vmem:[#allocation7_spill] sm:$0xff] %v10326_v48  ;;  %v10344_v54 = vsel %vm368_vm1, %v390_v38, %v392_v45  ;;  %v399_v57 = vrot.slane %v10334_v52, 1  ;;  %v10353_v59 = vld [vmem:[%s10212_s29 + $0xa0] sm:$0x3]  ;;  %v10359_v61 = vld [vmem:[%s10212_s29 + $0xb0] sm:$0xff]  ;;  %v10381_v7 = vld [vmem:[%s10212_s29 + $0xc8] sm:$0xff] }
  0x1e   : > { %8633 = vmatprep.mubr.msk.f32.mxu0 %vm461_vm2, %v10272_v27  ;;  %12712 = vst [vmem:[#allocation8_spill] sm:$0xff] %v10344_v54  ;;  %v10348_v56 = vsel %vm368_vm1, %v394_v49, %v395_v50  ;;  %v400_v58 = vrot.slane %v10337_v53, 1  ;;  %v10366_v62 = vsel %vm368_vm1, %v395_v50, %v397_v55  ;;  %v402_v63 = vrot.slane %v10353_v59, 1  ;;  %v10375_v5 = vld [vmem:[%s10212_s29 + $0xb8] sm:$0x3]  ;;  %v10378_v6 = vld [vmem:[%s10212_s29 + $0xc0] sm:$0xff] }
  0x1f   : > { %12713 = vst [vmem:[#allocation9_spill] sm:$0xff] %v10348_v56  ;;  %12714 = vst [vmem:[#allocation10_spill] sm:$0xff] %v10366_v62  ;;  %v404_v1 = vrot.slane %v10356_v60, 1  ;;  %v405_v4 = vrot.slane %v10359_v61, 1  ;;  %v407_v11 = vrot.slane %v10375_v5, 1  ;;  %v409_v16 = vrot.slane %v10378_v6, 1 }
  0x20   : > { %v10370_v0 = vsel %vm368_vm1, %v399_v57, %v400_v58  ;;  %v10388_v10 = vsel %vm368_vm1, %v400_v58, %v402_v63  ;;  %v410_v17 = vrot.slane %v10381_v7, 1  ;;  %v10397_v18 = vld [vmem:[%s10212_s29 + $0xd0] sm:$0x3]  ;;  %v10424_v33 = vld [vmem:[%s12520_s1 + $0xc] sm:$0xf]  ;;  %v10480_v35 = vld [vmem:[%s10212_s29 + $0xf8] sm:$0xff] }
  0x21   : > { %8634 = vmatmul.mubr.msk.f32.gmra.mrb[4].mxu0 %vm461_vm2, %v10292_v34  ;;  %12715 = vst [vmem:[#allocation11_spill] sm:$0xff] %v10370_v0  ;;  %12716 = vst [vmem:[#allocation12_spill] sm:$0xff] %v10388_v10  ;;  %v10392_v15 = vsel %vm368_vm1, %v404_v1, %v405_v4  ;;  %v10404_v21 = vsel %vm368_vm1, %v405_v4, %v407_v11  ;;  %v412_v26 = vrot.slane %v10397_v18, 1  ;;  %v10483_v37 = vld [vmem:[%s10212_s29 + $0x108] sm:$0xff]  ;;  %v10490_v38 = vld [vmem:[%s10212_s29 + $0x110] sm:$0xff] }
  0x22   : > { %8636 = vmatprep.mubr.msk.f32.mxu0 %vm461_vm2, %v10296_v36  ;;  %12717 = vst [vmem:[#allocation13_spill] sm:$0xff] %v10392_v15  ;;  %12718 = vst [vmem:[#allocation14_spill] sm:$0xff] %v10404_v21  ;;  %v10408_v28 = vsel %vm368_vm1, %v409_v16, %v410_v17  ;;  %v10493_v42 = vld [vmem:[%s10212_s29 + $0x120] sm:$0xff]  ;;  %v10500_v43 = vld [vmem:[%s10212_s29 + $0x128] sm:$0xff]  ;;  %v1109_v16 = vrot.slane %v10224_v8, 2 }
  0x23   : > { %12719 = vst [vmem:[#allocation15_spill] sm:$0xff] %v10408_v28  ;;  %v10415_v29 = vsel %vm368_vm1, %v410_v17, %v412_v26  ;;  %v10503_v45 = vld [vmem:[%s10212_s29 + $0x138] sm:$0xff]  ;;  %v10510_v49 = vld [vmem:[%s10212_s29 + $0x140] sm:$0xff]  ;;  %v10513_v50 = vld [vmem:[%s10212_s29 + $0x150] sm:$0xff]  ;;  %v1110_v17 = vrot.slane %v10227_v9, 2  ;;  %v1112_v26 = vrot.slane %v10232_v12, 2 }
  0x24   : > { %12720 = vst [vmem:[#allocation16_spill] sm:$0xff] %v10415_v29  ;;  %v10520_v55 = vld [vmem:[%s10212_s29 + $0x158] sm:$0xff]  ;;  %v10523_v57 = vld [vmem:[%s10212_s29 + $0x168] sm:$0xff]  ;;  %v10530_v58 = vld [vmem:[%s10212_s29 + $0x170] sm:$0xff] }
  0x25   : > { %8637 = vmatmul.mubr.msk.f32.gmra.mrb[6].mxu0 %vm461_vm2, %v10316_v44  ;;  %v10533_v63 = vld [vmem:[%s10212_s29 + $0x180] sm:$0xff]  ;;  %v10540_v1 = vld [vmem:[%s10212_s29 + $0x188] sm:$0xff]  ;;  %v10543_v4 = vld [vmem:[%s10212_s29 + $0x198] sm:$0xff]  ;;  %v10576_v12 = vsel %vm1103_vm3, %v1110_v17, %v1112_v26 }
  0x26   : > { %8639 = vmatprep.mubr.msk.f32.mxu0 %vm461_vm2, %v10326_v48  ;;  %v10550_v11 = vld [vmem:[%s10212_s29 + $0x1a0] sm:$0xff]  ;;  %12722 = vst [vmem:[#allocation18_spill] sm:$0xff] %v10576_v12 }
  0x29   : > { %8640 = vmatmul.mubr.msk.f32.gmra.mrb[8].mxu0 %vm461_vm2, %v10344_v54 }
  0x2a   : > { %8642 = vmatprep.mubr.msk.f32.mxu0 %vm461_vm2, %v10348_v56 }
  0x2d   : > { %8643 = vmatmul.mubr.msk.f32.gmra.mrb[10].mxu0 %vm461_vm2, %v10366_v62 }
  0x2e   : > { %8645 = vmatprep.mubr.msk.f32.mxu0 %vm461_vm2, %v10370_v0  ;;  %v1120_v0 = vrot.slane %v10256_v23, 2 }
  0x31   : > { %8646 = vmatmul.mubr.msk.f32.gmra.mrb[12].mxu0 %vm461_vm2, %v10388_v10  ;;  %v1119_v10 = vrot.slane %v10253_v22, 2 }
  0x32   : > { %8648 = vmatprep.mubr.msk.f32.mxu0 %vm461_vm2, %v10392_v15  ;;  %v10567_v15 = vld [vmem:[%s12520_s1 + $0x10] sm:$0xf] }
  0x35   : > { %8649 = vmatmul.mubr.msk.f32.gmra.mrb[14].mxu0 %vm461_vm2, %v10404_v21  ;;  %v1115_v21 = vrot.slane %v10238_v14, 2 }
  0x36   : > { %8651 = vmatprep.mubr.msk.f32.mxu0 %vm461_vm2, %v10408_v28  ;;  %v1114_v28 = vrot.slane %v10235_v13, 2 }
  0x39   : > { %8652 = vmatmul.mubr.msk.f32.gmra.mrb[16].mxu0 %vm461_vm2, %v10415_v29  ;;  %v10560_v29 = vsel %vm1103_vm3, %v1109_v16, %v1110_v17  ;;  %v10580_v16 = vsel %vm1103_vm3, %v1114_v28, %v1115_v21  ;;  %v10595_v28 = vsel %vm1103_vm3, %v1119_v10, %v1120_v0  ;;  %v1125_v17 = vrot.slane %v10285_v32, 2 }
  0x3a   : > { %8683 = vmatprep.mubr.msk.f32.mxu0 %vm461_vm2, %v10215_v2  ;;  %v10463_v2 = vld [vmem:[%s10212_s29 + $0xd8] sm:$0xff]  ;;  %12721 = vst [vmem:[#allocation17_spill] sm:$0xff] %v10560_v29  ;;  %12723 = vst [vmem:[#allocation19_spill] sm:$0xff] %v10580_v16  ;;  %v1129_v10 = vrot.slane %v10304_v40, 2 }
  0x3b   : > { %12725 = vst [vmem:[#allocation21_spill] sm:$0xff] %v10595_v28 }
  0x3d   : > { %8684 = vmatmul.mubr.msk.f32.vlgmr.msra.gmra.mrb[18].mxu0 %vm461_vm2, %v10218_v3  ;;  %v10470_v3 = vld [vmem:[%s10212_s29 + $0xe0] sm:$0xff] }
  0x3e   : > { %8738 = vmatpush3.msk.msra.mxu0 %vm534_vm0, %v10261_v24  ;;  %8686 = vmatprep.mubr.msk.f32.mxu0 %vm461_vm2, %v10224_v8  ;;  %v10473_v24 = vld [vmem:[%s10212_s29 + $0xf0] sm:$0xff] }
  0x3f   : > { %8793 = vmatprep.subr.msk.mxu0 %vm534_vm0, %v10424_v33 }
  0x41   : > { %8687 = vmatmul.mubr.msk.f32.gmra.mrb[2].mxu0 %vm461_vm2, %v10227_v9 }
  0x42   : > { %8689 = vmatprep.mubr.msk.f32.mxu0 %vm461_vm2, %v10235_v13 }
  0x45   : > { %8690 = vmatmul.mubr.msk.f32.gmra.mrb[4].mxu0 %vm461_vm2, %v10238_v14 }
  0x46   : > { %8692 = vmatprep.mubr.msk.f32.mxu0 %vm461_vm2, %v10253_v22 }
  0x49   : > { %8693 = vmatmul.mubr.msk.f32.gmra.mrb[6].mxu0 %vm461_vm2, %v10256_v23 }
  0x4a   : > { %8695 = vmatprep.mubr.msk.f32.mxu0 %vm461_vm2, %v10282_v31 }
  0x4d   : > { %8696 = vmatmul.mubr.msk.f32.gmra.mrb[8].mxu0 %vm461_vm2, %v10285_v32 }
  0x4e   : > { %8698 = vmatprep.mubr.msk.f32.mxu0 %vm461_vm2, %v10304_v40 }
  0x51   : > { %8699 = vmatmul.mubr.msk.f32.gmra.mrb[10].mxu0 %vm461_vm2, %v10307_v41 }
  0x52   : > { %8701 = vmatprep.mubr.msk.f32.mxu0 %vm461_vm2, %v10334_v52 }
  0x55   : > { %8702 = vmatmul.mubr.msk.f32.gmra.mrb[12].mxu0 %vm461_vm2, %v10337_v53 }
  0x56   : > { %8704 = vmatprep.mubr.msk.f32.mxu0 %vm461_vm2, %v10356_v60 }
  0x59   : > { %8705 = vmatmul.mubr.msk.f32.gmra.mrb[14].mxu0 %vm461_vm2, %v10359_v61 }
  0x5a   : > { %8707 = vmatprep.mubr.msk.f32.mxu0 %vm461_vm2, %v10378_v6 }
  0x5d   : > { %8708 = vmatmul.mubr.msk.f32.gmra.mrb[16].mxu0 %vm461_vm2, %v10381_v7 }
  0x5e   : > { %8710 = vmatprep.mubr.msk.f32.mxu0 %vm461_vm2, %v10463_v2 }
  0x61   : > { %8711 = vmatmul.mubr.msk.f32.gmra.mrb[20].mxu0 %vm461_vm2, %v10470_v3 }
  0x62   : > { %8713 = vmatprep.mubr.msk.f32.mxu0 %vm461_vm2, %v10473_v24 }
  0x65   : > { %8714 = vmatmul.mubr.msk.f32.gmra.mrb[22].mxu0 %vm461_vm2, %v10480_v35 }
  0x66   : > { %8716 = vmatprep.mubr.msk.f32.mxu0 %vm461_vm2, %v10483_v37 }
  0x69   : > { %8717 = vmatmul.mubr.msk.f32.gmra.mrb[24].mxu0 %vm461_vm2, %v10490_v38 }
  0x6a   : > { %8719 = vmatprep.mubr.msk.f32.mxu0 %vm461_vm2, %v10493_v42 }
  0x6d   : > { %8720 = vmatmul.mubr.msk.f32.gmra.mrb[26].mxu0 %vm461_vm2, %v10500_v43 }
  0x6e   : > { %8722 = vmatprep.mubr.msk.f32.mxu0 %vm461_vm2, %v10503_v45 }
  0x71   : > { %8723 = vmatmul.mubr.msk.f32.gmra.mrb[28].mxu0 %vm461_vm2, %v10510_v49 }
  0x72   : > { %8725 = vmatprep.mubr.msk.f32.mxu0 %vm461_vm2, %v10513_v50 }
  0x75   : > { %8726 = vmatmul.mubr.msk.f32.gmra.mrb[30].mxu0 %vm461_vm2, %v10520_v55 }
  0x76   : > { %8728 = vmatprep.mubr.msk.f32.mxu0 %vm461_vm2, %v10523_v57 }
  0x79   : > { %8729 = vmatmul.mubr.msk.f32.gmra.mrb[32].mxu0 %vm461_vm2, %v10530_v58 }
  0x7a   : > { %8731 = vmatprep.mubr.msk.f32.mxu0 %vm461_vm2, %v10533_v63 }
  0x7d   : > { %8732 = vmatmul.mubr.msk.f32.gmra.mrb[34].mxu0 %vm461_vm2, %v10540_v1 }
  0x7e   : > { %8734 = vmatprep.mubr.msk.f32.mxu0 %vm461_vm2, %v10543_v4 }
  0x81   : > { %8735 = vmatmul.mubr.msk.f32.gmra.mrb[36].mxu0 %vm461_vm2, %v10550_v11 }
  0x82   : > { %8739 = vmatprep.mubr.msk.f32.mxu0 %vm461_vm2, %v10320_v46  ;;  %v1117_v46 = vrot.slane %v10245_v19, 2  ;;  %v1122_v19 = vrot.slane %v10277_v30, 2 }
  0x84   : > { %v10604_v26 = vsel %vm1103_vm3, %v1120_v0, %v1122_v19  ;;  %v1132_v0 = vrot.slane %v10331_v51, 2  ;;  %v1134_v19 = vrot.slane %v10334_v52, 2 }
  0x85   : > { %8740 = vmatmul.mubr.msk.f32.vlgmr.msra.gmra.mrb[38].mxu0 %vm461_vm2, %v10323_v47  ;;  %v10591_v47 = vsel %vm1103_vm3, %v1115_v21, %v1117_v46  ;;  %12726 = vst [vmem:[#allocation22_spill] sm:$0xff] %v10604_v26  ;;  %v1127_v21 = vrot.slane %v10301_v39, 2  ;;  %v1130_v46 = vrot.slane %v10307_v41, 2 }
  0x86   : > { %8794 = vmatpush3.msk.msra.mxu0 %vm534_vm0, %v10424_v33  ;;  %8742 = vmatprep.mubr.msk.f32.mxu0 %vm461_vm2, %v10560_v29  ;;  %12724 = vst [vmem:[#allocation20_spill] sm:$0xff] %v10591_v47  ;;  %v1124_v33 = vrot.slane %v10282_v31, 2  ;;  %v10738_v29 = vld [vmem:[%s10212_s29 + $0x160] sm:$0x3] }
  0x87   : > { %8849 = vmatprep.subr.msk.mxu0 %vm534_vm0, %v10567_v15  ;;  %v10621_v39 = vsel %vm1103_vm3, %v1129_v10, %v1130_v46  ;;  %v1140_v10 = vrot.slane %v10359_v61, 2 }
  0x88   : > { %v10608_v30 = vsel %vm1103_vm3, %v1124_v33, %v1125_v17  ;;  %12729 = vst [vmem:[#allocation25_spill] sm:$0xff] %v10621_v39  ;;  %v1135_v33 = vrot.slane %v10337_v53, 2 }
  0x89   : > { %8743 = vmatmul.mubr.msk.f32.gmra.mrb[2].mxu0 %vm461_vm2, %v10576_v12  ;;  %12727 = vst [vmem:[#allocation23_spill] sm:$0xff] %v10608_v30  ;;  %v1174_v12 = vrot.slane %v10513_v50, 2 }
  0x8a   : > { %8745 = vmatprep.mubr.msk.f32.mxu0 %vm461_vm2, %v10580_v16  ;;  %v10634_v51 = vsel %vm1103_vm3, %v1134_v19, %v1135_v33  ;;  %v1145_v19 = vrot.slane %v10381_v7, 2 }
  0x8b   : > { %12731 = vst [vmem:[#allocation27_spill] sm:$0xff] %v10634_v51 }
  0x8d   : > { %8746 = vmatmul.mubr.msk.f32.gmra.mrb[4].mxu0 %vm461_vm2, %v10591_v47  ;;  %v10720_v47 = vld [vmem:[%s10212_s29 + $0x148] sm:$0x3] }
  0x8e   : > { %8748 = vmatprep.mubr.msk.f32.mxu0 %vm461_vm2, %v10595_v28  ;;  %v10617_v28 = vsel %vm1103_vm3, %v1125_v17, %v1127_v21  ;;  %v1137_v17 = vrot.slane %v10353_v59, 2  ;;  %v1139_v21 = vrot.slane %v10356_v60, 2 }
  0x8f   : > { %12728 = vst [vmem:[#allocation24_spill] sm:$0xff] %v10617_v28 }
  0x90   : > { %v10647_v59 = vsel %vm1103_vm3, %v1139_v21, %v1140_v10  ;;  %v1150_v21 = vrot.slane %v10470_v3, 2 }
  0x91   : > { %8749 = vmatmul.mubr.msk.f32.gmra.mrb[6].mxu0 %vm461_vm2, %v10604_v26  ;;  %12733 = vst [vmem:[#allocation29_spill] sm:$0xff] %v10647_v59  ;;  %v10704_v26 = vld [vmem:[%s10212_s29 + $0x130] sm:$0x3] }
  0x92   : > { %8751 = vmatprep.mubr.msk.f32.mxu0 %vm461_vm2, %v10608_v30  ;;  %v10630_v30 = vsel %vm1103_vm3, %v1130_v46, %v1132_v0  ;;  %v1142_v46 = vrot.slane %v10375_v5, 2  ;;  %v1144_v0 = vrot.slane %v10378_v6, 2 }
  0x93   : > { %12730 = vst [vmem:[#allocation26_spill] sm:$0xff] %v10630_v30 }
  0x94   : > { %v10660_v5 = vsel %vm1103_vm3, %v1144_v0, %v1145_v19  ;;  %v1154_v0 = vrot.slane %v10473_v24, 2 }
  0x95   : > { %8752 = vmatmul.mubr.msk.f32.gmra.mrb[8].mxu0 %vm461_vm2, %v10617_v28  ;;  %12735 = vst [vmem:[#allocation31_spill] sm:$0xff] %v10660_v5  ;;  %v288_v28 = vld [vmem:[%s10212_s29 + $0x118] sm:$0x3] }
  0x96   : > { %8754 = vmatprep.mubr.msk.f32.mxu0 %vm461_vm2, %v10621_v39  ;;  %v10643_v39 = vsel %vm1103_vm3, %v1135_v33, %v1137_v17  ;;  %v1147_v33 = vrot.slane %v10397_v18, 2  ;;  %v1149_v17 = vrot.slane %v10463_v2, 2 }
  0x97   : > { %12732 = vst [vmem:[#allocation28_spill] sm:$0xff] %v10643_v39 }
  0x98   : > { %v10673_v18 = vsel %vm1103_vm3, %v1149_v17, %v1150_v21  ;;  %v1159_v17 = vrot.slane %v10483_v37, 2 }
  0x99   : > { %8755 = vmatmul.mubr.msk.f32.gmra.mrb[10].mxu0 %vm461_vm2, %v10630_v30  ;;  %v282_v30 = vld [vmem:[%s10212_s29 + $0xe8] sm:$0x3]  ;;  %12737 = vst [vmem:[#allocation33_spill] sm:$0xff] %v10673_v18 }
  0x9a   : > { %8757 = vmatprep.mubr.msk.f32.mxu0 %vm461_vm2, %v10634_v51  ;;  %v10656_v51 = vsel %vm1103_vm3, %v1140_v10, %v1142_v46  ;;  %v10670_v10 = vsel %vm1103_vm3, %v1145_v19, %v1147_v33  ;;  %v1152_v46 = vrot.slane %v282_v30, 2 }
  0x9b   : > { %12734 = vst [vmem:[#allocation30_spill] sm:$0xff] %v10656_v51  ;;  %12736 = vst [vmem:[#allocation32_spill] sm:$0xff] %v10670_v10 }
  0x9d   : > { %8758 = vmatmul.mubr.msk.f32.gmra.mrb[12].mxu0 %vm461_vm2, %v10643_v39  ;;  %v285_v39 = vld [vmem:[%s10212_s29 + $0x100] sm:$0x3] }
  0x9e   : > { %8760 = vmatprep.mubr.msk.f32.mxu0 %vm461_vm2, %v10647_v59  ;;  %v1155_v59 = vrot.slane %v10480_v35, 2  ;;  %v1157_v19 = vrot.slane %v285_v39, 2 }
  0xa0   : > { %v10686_v33 = vsel %vm1103_vm3, %v1154_v0, %v1155_v59  ;;  %v1164_v0 = vrot.slane %v10493_v42, 2 }
  0xa1   : > { %8761 = vmatmul.mubr.msk.f32.gmra.mrb[14].mxu0 %vm461_vm2, %v10656_v51  ;;  %12739 = vst [vmem:[#allocation35_spill] sm:$0xff] %v10686_v33  ;;  %v1160_v51 = vrot.slane %v10490_v38, 2 }
  0xa2   : > { %8763 = vmatprep.mubr.msk.f32.mxu0 %vm461_vm2, %v10660_v5  ;;  %v10683_v5 = vsel %vm1103_vm3, %v1150_v21, %v1152_v46  ;;  %v1162_v21 = vrot.slane %v288_v28, 2 }
  0xa3   : > { %12738 = vst [vmem:[#allocation34_spill] sm:$0xff] %v10683_v5  ;;  %v10699_v46 = vsel %vm1103_vm3, %v1159_v17, %v1160_v51  ;;  %v1169_v17 = vrot.slane %v10503_v45, 2 }
  0xa4   : > { %12741 = vst [vmem:[#allocation37_spill] sm:$0xff] %v10699_v46 }
  0xa5   : > { %8764 = vmatmul.mubr.msk.f32.gmra.mrb[16].mxu0 %vm461_vm2, %v10670_v10  ;;  %v1165_v10 = vrot.slane %v10500_v43, 2 }
  0xa6   : > { %8766 = vmatprep.mubr.msk.f32.mxu0 %vm461_vm2, %v10673_v18  ;;  %v10696_v18 = vsel %vm1103_vm3, %v1155_v59, %v1157_v19  ;;  %v1167_v59 = vrot.slane %v10704_v26, 2 }
  0xa7   : > { %12740 = vst [vmem:[#allocation36_spill] sm:$0xff] %v10696_v18  ;;  %v10715_v19 = vsel %vm1103_vm3, %v1164_v0, %v1165_v10  ;;  %v1172_v0 = vrot.slane %v10720_v47, 2 }
  0xa8   : > { %12743 = vst [vmem:[#allocation39_spill] sm:$0xff] %v10715_v19 }
  0xa9   : > { %8767 = vmatmul.mubr.msk.f32.gmra.mrb[20].mxu0 %vm461_vm2, %v10683_v5  ;;  %v1170_v5 = vrot.slane %v10510_v49, 2 }
  0xaa   : > { %8769 = vmatprep.mubr.msk.f32.mxu0 %vm461_vm2, %v10686_v33  ;;  %v10711_v33 = vsel %vm1103_vm3, %v1160_v51, %v1162_v21  ;;  %v415_v51 = vrot.slane %v10470_v3, 1  ;;  %v10729_v21 = vsel %vm1103_vm3, %v1165_v10, %v1167_v59  ;;  %v420_v10 = vrot.slane %v10480_v35, 1 }
  0xab   : > { %12742 = vst [vmem:[#allocation38_spill] sm:$0xff] %v10711_v33  ;;  %12744 = vst [vmem:[#allocation40_spill] sm:$0xff] %v10729_v21  ;;  %v10733_v16 = vsel %vm1103_vm3, %v1169_v17, %v1170_v5  ;;  %v422_v59 = vrot.slane %v285_v39, 1  ;;  %v425_v39 = vrot.slane %v10490_v38, 1 }
  0xac   : > { %12745 = vst [vmem:[#allocation41_spill] sm:$0xff] %v10733_v16 }
  0xad   : > { %8770 = vmatmul.mubr.msk.f32.gmra.mrb[22].mxu0 %vm461_vm2, %v10696_v18  ;;  %v417_v18 = vrot.slane %v282_v30, 1  ;;  %v419_v30 = vrot.slane %v10473_v24, 1 }
  0xae   : > { %8772 = vmatprep.mubr.msk.f32.mxu0 %vm461_vm2, %v10699_v46  ;;  %v414_v46 = vrot.slane %v10463_v2, 1 }
  0xb0   : > { %v10741_v62 = vsel %vm368_vm1, %v414_v46, %v415_v51  ;;  %v10757_v46 = vsel %vm1103_vm3, %v1170_v5, %v1172_v0 }
  0xb1   : > { %8773 = vmatmul.mubr.msk.f32.gmra.mrb[24].mxu0 %vm461_vm2, %v10711_v33  ;;  %v1175_v33 = vrot.slane %v10520_v55, 2  ;;  %12746 = vst [vmem:[#allocation42_spill] sm:$0xff] %v10741_v62  ;;  %8654 = vmatprep.mubr.msk.f32.mxu1 %vm461_vm2, %v10741_v62  ;;  %12748 = vst [vmem:[#allocation44_spill] sm:$0xff] %v10757_v46  ;;  %v10766_v62 = vld [vmem:[%s10212_s29 + $0x178] sm:$0x3] }
  0xb2   : > { %8775 = vmatprep.mubr.msk.f32.mxu0 %vm461_vm2, %v10715_v19  ;;  %v10744_v19 = vsel %vm368_vm1, %v415_v51, %v417_v18  ;;  %v1177_v18 = vrot.slane %v10738_v29, 2  ;;  %v1179_v51 = vrot.slane %v10523_v57, 2  ;;  %v1182_v0 = vrot.slane %v10766_v62, 2 }
  0xb3   : > { %12747 = vst [vmem:[#allocation43_spill] sm:$0xff] %v10744_v19  ;;  %8655 = vmatmul.mubr.msk.f32.vlgmr.msra.gmra.mrb[0].mxu1 %vm461_vm2, %v10744_v19  ;;  %v10761_v17 = vsel %vm1103_vm3, %v1174_v12, %v1175_v33  ;;  %v10769_v19 = vsel %vm368_vm1, %v419_v30, %v420_v10  ;;  %v424_v12 = vrot.slane %v10483_v37, 1  ;;  %v427_v30 = vrot.slane %v288_v28, 1 }
  0xb4   : > { %12749 = vst [vmem:[#allocation45_spill] sm:$0xff] %v10761_v17  ;;  %12750 = vst [vmem:[#allocation46_spill] sm:$0xff] %v10769_v19  ;;  %8657 = vmatprep.mubr.msk.f32.mxu1 %vm461_vm2, %v10769_v19  ;;  %v10785_v5 = vsel %vm1103_vm3, %v1175_v33, %v1177_v18  ;;  %v303_v19 = vld [vmem:[%s10212_s29 + $0x190] sm:$0x3]  ;;  %v429_v28 = vrot.slane %v10493_v42, 1  ;;  %v430_v33 = vrot.slane %v10500_v43, 1 }
  0xb5   : > { %8776 = vmatmul.mubr.msk.f32.gmra.mrb[26].mxu0 %vm461_vm2, %v10729_v21  ;;  %v1180_v21 = vrot.slane %v10530_v58, 2  ;;  %12752 = vst [vmem:[#allocation48_spill] sm:$0xff] %v10785_v5 }
  0xb6   : > { %8778 = vmatprep.mubr.msk.f32.mxu0 %vm461_vm2, %v10733_v16  ;;  %v10772_v16 = vsel %vm368_vm1, %v420_v10, %v422_v59  ;;  %v1184_v59 = vrot.slane %v10533_v63, 2  ;;  %v10821_v56 = vsel %vm368_vm1, %v429_v28, %v430_v33  ;;  %v437_v28 = vrot.slane %v10720_v47, 1 }
  0xb7   : > { %12751 = vst [vmem:[#allocation47_spill] sm:$0xff] %v10772_v16  ;;  %8658 = vmatmul.mubr.msk.f32.gmra.mrb[2].mxu1 %vm461_vm2, %v10772_v16  ;;  %v10789_v10 = vsel %vm1103_vm3, %v1179_v51, %v1180_v21  ;;  %v10795_v16 = vsel %vm368_vm1, %v424_v12, %v425_v39  ;;  %v10811_v18 = vsel %vm1103_vm3, %v1180_v21, %v1182_v0  ;;  %v1187_v51 = vrot.slane %v303_v19, 2 }
  0xb8   : > { %12753 = vst [vmem:[#allocation49_spill] sm:$0xff] %v10789_v10  ;;  %12754 = vst [vmem:[#allocation50_spill] sm:$0xff] %v10795_v16  ;;  %8660 = vmatprep.mubr.msk.f32.mxu1 %vm461_vm2, %v10795_v16  ;;  %v432_v12 = vrot.slane %v10704_v26, 1  ;;  %v306_v16 = vld [vmem:[%s10212_s29 + $0x1a8] sm:$0x3]  ;;  %v434_v26 = vrot.slane %v10503_v45, 1 }
  0xb9   : > { %8779 = vmatmul.mubr.msk.f32.gmra.mrb[28].mxu0 %vm461_vm2, %v10757_v46  ;;  %v1185_v46 = vrot.slane %v10540_v1, 2  ;;  %12756 = vst [vmem:[#allocation52_spill] sm:$0xff] %v10811_v18  ;;  %12758 = vst [vmem:[#allocation54_spill] sm:$0xff] %v10821_v56  ;;  %v435_v21 = vrot.slane %v10510_v49, 1 }
  0xba   : > { %8781 = vmatprep.mubr.msk.f32.mxu0 %vm461_vm2, %v10761_v17  ;;  %v10798_v17 = vsel %vm368_vm1, %v425_v39, %v427_v30  ;;  %v1189_v30 = vrot.slane %v10543_v4, 2 }
  0xbb   : > { %12755 = vst [vmem:[#allocation51_spill] sm:$0xff] %v10798_v17  ;;  %8661 = vmatmul.mubr.msk.f32.gmra.mrb[4].mxu1 %vm461_vm2, %v10798_v17  ;;  %v10815_v39 = vsel %vm1103_vm3, %v1184_v59, %v1185_v46  ;;  %v10824_v17 = vsel %vm368_vm1, %v430_v33, %v432_v12  ;;  %v10837_v0 = vsel %vm1103_vm3, %v1185_v46, %v1187_v51  ;;  %v1192_v59 = vrot.slane %v306_v16, 2 }
  0xbc   : > { %12757 = vst [vmem:[#allocation53_spill] sm:$0xff] %v10815_v39  ;;  %12759 = vst [vmem:[#allocation55_spill] sm:$0xff] %v10824_v17  ;;  %8663 = vmatprep.mubr.msk.f32.mxu1 %vm461_vm2, %v10821_v56  ;;  %v10844_v12 = vsel %vm368_vm1, %v434_v26, %v435_v21  ;;  %v439_v46 = vrot.slane %v10513_v50, 1  ;;  %v440_v51 = vrot.slane %v10520_v55, 1 }
  0xbd   : > { %8782 = vmatmul.mubr.msk.f32.gmra.mrb[30].mxu0 %vm461_vm2, %v10785_v5  ;;  %v1190_v5 = vrot.slane %v10550_v11, 2  ;;  %12760 = vst [vmem:[#allocation56_spill] sm:$0xff] %v10837_v0  ;;  %12762 = vst [vmem:[#allocation58_spill] sm:$0xff] %v10844_v12 }
  0xbe   : > { %8784 = vmatprep.mubr.msk.f32.mxu0 %vm461_vm2, %v10789_v10  ;;  %v10864_v26 = vsel %vm368_vm1, %v439_v46, %v440_v51 }
  0xbf   : > { %8664 = vmatmul.mubr.msk.f32.gmra.mrb[6].mxu1 %vm461_vm2, %v10824_v17  ;;  %v10841_v33 = vsel %vm1103_vm3, %v1189_v30, %v1190_v5  ;;  %v10860_v47 = vsel %vm1103_vm3, %v1190_v5, %v1192_v59  ;;  %v442_v30 = vrot.slane %v10738_v29, 1  ;;  %12764 = vst [vmem:[#allocation60_spill] sm:$0xff] %v10864_v26  ;;  %v447_v29 = vrot.slane %v10766_v62, 1  ;;  %v10886_v59 = vld [vmem:[%s12520_s1 + $0x14] sm:$0xf] }
  0xc0   : > { %12761 = vst [vmem:[#allocation57_spill] sm:$0xff] %v10841_v33  ;;  %8666 = vmatprep.mubr.msk.f32.mxu1 %vm461_vm2, %v10844_v12  ;;  %v450_v62 = vrot.slane %v10540_v1, 1 }
  0xc1   : > { %8785 = vmatmul.mubr.msk.f32.gmra.mrb[32].mxu0 %vm461_vm2, %v10811_v18  ;;  %v10847_v18 = vsel %vm368_vm1, %v435_v21, %v437_v28  ;;  %v10867_v21 = vsel %vm368_vm1, %v440_v51, %v442_v30  ;;  %v444_v28 = vrot.slane %v10523_v57, 1  ;;  %v455_v30 = vrot.slane %v10550_v11, 1 }
  0xc2   : > { %8787 = vmatprep.mubr.msk.f32.mxu0 %vm461_vm2, %v10815_v39  ;;  %12763 = vst [vmem:[#allocation59_spill] sm:$0xff] %v10847_v18  ;;  %12765 = vst [vmem:[#allocation61_spill] sm:$0xff] %v10867_v21 }
  0xc3   : > { %8667 = vmatmul.mubr.msk.f32.gmra.mrb[8].mxu1 %vm461_vm2, %v10847_v18 }
  0xc4   : > { %8669 = vmatprep.mubr.msk.f32.mxu1 %vm461_vm2, %v10864_v26 }
  0xc5   : > { %8788 = vmatmul.mubr.msk.f32.gmra.mrb[34].mxu0 %vm461_vm2, %v10837_v0 }
  0xc6   : > { %8790 = vmatprep.mubr.msk.f32.mxu0 %vm461_vm2, %v10841_v33  ;;  %v445_v33 = vrot.slane %v10530_v58, 1 }
  0xc7   : > { %8670 = vmatmul.mubr.msk.f32.gmra.mrb[10].mxu1 %vm461_vm2, %v10867_v21 }
  0xc8   : > { %v10881_v5 = vsel %vm368_vm1, %v444_v28, %v445_v33  ;;  %v10889_v46 = vsel %vm368_vm1, %v445_v33, %v447_v29  ;;  %v452_v33 = vrot.slane %v303_v19, 1  ;;  %v457_v19 = vrot.slane %v306_v16, 1 }
  0xc9   : > { %8791 = vmatmul.mubr.msk.f32.gmra.mrb[40].mxu0 %vm461_vm2, %v10860_v47  ;;  %12766 = vst [vmem:[#allocation62_spill] sm:$0xff] %v10881_v5  ;;  %12767 = vst [vmem:[#allocation63_spill] sm:$0xff] %v10889_v46  ;;  %8672 = vmatprep.mubr.msk.f32.mxu1 %vm461_vm2, %v10881_v5 }
  0xca   : > { %8795 = vmatprep.mubr.msk.f32.mxu0 %vm461_vm2, %v10224_v8  ;;  %v449_v8 = vrot.slane %v10533_v63, 1  ;;  %v10925_v29 = vsel %vm368_vm1, %v455_v30, %v457_v19  ;;  %v7571_v19 = vld [vmem:[%s12520_s1 + $0x18] sm:$0xf] }
  0xcb   : > { %8673 = vmatmul.mubr.msk.f32.gmra.mrb[12].mxu1 %vm461_vm2, %v10889_v46  ;;  %12771 = vst [vmem:[#allocation67_spill] sm:$0xff] %v10925_v29 }
  0xcc   : > { %v10906_v51 = vsel %vm368_vm1, %v449_v8, %v450_v62 }
  0xcd   : > { %8796 = vmatmul.mubr.msk.f32.vlgmr.msra.gmra.mrb[42].mxu0 %vm461_vm2, %v10227_v9  ;;  %12768 = vst [vmem:[#allocation64_spill] sm:$0xff] %v10906_v51  ;;  %v10909_v9 = vsel %vm368_vm1, %v450_v62, %v452_v33  ;;  %8675 = vmatprep.mubr.msk.f32.mxu1 %vm461_vm2, %v10906_v51  ;;  %v10988_v62 = vld [vmem:[%s10212_s29 + $0x1b0] sm:$0xff]  ;;  %v10995_v33 = vld [vmem:[%s10212_s29 + $0x1b8] sm:$0xff] }
  0xce   : > { %8850 = vmatpush3.msk.msra.mxu0 %vm534_vm0, %v10567_v15  ;;  %8798 = vmatprep.mubr.msk.f32.mxu0 %vm461_vm2, %v10235_v13  ;;  %12769 = vst [vmem:[#allocation65_spill] sm:$0xff] %v10909_v9  ;;  %v454_v15 = vrot.slane %v10543_v4, 1 }
  0xcf   : > { %8905 = vmatprep.subr.msk.mxu0 %vm534_vm0, %v10886_v59  ;;  %8676 = vmatmul.mubr.msk.f32.gmra.mrb[14].mxu1 %vm461_vm2, %v10909_v9 }
  0xd0   : > { %v10922_v28 = vsel %vm368_vm1, %v454_v15, %v455_v30 }
  0xd1   : > { %8799 = vmatmul.mubr.msk.f32.gmra.mrb[2].mxu0 %vm461_vm2, %v10238_v14  ;;  %12770 = vst [vmem:[#allocation66_spill] sm:$0xff] %v10922_v28  ;;  %8678 = vmatprep.mubr.msk.f32.mxu1 %vm461_vm2, %v10922_v28 }
  0xd2   : > { %8801 = vmatprep.mubr.msk.f32.mxu0 %vm461_vm2, %v10253_v22 }
  0xd3   : > { %8679 = vmatmul.mubr.msk.f32.gmra.mrb[16].mxu1 %vm461_vm2, %v10925_v29 }
  0xd5   : > { %8802 = vmatmul.mubr.msk.f32.gmra.mrb[4].mxu0 %vm461_vm2, %v10256_v23 }
  0xd6   : > { %8804 = vmatprep.mubr.msk.f32.mxu0 %vm461_vm2, %v10282_v31 }
  0xd9   : > { %8805 = vmatmul.mubr.msk.f32.gmra.mrb[6].mxu0 %vm461_vm2, %v10285_v32 }
  0xda   : > { %8807 = vmatprep.mubr.msk.f32.mxu0 %vm461_vm2, %v10304_v40 }
  0xdd   : > { %8808 = vmatmul.mubr.msk.f32.gmra.mrb[8].mxu0 %vm461_vm2, %v10307_v41 }
  0xde   : > { %8810 = vmatprep.mubr.msk.f32.mxu0 %vm461_vm2, %v10334_v52 }
  0xe1   : > { %8811 = vmatmul.mubr.msk.f32.gmra.mrb[10].mxu0 %vm461_vm2, %v10337_v53 }
  0xe2   : > { %8813 = vmatprep.mubr.msk.f32.mxu0 %vm461_vm2, %v10356_v60 }
  0xe5   : > { %8814 = vmatmul.mubr.msk.f32.gmra.mrb[12].mxu0 %vm461_vm2, %v10359_v61 }
  0xe6   : > { %8816 = vmatprep.mubr.msk.f32.mxu0 %vm461_vm2, %v10378_v6 }
  0xe9   : > { %8817 = vmatmul.mubr.msk.f32.gmra.mrb[14].mxu0 %vm461_vm2, %v10381_v7 }
  0xea   : > { %8819 = vmatprep.mubr.msk.f32.mxu0 %vm461_vm2, %v10463_v2 }
  0xec   : > { %v8629_v16 = vpop.f32.mrb[0].mxu0 }
  0xed   : > { %v604_v8 = vpop.f32.mrb[1].mxu0  ;;  %8820 = vmatmul.mubr.msk.f32.gmra.mrb[16].mxu0 %vm461_vm2, %v10470_v3  ;;  %v12775_v16 = vld [vmem:[#allocation12_spill] sm:$0xff] }
  0xee   : > { %8822 = vmatprep.mubr.msk.f32.mxu0 %vm461_vm2, %v10473_v24  ;;  %v12776_v8 = vld [vmem:[#allocation13_spill] sm:$0xff] }
  0xf1   : > { %8823 = vmatmul.mubr.msk.f32.gmra.mrb[20].mxu0 %vm461_vm2, %v10480_v35 }
  0xf2   : > { %8825 = vmatprep.mubr.msk.f32.mxu0 %vm461_vm2, %v10483_v37 }
  0xf5   : > { %8826 = vmatmul.mubr.msk.f32.gmra.mrb[22].mxu0 %vm461_vm2, %v10490_v38 }
  0xf6   : > { %8828 = vmatprep.mubr.msk.f32.mxu0 %vm461_vm2, %v10493_v42 }
  0xf9   : > { %8829 = vmatmul.mubr.msk.f32.gmra.mrb[24].mxu0 %vm461_vm2, %v10500_v43 }
  0xfa   : > { %8831 = vmatprep.mubr.msk.f32.mxu0 %vm461_vm2, %v10503_v45 }
  0xfd   : > { %8832 = vmatmul.mubr.msk.f32.gmra.mrb[26].mxu0 %vm461_vm2, %v10510_v49 }
  0xfe   : > { %8834 = vmatprep.mubr.msk.f32.mxu0 %vm461_vm2, %v10513_v50 }
 0x101   : > { %8835 = vmatmul.mubr.msk.f32.gmra.mrb[28].mxu0 %vm461_vm2, %v10520_v55 }
 0x102   : > { %8837 = vmatprep.mubr.msk.f32.mxu0 %vm461_vm2, %v10523_v57 }
 0x105   : > { %8838 = vmatmul.mubr.msk.f32.gmra.mrb[30].mxu0 %vm461_vm2, %v10530_v58 }
 0x106   : > { %8840 = vmatprep.mubr.msk.f32.mxu0 %vm461_vm2, %v10533_v63 }
 0x109   : > { %8841 = vmatmul.mubr.msk.f32.gmra.mrb[32].mxu0 %vm461_vm2, %v10540_v1 }
 0x10a   : > { %8843 = vmatprep.mubr.msk.f32.mxu0 %vm461_vm2, %v10543_v4 }
 0x10d   : > { %8844 = vmatmul.mubr.msk.f32.gmra.mrb[34].mxu0 %vm461_vm2, %v10550_v11 }
 0x10e   : > { %8846 = vmatprep.mubr.msk.f32.mxu0 %vm461_vm2, %v10988_v62 }
 0x110   : > { %v8685_v15 = vpop.f32.mrb[18].mxu0 }
 0x111   : > { %v924_v30 = vpop.f32.mrb[19].mxu0  ;;  %8847 = vmatmul.mubr.msk.f32.gmra.mrb[44].mxu0 %vm461_vm2, %v10995_v33  ;;  %v12777_v15 = vld [vmem:[#allocation14_spill] sm:$0xff] }
 0x112   : > { %8851 = vmatprep.mubr.msk.f32.mxu0 %vm461_vm2, %v10249_v20  ;;  %v12772_v20 = vld [vmem:[#allocation9_spill] sm:$0xff]  ;;  %v12778_v30 = vld [vmem:[#allocation15_spill] sm:$0xff] }
 0x115   : > { %8852 = vmatmul.mubr.msk.f32.vlgmr.msra.gmra.mrb[46].mxu0 %vm461_vm2, %v10268_v25  ;;  %v12773_v25 = vld [vmem:[#allocation10_spill] sm:$0xff] }
 0x116   : > { %8906 = vmatpush3.msk.msra.mxu0 %vm534_vm0, %v10886_v59  ;;  %8854 = vmatprep.mubr.msk.f32.mxu0 %vm461_vm2, %v10272_v27  ;;  %v12774_v59 = vld [vmem:[#allocation11_spill] sm:$0xff] }
 0x117   : > { %8961 = vmatprep.subr.msk.mxu0 %vm534_vm0, %v7571_v19 }
 0x119   : > { %8855 = vmatmul.mubr.msk.f32.gmra.mrb[2].mxu0 %vm461_vm2, %v10292_v34 }
 0x11a   : > { %8857 = vmatprep.mubr.msk.f32.mxu0 %vm461_vm2, %v10296_v36 }
 0x11d   : > { %8858 = vmatmul.mubr.msk.f32.gmra.mrb[4].mxu0 %vm461_vm2, %v10316_v44 }
 0x11e   : > { %8860 = vmatprep.mubr.msk.f32.mxu0 %vm461_vm2, %v10326_v48 }
 0x121   : > { %8861 = vmatmul.mubr.msk.f32.gmra.mrb[6].mxu0 %vm461_vm2, %v10344_v54  ;;  %v12779_v54 = vld [vmem:[#allocation16_spill] sm:$0xff] }
 0x122   : > { %8863 = vmatprep.mubr.msk.f32.mxu0 %vm461_vm2, %v12772_v20  ;;  %v12780_v20 = vld [vmem:[#allocation42_spill] sm:$0xff] }
 0x125   : > { %8864 = vmatmul.mubr.msk.f32.gmra.mrb[8].mxu0 %vm461_vm2, %v12773_v25  ;;  %v12781_v25 = vld [vmem:[#allocation43_spill] sm:$0xff] }
 0x126   : > { %8866 = vmatprep.mubr.msk.f32.mxu0 %vm461_vm2, %v12774_v59  ;;  %v12782_v59 = vld [vmem:[#allocation46_spill] sm:$0xff] }
 0x129   : > { %8867 = vmatmul.mubr.msk.f32.gmra.mrb[10].mxu0 %vm461_vm2, %v12775_v16 }
 0x12a   : > { %8869 = vmatprep.mubr.msk.f32.mxu0 %vm461_vm2, %v12776_v8  ;;  %v12783_v8 = vld [vmem:[#allocation47_spill] sm:$0xff] }
 0x12d   : > { %8870 = vmatmul.mubr.msk.f32.gmra.mrb[12].mxu0 %vm461_vm2, %v12777_v15  ;;  %v12784_v15 = vld [vmem:[#allocation50_spill] sm:$0xff] }
 0x12e   : > { %8872 = vmatprep.mubr.msk.f32.mxu0 %vm461_vm2, %v12778_v30  ;;  %v12785_v30 = vld [vmem:[#allocation51_spill] sm:$0xff] }
 0x131   : > { %8873 = vmatmul.mubr.msk.f32.gmra.mrb[14].mxu0 %vm461_vm2, %v12779_v54 }
 0x132   : > { %8875 = vmatprep.mubr.msk.f32.mxu0 %vm461_vm2, %v12780_v20 }
 0x135   : > { %8876 = vmatmul.mubr.msk.f32.gmra.mrb[16].mxu0 %vm461_vm2, %v12781_v25 }
 0x136   : > { %8878 = vmatprep.mubr.msk.f32.mxu0 %vm461_vm2, %v12782_v59 }
 0x139   : > { %8879 = vmatmul.mubr.msk.f32.gmra.mrb[20].mxu0 %vm461_vm2, %v12783_v8 }
 0x13a   : > { %8881 = vmatprep.mubr.msk.f32.mxu0 %vm461_vm2, %v12784_v15 }
 0x13d   : > { %8882 = vmatmul.mubr.msk.f32.gmra.mrb[22].mxu0 %vm461_vm2, %v12785_v30 }
 0x13e   : > { %8884 = vmatprep.mubr.msk.f32.mxu0 %vm461_vm2, %v10821_v56 }
 0x141   : > { %8885 = vmatmul.mubr.msk.f32.gmra.mrb[24].mxu0 %vm461_vm2, %v10824_v17  ;;  %v1846_v17 = vrot.slane %v10995_v33, 1 }
 0x142   : > { %8887 = vmatprep.mubr.msk.f32.mxu0 %vm461_vm2, %v10844_v12  ;;  %v1845_v12 = vrot.slane %v10988_v62, 1 }
 0x145   : > { %8888 = vmatmul.mubr.msk.f32.gmra.mrb[26].mxu0 %vm461_vm2, %v10847_v18  ;;  %v309_v18 = vld [vmem:[%s10212_s29 + $0x1c0] sm:$0x3] }
 0x146   : > { %8890 = vmatprep.mubr.msk.f32.mxu0 %vm461_vm2, %v10864_v26 }
 0x149   : > { %8891 = vmatmul.mubr.msk.f32.gmra.mrb[28].mxu0 %vm461_vm2, %v10867_v21  ;;  %v1848_v21 = vrot.slane %v309_v18, 1 }
 0x14a   : > { %8893 = vmatprep.mubr.msk.f32.mxu0 %vm461_vm2, %v10881_v5  ;;  %v11075_v5 = vsel %vm368_vm1, %v1845_v12, %v1846_v17  ;;  %v7609_v12 = vld [vmem:[%s12520_s1 + $0x1c] sm:$0xf] }
 0x14d   : > { %8894 = vmatmul.mubr.msk.f32.gmra.mrb[30].mxu0 %vm461_vm2, %v10889_v46 }
 0x14e   : > { %8896 = vmatprep.mubr.msk.f32.mxu0 %vm461_vm2, %v10906_v51  ;;  %v11082_v51 = vsel %vm368_vm1, %v1846_v17, %v1848_v21  ;;  %v12790_v17 = vld [vmem:[#allocation21_spill] sm:$0xff]  ;;  %v12791_v21 = vld [vmem:[#allocation22_spill] sm:$0xff] }
 0x151   : > { %8897 = vmatmul.mubr.msk.f32.gmra.mrb[32].mxu0 %vm461_vm2, %v10909_v9 }
 0x152   : > { %8899 = vmatprep.mubr.msk.f32.mxu0 %vm461_vm2, %v10922_v28  ;;  %v12786_v28 = vld [vmem:[#allocation17_spill] sm:$0xff] }
 0x154   : > { %v8736_v26 = vpop.f32.mrb[36].mxu0 }
 0x155   : > { %v1094_v46 = vpop.f32.mrb[37].mxu0  ;;  %8900 = vmatmul.mubr.msk.f32.gmra.mrb[34].mxu0 %vm461_vm2, %v10925_v29  ;;  %v12787_v26 = vld [vmem:[#allocation18_spill] sm:$0xff] }
 0x156   : > { %8902 = vmatprep.mubr.msk.f32.mxu0 %vm461_vm2, %v11075_v5  ;;  %v12788_v46 = vld [vmem:[#allocation19_spill] sm:$0xff] }
 0x158   : > { %v8741_v56 = vpop.f32.mrb[38].mxu0 }
 0x159   : > { %v1337_v9 = vpop.f32.mrb[39].mxu0  ;;  %8903 = vmatmul.mubr.msk.f32.gmra.mrb[48].mxu0 %vm461_vm2, %v11082_v51  ;;  %v12789_v56 = vld [vmem:[#allocation20_spill] sm:$0xff] }
 0x15a   : > { %8907 = vmatprep.mubr.msk.f32.mxu0 %vm461_vm2, %v12786_v28  ;;  %v12792_v9 = vld [vmem:[#allocation23_spill] sm:$0xff]  ;;  %v12793_v28 = vld [vmem:[#allocation24_spill] sm:$0xff] }
 0x15d   : > { %8908 = vmatmul.mubr.msk.f32.vlgmr.msra.gmra.mrb[50].mxu0 %vm461_vm2, %v12787_v26  ;;  %v12795_v26 = vld [vmem:[#allocation26_spill] sm:$0xff] }
 0x15e   : > { %8962 = vmatpush3.msk.msra.mxu0 %vm534_vm0, %v7571_v19  ;;  %8910 = vmatprep.mubr.msk.f32.mxu0 %vm461_vm2, %v12788_v46  ;;  %v12794_v19 = vld [vmem:[#allocation25_spill] sm:$0xff]  ;;  %v12796_v46 = vld [vmem:[#allocation27_spill] sm:$0xff] }
 0x15f   : > { %9017 = vmatprep.subr.msk.mxu0 %vm534_vm0, %v7609_v12 }
 0x161   : > { %8911 = vmatmul.mubr.msk.f32.gmra.mrb[2].mxu0 %vm461_vm2, %v12789_v56  ;;  %v12797_v56 = vld [vmem:[#allocation28_spill] sm:$0xff] }
 0x162   : > { %8913 = vmatprep.mubr.msk.f32.mxu0 %vm461_vm2, %v12790_v17  ;;  %v12798_v17 = vld [vmem:[#allocation29_spill] sm:$0xff] }
 0x165   : > { %8914 = vmatmul.mubr.msk.f32.gmra.mrb[4].mxu0 %vm461_vm2, %v12791_v21  ;;  %v12799_v21 = vld [vmem:[#allocation30_spill] sm:$0xff] }
 0x166   : > { %8916 = vmatprep.mubr.msk.f32.mxu0 %vm461_vm2, %v12792_v9  ;;  %v12800_v9 = vld [vmem:[#allocation31_spill] sm:$0xff] }
 0x169   : > { %8917 = vmatmul.mubr.msk.f32.gmra.mrb[6].mxu0 %vm461_vm2, %v12793_v28  ;;  %v12801_v28 = vld [vmem:[#allocation32_spill] sm:$0xff] }
 0x16a   : > { %8919 = vmatprep.mubr.msk.f32.mxu0 %vm461_vm2, %v12794_v19  ;;  %v12802_v19 = vld [vmem:[#allocation33_spill] sm:$0xff] }
 0x16d   : > { %8920 = vmatmul.mubr.msk.f32.gmra.mrb[8].mxu0 %vm461_vm2, %v12795_v26  ;;  %v12803_v26 = vld [vmem:[#allocation34_spill] sm:$0xff] }
 0x16e   : > { %8922 = vmatprep.mubr.msk.f32.mxu0 %vm461_vm2, %v12796_v46  ;;  %v12804_v46 = vld [vmem:[#allocation35_spill] sm:$0xff] }
 0x171   : > { %8923 = vmatmul.mubr.msk.f32.gmra.mrb[10].mxu0 %vm461_vm2, %v12797_v56  ;;  %v12805_v56 = vld [vmem:[#allocation36_spill] sm:$0xff] }
 0x172   : > { %8925 = vmatprep.mubr.msk.f32.mxu0 %vm461_vm2, %v12798_v17  ;;  %v12806_v17 = vld [vmem:[#allocation37_spill] sm:$0xff] }
 0x175   : > { %8926 = vmatmul.mubr.msk.f32.gmra.mrb[12].mxu0 %vm461_vm2, %v12799_v21  ;;  %v12807_v21 = vld [vmem:[#allocation38_spill] sm:$0xff] }
 0x176   : > { %8928 = vmatprep.mubr.msk.f32.mxu0 %vm461_vm2, %v12800_v9  ;;  %v12808_v9 = vld [vmem:[#allocation39_spill] sm:$0xff] }
 0x179   : > { %8929 = vmatmul.mubr.msk.f32.gmra.mrb[14].mxu0 %vm461_vm2, %v12801_v28  ;;  %v12809_v28 = vld [vmem:[#allocation40_spill] sm:$0xff] }
 0x17a   : > { %8931 = vmatprep.mubr.msk.f32.mxu0 %vm461_vm2, %v12802_v19  ;;  %v12810_v19 = vld [vmem:[#allocation41_spill] sm:$0xff] }
 0x17d   : > { %8932 = vmatmul.mubr.msk.f32.gmra.mrb[16].mxu0 %vm461_vm2, %v12803_v26  ;;  %v12811_v26 = vld [vmem:[#allocation44_spill] sm:$0xff] }
 0x17e   : > { %8934 = vmatprep.mubr.msk.f32.mxu0 %vm461_vm2, %v12804_v46  ;;  %v12812_v46 = vld [vmem:[#allocation45_spill] sm:$0xff] }
 0x181   : > { %8935 = vmatmul.mubr.msk.f32.gmra.mrb[20].mxu0 %vm461_vm2, %v12805_v56  ;;  %v12813_v56 = vld [vmem:[#allocation48_spill] sm:$0xff] }
 0x182   : > { %8937 = vmatprep.mubr.msk.f32.mxu0 %vm461_vm2, %v12806_v17 }
 0x185   : > { %8938 = vmatmul.mubr.msk.f32.gmra.mrb[22].mxu0 %vm461_vm2, %v12807_v21  ;;  %v12814_v21 = vld [vmem:[#allocation52_spill] sm:$0xff] }
 0x186   : > { %8940 = vmatprep.mubr.msk.f32.mxu0 %vm461_vm2, %v12808_v9 }
 0x189   : > { %8941 = vmatmul.mubr.msk.f32.gmra.mrb[24].mxu0 %vm461_vm2, %v12809_v28  ;;  %v2141_v28 = vrot.slane %v10995_v33, 2 }
 0x18a   : > { %8943 = vmatprep.mubr.msk.f32.mxu0 %vm461_vm2, %v12810_v19  ;;  %v2140_v19 = vrot.slane %v10988_v62, 2 }
 0x18d   : > { %8944 = vmatmul.mubr.msk.f32.gmra.mrb[26].mxu0 %vm461_vm2, %v12811_v26  ;;  %v11160_v26 = vsel %vm1103_vm3, %v2140_v19, %v2141_v28  ;;  %v12842_v19 = vld [vmem:[#allocation27_spill] sm:$0xff] }
 0x18e   : > { %8946 = vmatprep.mubr.msk.f32.mxu0 %vm461_vm2, %v12812_v46  ;;  %v12815_v46 = vld [vmem:[#allocation57_spill] sm:$0xff] }
 0x191   : > { %8947 = vmatmul.mubr.msk.f32.gmra.mrb[28].mxu0 %vm461_vm2, %v12813_v56  ;;  %v2143_v56 = vrot.slane %v309_v18, 2 }
 0x192   : > { %8949 = vmatprep.mubr.msk.f32.mxu0 %vm461_vm2, %v10789_v10 }
 0x195   : > { %8950 = vmatmul.mubr.msk.f32.gmra.mrb[30].mxu0 %vm461_vm2, %v12814_v21 }
 0x196   : > { %8952 = vmatprep.mubr.msk.f32.mxu0 %vm461_vm2, %v10815_v39  ;;  %v11167_v39 = vsel %vm1103_vm3, %v2141_v28, %v2143_v56  ;;  %v12839_v56 = vld [vmem:[#allocation24_spill] sm:$0xff]  ;;  %v7686_v28 = vld [vmem:[%s12522_s3 + $0x4] sm:$0xf] }
 0x197   : > { %9129 = vmatprep.subr.msk.mxu1 %vm534_vm0, %v7686_v28 }
 0x198   : > { %9130 = vmatpush3.msk.msra.mxu1 %vm534_vm0, %v7686_v28 }
 0x199   : > { %8953 = vmatmul.mubr.msk.f32.gmra.mrb[32].mxu0 %vm461_vm2, %v10837_v0 }
 0x19a   : > { %8955 = vmatprep.mubr.msk.f32.mxu0 %vm461_vm2, %v12815_v46 }
 0x19c   : > { %v8792_v10 = vpop.f32.mrb[40].mxu0 }
 0x19d   : > { %v1507_v9 = vpop.f32.mrb[41].mxu0  ;;  %8956 = vmatmul.mubr.msk.f32.gmra.mrb[34].mxu0 %vm461_vm2, %v10860_v47  ;;  %v7647_v10 = vld [vmem:[%s12520_s1 + $0x20] sm:$0xf] }
 0x19e   : > { %8958 = vmatprep.mubr.msk.f32.mxu0 %vm461_vm2, %v11160_v26  ;;  %v12841_v9 = vld [vmem:[#allocation26_spill] sm:$0xff] }
 0x1a0   : > { %v8797_v21 = vpop.f32.mrb[42].mxu0 }
 0x1a1   : > { %v1629_v0 = vpop.f32.mrb[43].mxu0  ;;  %8959 = vmatmul.mubr.msk.f32.gmra.mrb[52].mxu0 %vm461_vm2, %v11167_v39  ;;  %v12840_v21 = vld [vmem:[#allocation25_spill] sm:$0xff] }
 0x1a2   : > { %8963 = vmatprep.mubr.msk.f32.mxu0 %vm461_vm2, %v10235_v13  ;;  %v310_v13 = vld [vmem:[%s10212_s29 + $0x1c8] sm:$0xff] }
 0x1a5   : > { %8964 = vmatmul.mubr.msk.f32.vlgmr.msra.gmra.mrb[54].mxu0 %vm461_vm2, %v10238_v14 }
 0x1a6   : > { %9018 = vmatpush3.msk.msra.mxu0 %vm534_vm0, %v7609_v12  ;;  %8966 = vmatprep.mubr.msk.f32.mxu0 %vm461_vm2, %v10253_v22  ;;  %v12837_v12 = vld [vmem:[#allocation22_spill] sm:$0xff] }
 0x1a7   : > { %9073 = vmatprep.subr.msk.mxu0 %vm534_vm0, %v7647_v10 }
 0x1a9   : > { %8967 = vmatmul.mubr.msk.f32.gmra.mrb[2].mxu0 %vm461_vm2, %v10256_v23  ;;  %v311_v23 = vld [vmem:[%s10212_s29 + $0x1d0] sm:$0xff] }
 0x1aa   : > { %8969 = vmatprep.mubr.msk.f32.mxu0 %vm461_vm2, %v10282_v31 }
 0x1ad   : > { %8970 = vmatmul.mubr.msk.f32.gmra.mrb[4].mxu0 %vm461_vm2, %v10285_v32 }
 0x1ae   : > { %8972 = vmatprep.mubr.msk.f32.mxu0 %vm461_vm2, %v10304_v40  ;;  %v12816_v40 = vld [vmem:[#allocation8_spill] sm:$0xff] }
 0x1b1   : > { %8973 = vmatmul.mubr.msk.f32.gmra.mrb[6].mxu0 %vm461_vm2, %v10307_v41  ;;  %v12817_v41 = vld [vmem:[#allocation9_spill] sm:$0xff] }
 0x1b2   : > { %8975 = vmatprep.mubr.msk.f32.mxu0 %vm461_vm2, %v10334_v52  ;;  %v12818_v52 = vld [vmem:[#allocation10_spill] sm:$0xff] }
 0x1b5   : > { %8976 = vmatmul.mubr.msk.f32.gmra.mrb[8].mxu0 %vm461_vm2, %v10337_v53  ;;  %v12819_v53 = vld [vmem:[#allocation11_spill] sm:$0xff] }
 0x1b6   : > { %8978 = vmatprep.mubr.msk.f32.mxu0 %vm461_vm2, %v10356_v60  ;;  %v12820_v60 = vld [vmem:[#allocation13_spill] sm:$0xff] }
 0x1b9   : > { %8979 = vmatmul.mubr.msk.f32.gmra.mrb[10].mxu0 %vm461_vm2, %v10359_v61  ;;  %v12821_v61 = vld [vmem:[#allocation14_spill] sm:$0xff] }
 0x1ba   : > { %8981 = vmatprep.mubr.msk.f32.mxu0 %vm461_vm2, %v10378_v6  ;;  %v12822_v6 = vld [vmem:[#allocation15_spill] sm:$0xff] }
 0x1bd   : > { %8982 = vmatmul.mubr.msk.f32.gmra.mrb[12].mxu0 %vm461_vm2, %v10381_v7  ;;  %v12823_v7 = vld [vmem:[#allocation54_spill] sm:$0xff] }
 0x1be   : > { %8984 = vmatprep.mubr.msk.f32.mxu0 %vm461_vm2, %v10463_v2  ;;  %v12824_v2 = vld [vmem:[#allocation55_spill] sm:$0xff] }
 0x1c1   : > { %8985 = vmatmul.mubr.msk.f32.gmra.mrb[14].mxu0 %vm461_vm2, %v10470_v3  ;;  %v12825_v3 = vld [vmem:[#allocation58_spill] sm:$0xff] }
 0x1c2   : > { %8987 = vmatprep.mubr.msk.f32.mxu0 %vm461_vm2, %v10473_v24  ;;  %v12826_v24 = vld [vmem:[#allocation59_spill] sm:$0xff] }
 0x1c5   : > { %8988 = vmatmul.mubr.msk.f32.gmra.mrb[16].mxu0 %vm461_vm2, %v10480_v35  ;;  %v12827_v35 = vld [vmem:[#allocation60_spill] sm:$0xff] }
 0x1c6   : > { %8990 = vmatprep.mubr.msk.f32.mxu0 %vm461_vm2, %v10483_v37  ;;  %v12828_v37 = vld [vmem:[#allocation61_spill] sm:$0xff] }
 0x1c9   : > { %8991 = vmatmul.mubr.msk.f32.gmra.mrb[20].mxu0 %vm461_vm2, %v10490_v38  ;;  %v12829_v38 = vld [vmem:[#allocation62_spill] sm:$0xff] }
 0x1ca   : > { %8993 = vmatprep.mubr.msk.f32.mxu0 %vm461_vm2, %v10493_v42  ;;  %v12830_v42 = vld [vmem:[#allocation63_spill] sm:$0xff] }
 0x1cd   : > { %8994 = vmatmul.mubr.msk.f32.gmra.mrb[22].mxu0 %vm461_vm2, %v10500_v43  ;;  %v12831_v43 = vld [vmem:[#allocation64_spill] sm:$0xff] }
 0x1ce   : > { %8996 = vmatprep.mubr.msk.f32.mxu0 %vm461_vm2, %v10503_v45  ;;  %v12832_v45 = vld [vmem:[#allocation65_spill] sm:$0xff] }
 0x1d1   : > { %8997 = vmatmul.mubr.msk.f32.gmra.mrb[24].mxu0 %vm461_vm2, %v10510_v49  ;;  %v12833_v49 = vld [vmem:[#allocation66_spill] sm:$0xff] }
 0x1d2   : > { %8999 = vmatprep.mubr.msk.f32.mxu0 %vm461_vm2, %v10513_v50  ;;  %v2728_v50 = vrot.slane %v310_v13, 1 }
 0x1d5   : > { %9000 = vmatmul.mubr.msk.f32.gmra.mrb[26].mxu0 %vm461_vm2, %v10520_v55  ;;  %v2729_v55 = vrot.slane %v311_v23, 1 }
 0x1d6   : > { %9002 = vmatprep.mubr.msk.f32.mxu0 %vm461_vm2, %v10523_v57  ;;  %v312_v57 = vld [vmem:[%s10212_s29 + $0x1d8] sm:$0x3] }
 0x1d9   : > { %9003 = vmatmul.mubr.msk.f32.gmra.mrb[28].mxu0 %vm461_vm2, %v10530_v58  ;;  %v2731_v58 = vrot.slane %v312_v57, 1  ;;  %v12852_v57 = vld [vmem:[#allocation38_spill] sm:$0xff] }
 0x1da   : > { %9005 = vmatprep.mubr.msk.f32.mxu0 %vm461_vm2, %v10533_v63  ;;  %v2730_v63 = vsel %vm368_vm1, %v2728_v50, %v2729_v55  ;;  %v12850_v50 = vld [vmem:[#allocation35_spill] sm:$0xff] }
 0x1dd   : > { %9006 = vmatmul.mubr.msk.f32.gmra.mrb[30].mxu0 %vm461_vm2, %v10540_v1 }
 0x1de   : > { %9008 = vmatprep.mubr.msk.f32.mxu0 %vm461_vm2, %v10543_v4 }
 0x1e1   : > { %9009 = vmatmul.mubr.msk.f32.gmra.mrb[32].mxu0 %vm461_vm2, %v10550_v11  ;;  %v2732_v11 = vsel %vm368_vm1, %v2729_v55, %v2731_v58  ;;  %v12851_v55 = vld [vmem:[#allocation36_spill] sm:$0xff]  ;;  %v12853_v58 = vld [vmem:[#allocation39_spill] sm:$0xff] }
 0x1e2   : > { %9011 = vmatprep.mubr.msk.f32.mxu0 %vm461_vm2, %v10988_v62  ;;  %v12834_v62 = vld [vmem:[#allocation19_spill] sm:$0xff] }
 0x1e4   : > { %v8848_v14 = vpop.f32.mrb[44].mxu0 }
 0x1e5   : > { %v1799_v22 = vpop.f32.mrb[45].mxu0  ;;  %9012 = vmatmul.mubr.msk.f32.gmra.mrb[34].mxu0 %vm461_vm2, %v10995_v33  ;;  %v12836_v33 = vld [vmem:[#allocation21_spill] sm:$0xff]  ;;  %v12845_v14 = vld [vmem:[#allocation30_spill] sm:$0xff] }
 0x1e6   : > { %9014 = vmatprep.mubr.msk.f32.mxu0 %vm461_vm2, %v310_v13  ;;  %v12844_v13 = vld [vmem:[#allocation29_spill] sm:$0xff]  ;;  %v12846_v22 = vld [vmem:[#allocation31_spill] sm:$0xff] }
 0x1e8   : > { %v8853_v31 = vpop.f32.mrb[46].mxu0 }
 0x1e9   : > { %v1925_v32 = vpop.f32.mrb[47].mxu0  ;;  %9015 = vmatmul.mubr.msk.f32.gmra.mrb[56].mxu0 %vm461_vm2, %v311_v23  ;;  %v12847_v23 = vld [vmem:[#allocation32_spill] sm:$0xff]  ;;  %v12848_v31 = vld [vmem:[#allocation33_spill] sm:$0xff] }
 0x1ea   : > { %9019 = vmatprep.mubr.msk.f32.mxu0 %vm461_vm2, %v10272_v27  ;;  %v12849_v32 = vld [vmem:[#allocation34_spill] sm:$0xff] }
 0x1ed   : > { %9020 = vmatmul.mubr.msk.f32.vlgmr.msra.gmra.mrb[58].mxu0 %vm461_vm2, %v10292_v34  ;;  %v11839_v34 = vld [vmem:[%s12522_s3 + $0x10] sm:$0xf] }
 0x1ee   : > { %9074 = vmatpush3.msk.msra.mxu0 %vm534_vm0, %v7647_v10  ;;  %9022 = vmatprep.mubr.msk.f32.mxu0 %vm461_vm2, %v10296_v36  ;;  %v12843_v10 = vld [vmem:[#allocation28_spill] sm:$0xff] }
 0x1f1   : > { %9023 = vmatmul.mubr.msk.f32.gmra.mrb[2].mxu0 %vm461_vm2, %v10316_v44 }
 0x1f2   : > { %9025 = vmatprep.mubr.msk.f32.mxu0 %vm461_vm2, %v10326_v48 }
 0x1f5   : > { %9026 = vmatmul.mubr.msk.f32.gmra.mrb[4].mxu0 %vm461_vm2, %v12816_v40 }
 0x1f6   : > { %9028 = vmatprep.mubr.msk.f32.mxu0 %vm461_vm2, %v12817_v41 }
 0x1f9   : > { %9029 = vmatmul.mubr.msk.f32.gmra.mrb[6].mxu0 %vm461_vm2, %v12818_v52 }
 0x1fa   : > { %9031 = vmatprep.mubr.msk.f32.mxu0 %vm461_vm2, %v12819_v53 }
 0x1fd   : > { %9032 = vmatmul.mubr.msk.f32.gmra.mrb[8].mxu0 %vm461_vm2, %v12775_v16 }
 0x1fe   : > { %9034 = vmatprep.mubr.msk.f32.mxu0 %vm461_vm2, %v12820_v60 }
 0x201   : > { %9035 = vmatmul.mubr.msk.f32.gmra.mrb[10].mxu0 %vm461_vm2, %v12821_v61 }
 0x202   : > { %9037 = vmatprep.mubr.msk.f32.mxu0 %vm461_vm2, %v12822_v6 }
 0x205   : > { %9038 = vmatmul.mubr.msk.f32.gmra.mrb[12].mxu0 %vm461_vm2, %v12779_v54 }
 0x206   : > { %9040 = vmatprep.mubr.msk.f32.mxu0 %vm461_vm2, %v12780_v20 }
 0x209   : > { %9041 = vmatmul.mubr.msk.f32.gmra.mrb[14].mxu0 %vm461_vm2, %v12781_v25 }
 0x20a   : > { %9043 = vmatprep.mubr.msk.f32.mxu0 %vm461_vm2, %v12782_v59 }
 0x20d   : > { %9044 = vmatmul.mubr.msk.f32.gmra.mrb[16].mxu0 %vm461_vm2, %v12783_v8 }
 0x20e   : > { %9046 = vmatprep.mubr.msk.f32.mxu0 %vm461_vm2, %v12784_v15 }
 0x211   : > { %9047 = vmatmul.mubr.msk.f32.gmra.mrb[20].mxu0 %vm461_vm2, %v12785_v30 }
 0x212   : > { %9049 = vmatprep.mubr.msk.f32.mxu0 %vm461_vm2, %v12823_v7 }
 0x215   : > { %9050 = vmatmul.mubr.msk.f32.gmra.mrb[22].mxu0 %vm461_vm2, %v12824_v2 }
 0x216   : > { %9052 = vmatprep.mubr.msk.f32.mxu0 %vm461_vm2, %v12825_v3 }
 0x219   : > { %9053 = vmatmul.mubr.msk.f32.gmra.mrb[24].mxu0 %vm461_vm2, %v12826_v24 }
 0x21a   : > { %9055 = vmatprep.mubr.msk.f32.mxu0 %vm461_vm2, %v12827_v35 }
 0x21d   : > { %9056 = vmatmul.mubr.msk.f32.gmra.mrb[26].mxu0 %vm461_vm2, %v12828_v37 }
 0x21e   : > { %9058 = vmatprep.mubr.msk.f32.mxu0 %vm461_vm2, %v12829_v38 }
 0x221   : > { %9059 = vmatmul.mubr.msk.f32.gmra.mrb[28].mxu0 %vm461_vm2, %v12830_v42 }
 0x222   : > { %9061 = vmatprep.mubr.msk.f32.mxu0 %vm461_vm2, %v12831_v43 }
 0x225   : > { %9062 = vmatmul.mubr.msk.f32.gmra.mrb[30].mxu0 %vm461_vm2, %v12832_v45 }
 0x226   : > { %9064 = vmatprep.mubr.msk.f32.mxu0 %vm461_vm2, %v12833_v49 }
 0x229   : > { %9065 = vmatmul.mubr.msk.f32.gmra.mrb[32].mxu0 %vm461_vm2, %v10925_v29 }
 0x22a   : > { %9067 = vmatprep.mubr.msk.f32.mxu0 %vm461_vm2, %v11075_v5  ;;  %v12835_v5 = vld [vmem:[#allocation20_spill] sm:$0xff] }
 0x22c   : > { %v8904_v1 = vpop.f32.mrb[48].mxu0 }
 0x22d   : > { %v2095_v4 = vpop.f32.mrb[49].mxu0  ;;  %9068 = vmatmul.mubr.msk.f32.gmra.mrb[34].mxu0 %vm461_vm2, %v11082_v51  ;;  %v12838_v51 = vld [vmem:[#allocation23_spill] sm:$0xff]  ;;  %v12855_v1 = vld [vmem:[#allocation41_spill] sm:$0xff] }
 0x22e   : > { %9070 = vmatprep.mubr.msk.f32.mxu0 %vm461_vm2, %v2730_v63  ;;  %v12854_v63 = vld [vmem:[#allocation40_spill] sm:$0xff] }
 0x22f   : > { %v12856_v4 = vld [vmem:[#allocation44_spill] sm:$0xff] }
 0x230   : > { %v8909_v18 = vpop.f32.mrb[50].mxu0 }
 0x231   : > { %v2220_v0 = vpop.f32.mrb[51].mxu0  ;;  %9071 = vmatmul.mubr.msk.f32.gmra.mrb[60].mxu0 %vm461_vm2, %v2732_v11  ;;  %v12857_v11 = vld [vmem:[#allocation45_spill] sm:$0xff]  ;;  %v12858_v18 = vld [vmem:[#allocation48_spill] sm:$0xff] }
 0x232   : > { %9075 = vmatprep.mubr.msk.f32.mxu0 %vm461_vm2, %v12834_v62  ;;  %v12860_v0 = vld [vmem:[#allocation52_spill] sm:$0xff]  ;;  %v12861_v62 = vld [vmem:[#allocation53_spill] sm:$0xff] }
 0x235   : > { %9076 = vmatmul.mubr.msk.f32.vlgmr.msra.gmra.mrb[62].mxu0 %vm461_vm2, %v12835_v5  ;;  %v12862_v5 = vld [vmem:[#allocation56_spill] sm:$0xff] }
 0x236   : > { %9078 = vmatprep.mubr.msk.f32.mxu0 %vm461_vm2, %v12836_v33 }
 0x239   : > { %9079 = vmatmul.mubr.msk.f32.gmra.mrb[2].mxu0 %vm461_vm2, %v12837_v12 }
 0x23a   : > { %9081 = vmatprep.mubr.msk.f32.mxu0 %vm461_vm2, %v12838_v51 }
 0x23d   : > { %9082 = vmatmul.mubr.msk.f32.gmra.mrb[4].mxu0 %vm461_vm2, %v12839_v56 }
 0x23e   : > { %9084 = vmatprep.mubr.msk.f32.mxu0 %vm461_vm2, %v12840_v21  ;;  %v10146_v21 = vmov 0.0  }
 0x23f   : > { %3547 = vst.msk [vmem:[#allocation2 + $0x20] sm:$0xff] %vm461_vm2, %v10146_v21  ;;  %3542 = vst.msk [vmem:[#allocation2] sm:$0xff] %vm461_vm2, %v10146_v21 }
 0x240   : > { %3543 = vst.msk [vmem:[#allocation2 + $0x8] sm:$0xff] %vm461_vm2, %v10146_v21  ;;  %3546 = vst.msk [vmem:[#allocation2 + $0x18] sm:$0xff] %vm461_vm2, %v10146_v21 }
 0x241   : > { %9085 = vmatmul.mubr.msk.f32.gmra.mrb[6].mxu0 %vm461_vm2, %v12841_v9  ;;  %3549 = vst.msk [vmem:[#allocation2 + $0x30] sm:$0xff] %vm461_vm2, %v10146_v21  ;;  %3550 = vst.msk [vmem:[#allocation2 + $0x38] sm:$0xff] %vm461_vm2, %v10146_v21 }
 0x242   : > { %9087 = vmatprep.mubr.msk.f32.mxu0 %vm461_vm2, %v12842_v19  ;;  %3552 = vst.msk [vmem:[#allocation2 + $0x48] sm:$0xff] %vm461_vm2, %v10146_v21  ;;  %3553 = vst.msk [vmem:[#allocation2 + $0x50] sm:$0xff] %vm461_vm2, %v10146_v21 }
 0x243   : > { %3555 = vst.msk [vmem:[#allocation2 + $0x60] sm:$0xff] %vm461_vm2, %v10146_v21  ;;  %3556 = vst.msk [vmem:[#allocation2 + $0x68] sm:$0xff] %vm461_vm2, %v10146_v21 }
 0x244   : > { %3558 = vst.msk [vmem:[#allocation2 + $0x78] sm:$0xff] %vm461_vm2, %v10146_v21  ;;  %3559 = vst.msk [vmem:[#allocation2 + $0x80] sm:$0xff] %vm461_vm2, %v10146_v21 }
 0x245   : > { %9088 = vmatmul.mubr.msk.f32.gmra.mrb[8].mxu0 %vm461_vm2, %v12843_v10  ;;  %3561 = vst.msk [vmem:[#allocation2 + $0x90] sm:$0xff] %vm461_vm2, %v10146_v21  ;;  %3562 = vst.msk [vmem:[#allocation2 + $0x98] sm:$0xff] %vm461_vm2, %v10146_v21 }
 0x246   : > { %9090 = vmatprep.mubr.msk.f32.mxu0 %vm461_vm2, %v12844_v13  ;;  %3564 = vst.msk [vmem:[#allocation2 + $0xa8] sm:$0xff] %vm461_vm2, %v10146_v21  ;;  %3565 = vst.msk [vmem:[#allocation2 + $0xb0] sm:$0xff] %vm461_vm2, %v10146_v21 }
 0x247   : > { %3567 = vst.msk [vmem:[#allocation2 + $0xc0] sm:$0xff] %vm461_vm2, %v10146_v21  ;;  %3568 = vst.msk [vmem:[#allocation2 + $0xc8] sm:$0xff] %vm461_vm2, %v10146_v21 }
 0x248   : > { %3570 = vst.msk [vmem:[#allocation2 + $0xd8] sm:$0xff] %vm461_vm2, %v10146_v21  ;;  %3571 = vst.msk [vmem:[#allocation2 + $0xe0] sm:$0xff] %vm461_vm2, %v10146_v21 }
 0x249   : > { %9091 = vmatmul.mubr.msk.f32.gmra.mrb[10].mxu0 %vm461_vm2, %v12845_v14  ;;  %3573 = vst.msk [vmem:[#allocation2 + $0xf0] sm:$0xff] %vm461_vm2, %v10146_v21  ;;  %3574 = vst.msk [vmem:[#allocation2 + $0xf8] sm:$0xff] %vm461_vm2, %v10146_v21 }
 0x24a   : > { %9093 = vmatprep.mubr.msk.f32.mxu0 %vm461_vm2, %v12846_v22  ;;  %3576 = vst.msk [vmem:[#allocation2 + $0x108] sm:$0xff] %vm461_vm2, %v10146_v21  ;;  %3577 = vst.msk [vmem:[#allocation2 + $0x110] sm:$0xff] %vm461_vm2, %v10146_v21 }
 0x24b   : > { %3579 = vst.msk [vmem:[#allocation2 + $0x120] sm:$0xff] %vm461_vm2, %v10146_v21  ;;  %3580 = vst.msk [vmem:[#allocation2 + $0x128] sm:$0xff] %vm461_vm2, %v10146_v21 }
 0x24c   : > { %3582 = vst.msk [vmem:[#allocation2 + $0x138] sm:$0xff] %vm461_vm2, %v10146_v21  ;;  %3583 = vst.msk [vmem:[#allocation2 + $0x140] sm:$0xff] %vm461_vm2, %v10146_v21 }
 0x24d   : > { %9094 = vmatmul.mubr.msk.f32.gmra.mrb[12].mxu0 %vm461_vm2, %v12847_v23  ;;  %3585 = vst.msk [vmem:[#allocation2 + $0x150] sm:$0xff] %vm461_vm2, %v10146_v21  ;;  %3586 = vst.msk [vmem:[#allocation2 + $0x158] sm:$0xff] %vm461_vm2, %v10146_v21 }
 0x24e   : > { %9096 = vmatprep.mubr.msk.f32.mxu0 %vm461_vm2, %v12848_v31  ;;  %3588 = vst.msk [vmem:[#allocation2 + $0x168] sm:$0xff] %vm461_vm2, %v10146_v21  ;;  %3589 = vst.msk [vmem:[#allocation2 + $0x170] sm:$0xff] %vm461_vm2, %v10146_v21 }
 0x24f   : > { %3591 = vst.msk [vmem:[#allocation2 + $0x180] sm:$0xff] %vm461_vm2, %v10146_v21  ;;  %3592 = vst.msk [vmem:[#allocation2 + $0x188] sm:$0xff] %vm461_vm2, %v10146_v21 }
 0x250   : > { %3594 = vst.msk [vmem:[#allocation2 + $0x198] sm:$0xff] %vm461_vm2, %v10146_v21  ;;  %3595 = vst.msk [vmem:[#allocation2 + $0x1a0] sm:$0xff] %vm461_vm2, %v10146_v21 }
 0x251   : > { %9097 = vmatmul.mubr.msk.f32.gmra.mrb[14].mxu0 %vm461_vm2, %v12849_v32  ;;  %3548 = vst.msk [vmem:[#allocation2 + $0x28] sm:$0x3] %vm3544_vm4, %v10146_v21  ;;  %3545 = vst.msk [vmem:[#allocation2 + $0x10] sm:$0x3] %vm3544_vm4, %v10146_v21 }
 0x252   : > { %9099 = vmatprep.mubr.msk.f32.mxu0 %vm461_vm2, %v12850_v50  ;;  %3551 = vst.msk [vmem:[#allocation2 + $0x40] sm:$0x3] %vm3544_vm4, %v10146_v21  ;;  %3554 = vst.msk [vmem:[#allocation2 + $0x58] sm:$0x3] %vm3544_vm4, %v10146_v21 }
 0x253   : > { %3557 = vst.msk [vmem:[#allocation2 + $0x70] sm:$0x3] %vm3544_vm4, %v10146_v21  ;;  %3560 = vst.msk [vmem:[#allocation2 + $0x88] sm:$0x3] %vm3544_vm4, %v10146_v21 }
 0x254   : > { %3563 = vst.msk [vmem:[#allocation2 + $0xa0] sm:$0x3] %vm3544_vm4, %v10146_v21  ;;  %3566 = vst.msk [vmem:[#allocation2 + $0xb8] sm:$0x3] %vm3544_vm4, %v10146_v21 }
 0x255   : > { %9100 = vmatmul.mubr.msk.f32.gmra.mrb[16].mxu0 %vm461_vm2, %v12851_v55  ;;  %3569 = vst.msk [vmem:[#allocation2 + $0xd0] sm:$0x3] %vm3544_vm4, %v10146_v21  ;;  %3572 = vst.msk [vmem:[#allocation2 + $0xe8] sm:$0x3] %vm3544_vm4, %v10146_v21 }
 0x256   : > { %9102 = vmatprep.mubr.msk.f32.mxu0 %vm461_vm2, %v12806_v17  ;;  %v12859_v17 = vld [vmem:[#allocation49_spill] sm:$0xff]  ;;  %3575 = vst.msk [vmem:[#allocation2 + $0x100] sm:$0x3] %vm3544_vm4, %v10146_v21  ;;  %3578 = vst.msk [vmem:[#allocation2 + $0x118] sm:$0x3] %vm3544_vm4, %v10146_v21 }
 0x257   : > { %3581 = vst.msk [vmem:[#allocation2 + $0x130] sm:$0x3] %vm3544_vm4, %v10146_v21  ;;  %3584 = vst.msk [vmem:[#allocation2 + $0x148] sm:$0x3] %vm3544_vm4, %v10146_v21 }
 0x258   : > { %3587 = vst.msk [vmem:[#allocation2 + $0x160] sm:$0x3] %vm3544_vm4, %v10146_v21  ;;  %3590 = vst.msk [vmem:[#allocation2 + $0x178] sm:$0x3] %vm3544_vm4, %v10146_v21 }
 0x259   : > { %9103 = vmatmul.mubr.msk.f32.gmra.mrb[20].mxu0 %vm461_vm2, %v12852_v57  ;;  %3593 = vst.msk [vmem:[#allocation2 + $0x190] sm:$0x3] %vm3544_vm4, %v10146_v21  ;;  %3596 = vst.msk [vmem:[#allocation2 + $0x1a8] sm:$0x3] %vm3544_vm4, %v10146_v21 }
 0x25a   : > { %9105 = vmatprep.mubr.msk.f32.mxu0 %vm461_vm2, %v12853_v58  ;;  %3597 = vst.msk [vmem:[#allocation2 + $0x1] sm:$0xff] %vm461_vm2, %v10146_v21  ;;  %3631 = vst.msk [vmem:[#allocation2 + $0x199] sm:$0xff] %vm461_vm2, %v10146_v21 }
 0x25b   : > { %3598 = vst.msk [vmem:[#allocation2 + $0x9] sm:$0xff] %vm461_vm2, %v10146_v21  ;;  %3632 = vst.msk [vmem:[#allocation2 + $0x1a1] sm:$0xff] %vm461_vm2, %v10146_v21 }
 0x25d   : > { %9106 = vmatmul.mubr.msk.f32.gmra.mrb[22].mxu0 %vm461_vm2, %v12854_v63 }
 0x25e   : > { %9108 = vmatprep.mubr.msk.f32.mxu0 %vm461_vm2, %v12855_v1 }
 0x261   : > { %9109 = vmatmul.mubr.msk.f32.gmra.mrb[24].mxu0 %vm461_vm2, %v12856_v4 }
 0x262   : > { %9111 = vmatprep.mubr.msk.f32.mxu0 %vm461_vm2, %v12857_v11  ;;  %v4348_v36 = vld [vmem:[#allocation2 + $0x2] sm:$0xff]  ;;  %v4349_v27 = vld [vmem:[#allocation2 + $0xa] sm:$0xff] }
 0x265   : > { %9112 = vmatmul.mubr.msk.f32.gmra.mrb[26].mxu0 %vm461_vm2, %v12858_v18 }
 0x266   : > { %9114 = vmatprep.mubr.msk.f32.mxu0 %vm461_vm2, %v12859_v17 }
 0x269   : > { %9115 = vmatmul.mubr.msk.f32.gmra.mrb[28].mxu0 %vm461_vm2, %v12860_v0 }
 0x26a   : > { %9117 = vmatprep.mubr.msk.f32.mxu0 %vm461_vm2, %v12861_v62  ;;  %v11495_v62 = vld [vmem:[%s12522_s3 + $0x8] sm:$0xf] }
 0x26d   : > { %9118 = vmatmul.mubr.msk.f32.gmra.mrb[30].mxu0 %vm461_vm2, %v12862_v5 }
 0x26e   : > { %9120 = vmatprep.mubr.msk.f32.mxu0 %vm461_vm2, %v12815_v46  ;;  %v3665_v46 = vld [vmem:[%s12522_s3] sm:$0xf] }
 0x26f   : > { %9179 = vmatprep.subr.msk.mxu1 %vm534_vm0, %v3665_v46 }
 0x271   : > { %9121 = vmatmul.mubr.msk.f32.gmra.mrb[32].mxu0 %vm461_vm2, %v10860_v47  ;;  %v3667_v47 = vld [vmem:[#allocation2 + $0x9] sm:$0xff] }
 0x272   : > { %9123 = vmatprep.mubr.msk.f32.mxu0 %vm461_vm2, %v11160_v26  ;;  %v11460_v26 = vpop.f32.mrb[0].mxu1 }
 0x273   : > { %v11462_v9 = vpop.f32.mrb[1].mxu1 }
 0x274   : > { %v8960_v33 = vpop.f32.mrb[52].mxu0  ;;  %v11464_v28 = vpop.f32.mrb[2].mxu1 }
 0x275   : > { %v2390_v12 = vpop.f32.mrb[53].mxu0  ;;  %9124 = vmatmul.mubr.msk.f32.gmra.mrb[34].mxu0 %vm461_vm2, %v11167_v39  ;;  %v3666_v39 = vld [vmem:[#allocation2 + $0x1] sm:$0xff]  ;;  %v11466_v19 = vpop.f32.mrb[3].mxu1 }
 0x276   : > { %9131 = vmatprep.mubr.msk.f32.mxu1 %vm461_vm2, %v3666_v39  ;;  %v11468_v10 = vpop.f32.mrb[4].mxu1 }
 0x277   : > { %9132 = vmatmul.mubr.msk.f32.vlgmr.msra.gmra.mrb[18].mxu1 %vm461_vm2, %v3667_v47  ;;  %v11470_v13 = vpop.f32.mrb[5].mxu1 }
 0x278   : > { %v8965_v51 = vpop.f32.mrb[54].mxu0  ;;  %9180 = vmatpush3.msk.msra.mxu1 %vm534_vm0, %v3665_v46  ;;  %v11472_v14 = vpop.f32.mrb[6].mxu1 }
 0x279   : > { %v2512_v56 = vpop.f32.mrb[55].mxu0  ;;  %v11474_v22 = vpop.f32.mrb[7].mxu1  ;;  %9229 = vmatprep.subr.msk.mxu1 %vm534_vm0, %v11495_v62 }
 0x27a   : > { %v11476_v23 = vpop.f32.mrb[8].mxu1  ;;  %v11502_v56 = vld [vmem:[%s12521_s2] ss:$0 sm:$0xff] }
 0x27b   : > { %v11478_v32 = vpop.f32.mrb[9].mxu1 }
 0x27c   : > { %v11480_v55 = vpop.f32.mrb[10].mxu1 }
 0x27d   : > { %v11482_v58 = vpop.f32.mrb[11].mxu1 }
 0x27e   : > { %v11484_v1 = vpop.f32.mrb[12].mxu1 }
 0x27f   : > { %v11486_v4 = vpop.f32.mrb[13].mxu1 }
 0x280   : > { %v11488_v11 = vpop.f32.mrb[14].mxu1 }
 0x281   : > { %v11490_v18 = vpop.f32.mrb[15].mxu1 }
 0x282   : > { %v8680_v17 = vpop.f32.mrb[16].mxu1 }
 0x283   : > { %v774_v0 = vpop.f32.mrb[17].mxu1 }
 0x2bc   : > { %v9016_v31 = vpop.f32.mrb[56].mxu0 }
 0x2bd   : > { %v2682_v50 = vpop.f32.mrb[57].mxu0 }
 0x2c0   : > { %v9021_v57 = vpop.f32.mrb[58].mxu0 }
 0x2c1   : > { %v2808_v63 = vpop.f32.mrb[59].mxu0 }
 0x304   : > { %v9072_v5 = vpop.f32.mrb[60].mxu0 }
 0x305   : > { %v2978_v33 = vpop.f32.mrb[61].mxu0 }
 0x308   : > { %v9077_v12 = vpop.f32.mrb[62].mxu0 }
 0x309   : > { %v3103_v51 = vpop.f32.mrb[63].mxu0 }
 0x30c   : > { %v9080_v21 = vpop.f32.mrb[2].mxu0 }
 0x30d   : > { %v3328_v39 = vadd.f32 %v9080_v21, %v11502_v56  ;;  %v3113_v47 = vpop.f32.mrb[3].mxu0 }
 0x30e   : > { %v3327_v46 = vadd.f32 %v11502_v56, %v3113_v47 }
 0x30f   : > { %v3364_v31 = vmax.f32 %v3328_v39, 0.0 }
 0x310   : > { %v3363_v50 = vmax.f32 %v3327_v46, 0.0  ;;  %v9083_v57 = vpop.f32.mrb[4].mxu0 }
 0x311   : > { %3600 = vst.msk [vmem:[#allocation2 + $0x21] sm:$0xff] %vm461_vm2, %v3364_v31  ;;  %v3330_v63 = vadd.f32 %v9083_v57, %v11502_v56  ;;  %v3123_v17 = vpop.f32.mrb[5].mxu0 }
 0x312   : > { %3599 = vst.msk [vmem:[#allocation2 + $0x19] sm:$0xff] %vm461_vm2, %v3363_v50  ;;  %v3329_v0 = vadd.f32 %v11502_v56, %v3123_v17 }
 0x313   : > { %v3366_v5 = vmax.f32 %v3330_v63, 0.0 }
 0x314   : > { %v3365_v33 = vmax.f32 %v3329_v0, 0.0  ;;  %v9086_v12 = vpop.f32.mrb[6].mxu0 }
 0x315   : > { %3602 = vst.msk [vmem:[#allocation2 + $0x39] sm:$0xff] %vm461_vm2, %v3366_v5  ;;  %v3332_v51 = vadd.f32 %v9086_v12, %v11502_v56  ;;  %v3133_v21 = vpop.f32.mrb[7].mxu0 }
 0x316   : > { %3601 = vst.msk [vmem:[#allocation2 + $0x31] sm:$0xff] %vm461_vm2, %v3365_v33  ;;  %v3331_v39 = vadd.f32 %v11502_v56, %v3133_v21 }
 0x317   : > { %v3368_v47 = vmax.f32 %v3332_v51, 0.0 }
 0x318   : > { %v3367_v46 = vmax.f32 %v3331_v39, 0.0  ;;  %v9089_v31 = vpop.f32.mrb[8].mxu0  ;;  %v11522_v0 = vld [vmem:[#allocation2 + $0x21] sm:$0xff] }
 0x319   : > { %3604 = vst.msk [vmem:[#allocation2 + $0x51] sm:$0xff] %vm461_vm2, %v3368_v47  ;;  %v3334_v50 = vadd.f32 %v9089_v31, %v11502_v56  ;;  %v3143_v57 = vpop.f32.mrb[9].mxu0  ;;  %v11516_v63 = vld [vmem:[#allocation2 + $0x19] sm:$0xff] }
 0x31a   : > { %3603 = vst.msk [vmem:[#allocation2 + $0x49] sm:$0xff] %vm461_vm2, %v3367_v46  ;;  %v3333_v17 = vadd.f32 %v11502_v56, %v3143_v57  ;;  %9134 = vmatprep.mubr.msk.f32.mxu1 %vm461_vm2, %v11516_v63 }
 0x31b   : > { %v3370_v5 = vmax.f32 %v3334_v50, 0.0  ;;  %9135 = vmatmul.mubr.msk.f32.gmra.mrb[20].mxu1 %vm461_vm2, %v11522_v0 }
 0x31c   : > { %v3369_v33 = vmax.f32 %v3333_v17, 0.0  ;;  %v9092_v12 = vpop.f32.mrb[10].mxu0  ;;  %v11534_v46 = vld [vmem:[#allocation2 + $0x39] sm:$0xff] }
 0x31d   : > { %3606 = vst.msk [vmem:[#allocation2 + $0x69] sm:$0xff] %vm461_vm2, %v3370_v5  ;;  %v3336_v51 = vadd.f32 %v9092_v12, %v11502_v56  ;;  %v3153_v21 = vpop.f32.mrb[11].mxu0  ;;  %v11528_v39 = vld [vmem:[#allocation2 + $0x31] sm:$0xff] }
 0x31e   : > { %3605 = vst.msk [vmem:[#allocation2 + $0x61] sm:$0xff] %vm461_vm2, %v3369_v33  ;;  %v3335_v47 = vadd.f32 %v11502_v56, %v3153_v21  ;;  %9137 = vmatprep.mubr.msk.f32.mxu1 %vm461_vm2, %v11528_v39 }
 0x31f   : > { %v3372_v31 = vmax.f32 %v3336_v51, 0.0  ;;  %9138 = vmatmul.mubr.msk.f32.gmra.mrb[22].mxu1 %vm461_vm2, %v11534_v46 }
 0x320   : > { %v3371_v50 = vmax.f32 %v3335_v47, 0.0  ;;  %v9095_v57 = vpop.f32.mrb[12].mxu0  ;;  %v11546_v51 = vld [vmem:[#allocation2 + $0x51] sm:$0xff] }
 0x321   : > { %3608 = vst.msk [vmem:[#allocation2 + $0x81] sm:$0xff] %vm461_vm2, %v3372_v31  ;;  %v3338_v17 = vadd.f32 %v9095_v57, %v11502_v56  ;;  %v3163_v5 = vpop.f32.mrb[13].mxu0  ;;  %v11540_v12 = vld [vmem:[#allocation2 + $0x49] sm:$0xff] }
 0x322   : > { %3607 = vst.msk [vmem:[#allocation2 + $0x79] sm:$0xff] %vm461_vm2, %v3371_v50  ;;  %v3337_v33 = vadd.f32 %v11502_v56, %v3163_v5  ;;  %9140 = vmatprep.mubr.msk.f32.mxu1 %vm461_vm2, %v11540_v12 }
 0x323   : > { %v3374_v21 = vmax.f32 %v3338_v17, 0.0  ;;  %9141 = vmatmul.mubr.msk.f32.gmra.mrb[24].mxu1 %vm461_vm2, %v11546_v51 }
 0x324   : > { %v3373_v47 = vmax.f32 %v3337_v33, 0.0  ;;  %v9098_v31 = vpop.f32.mrb[14].mxu0  ;;  %v11558_v17 = vld [vmem:[#allocation2 + $0x69] sm:$0xff] }
 0x325   : > { %3610 = vst.msk [vmem:[#allocation2 + $0x99] sm:$0xff] %vm461_vm2, %v3374_v21  ;;  %v3340_v57 = vadd.f32 %v9098_v31, %v11502_v56  ;;  %v3173_v49 = vpop.f32.mrb[15].mxu0  ;;  %v11552_v29 = vld [vmem:[#allocation2 + $0x61] sm:$0xff] }
 0x326   : > { %3609 = vst.msk [vmem:[#allocation2 + $0x91] sm:$0xff] %vm461_vm2, %v3373_v47  ;;  %v3339_v50 = vadd.f32 %v11502_v56, %v3173_v49  ;;  %9143 = vmatprep.mubr.msk.f32.mxu1 %vm461_vm2, %v11552_v29 }
 0x327   : > { %v3376_v5 = vmax.f32 %v3340_v57, 0.0  ;;  %9144 = vmatmul.mubr.msk.f32.gmra.mrb[26].mxu1 %vm461_vm2, %v11558_v17 }
 0x328   : > { %v3375_v33 = vmax.f32 %v3339_v50, 0.0  ;;  %v9101_v21 = vpop.f32.mrb[16].mxu0  ;;  %v11570_v47 = vld [vmem:[#allocation2 + $0x81] sm:$0xff] }
 0x329   : > { %3612 = vst.msk [vmem:[#allocation2 + $0xb1] sm:$0xff] %vm461_vm2, %v3376_v5  ;;  %v3342_v31 = vadd.f32 %v9101_v21, %v11502_v56  ;;  %v3183_v43 = vpop.f32.mrb[17].mxu0  ;;  %v11564_v45 = vld [vmem:[#allocation2 + $0x79] sm:$0xff] }
 0x32a   : > { %3611 = vst.msk [vmem:[#allocation2 + $0xa9] sm:$0xff] %vm461_vm2, %v3375_v33  ;;  %v3341_v49 = vadd.f32 %v11502_v56, %v3183_v43  ;;  %9146 = vmatprep.mubr.msk.f32.mxu1 %vm461_vm2, %v11564_v45 }
 0x32b   : > { %v3378_v57 = vmax.f32 %v3342_v31, 0.0  ;;  %9147 = vmatmul.mubr.msk.f32.gmra.mrb[28].mxu1 %vm461_vm2, %v11570_v47 }
 0x32c   : > { %v3377_v50 = vmax.f32 %v3341_v49, 0.0  ;;  %v9104_v5 = vpop.f32.mrb[20].mxu0  ;;  %v11582_v33 = vld [vmem:[#allocation2 + $0x99] sm:$0xff] }
 0x32d   : > { %3614 = vst.msk [vmem:[#allocation2 + $0xc9] sm:$0xff] %vm461_vm2, %v3378_v57  ;;  %v9581_v21 = vadd.f32 %v9104_v5, %v11460_v26  ;;  %v3193_v38 = vpop.f32.mrb[21].mxu0  ;;  %v11576_v42 = vld [vmem:[#allocation2 + $0x91] sm:$0xff] }
 0x32e   : > { %3613 = vst.msk [vmem:[#allocation2 + $0xc1] sm:$0xff] %vm461_vm2, %v3377_v50  ;;  %v9582_v43 = vadd.f32 %v3193_v38, %v11462_v9  ;;  %9149 = vmatprep.mubr.msk.f32.mxu1 %vm461_vm2, %v11576_v42  ;;  %v11755_v24 = vld [vmem:[#allocation2 + $0x90] sm:$0xff]  ;;  %v11759_v7 = vld [vmem:[#allocation2 + $0x98] sm:$0xff] }
 0x32f   : > { %v3344_v31 = vadd.f32 %v9581_v21, %v11502_v56  ;;  %9150 = vmatmul.mubr.msk.f32.gmra.mrb[30].mxu1 %vm461_vm2, %v11582_v33 }
 0x330   : > { %v3343_v49 = vadd.f32 %v9582_v43, %v11502_v56  ;;  %v9107_v26 = vpop.f32.mrb[22].mxu0  ;;  %v11594_v37 = vld [vmem:[#allocation2 + $0xb1] sm:$0xff] }
 0x331   : > { %v3380_v57 = vmax.f32 %v3344_v31, 0.0  ;;  %v9583_v5 = vadd.f32 %v9107_v26, %v11464_v28  ;;  %v3203_v35 = vpop.f32.mrb[23].mxu0  ;;  %v11589_v50 = vld [vmem:[#allocation2 + $0xa9] sm:$0xff] }
 0x332   : > { %v3379_v38 = vmax.f32 %v3343_v49, 0.0  ;;  %v9584_v9 = vadd.f32 %v3203_v35, %v11466_v19  ;;  %9152 = vmatprep.mubr.msk.f32.mxu1 %vm461_vm2, %v11589_v50  ;;  %v11763_v2 = vld [vmem:[#allocation2 + $0xa8] sm:$0xff]  ;;  %v11767_v15 = vld [vmem:[#allocation2 + $0xb0] sm:$0xff] }
 0x333   : > { %3616 = vst.msk [vmem:[#allocation2 + $0xe1] sm:$0xff] %vm461_vm2, %v3380_v57  ;;  %v3346_v21 = vadd.f32 %v9583_v5, %v11502_v56  ;;  %9153 = vmatmul.mubr.msk.f32.gmra.mrb[32].mxu1 %vm461_vm2, %v11594_v37 }
 0x334   : > { %3615 = vst.msk [vmem:[#allocation2 + $0xd9] sm:$0xff] %vm461_vm2, %v3379_v38  ;;  %v3345_v28 = vadd.f32 %v9584_v9, %v11502_v56  ;;  %v9110_v43 = vpop.f32.mrb[24].mxu0  ;;  %v11608_v57 = vld [vmem:[#allocation2 + $0xc9] sm:$0xff] }
 0x335   : > { %v3382_v31 = vmax.f32 %v3346_v21, 0.0  ;;  %v9585_v35 = vadd.f32 %v9110_v43, %v11468_v10  ;;  %v3213_v19 = vpop.f32.mrb[25].mxu0  ;;  %v11603_v49 = vld [vmem:[#allocation2 + $0xc1] sm:$0xff] }
 0x336   : > { %v3381_v26 = vmax.f32 %v3345_v28, 0.0  ;;  %v9586_v3 = vadd.f32 %v3213_v19, %v11470_v13  ;;  %9155 = vmatprep.mubr.msk.f32.mxu1 %vm461_vm2, %v11603_v49  ;;  %v11771_v30 = vld [vmem:[#allocation2 + $0xc0] sm:$0xff]  ;;  %v11775_v59 = vld [vmem:[#allocation2 + $0xc8] sm:$0xff] }
 0x337   : > { %3618 = vst.msk [vmem:[#allocation2 + $0xf9] sm:$0xff] %vm461_vm2, %v3382_v31  ;;  %v3348_v5 = vadd.f32 %v9585_v35, %v11502_v56  ;;  %9156 = vmatmul.mubr.msk.f32.gmra.mrb[34].mxu1 %vm461_vm2, %v11608_v57 }
 0x338   : > { %3617 = vst.msk [vmem:[#allocation2 + $0xf1] sm:$0xff] %vm461_vm2, %v3381_v26  ;;  %v3347_v10 = vadd.f32 %v9586_v3, %v11502_v56  ;;  %v9113_v38 = vpop.f32.mrb[26].mxu0 }
 0x339   : > { %v3384_v9 = vmax.f32 %v3348_v5, 0.0  ;;  %v9587_v13 = vadd.f32 %v9113_v38, %v11472_v14  ;;  %v3223_v21 = vpop.f32.mrb[27].mxu0 }
 0x33a   : > { %v3383_v28 = vmax.f32 %v3347_v10, 0.0  ;;  %v9588_v43 = vadd.f32 %v3223_v21, %v11474_v22  ;;  %v11626_v3 = vld [vmem:[#allocation2 + $0xe1] sm:$0xff] }
 0x33b   : > { %3620 = vst.msk [vmem:[#allocation2 + $0x111] sm:$0xff] %vm461_vm2, %v3384_v9  ;;  %v3350_v31 = vadd.f32 %v9587_v13, %v11502_v56  ;;  %v11620_v35 = vld [vmem:[#allocation2 + $0xd9] sm:$0xff] }
 0x33c   : > { %3619 = vst.msk [vmem:[#allocation2 + $0x109] sm:$0xff] %vm461_vm2, %v3383_v28  ;;  %v3349_v19 = vadd.f32 %v9588_v43, %v11502_v56  ;;  %v9116_v26 = vpop.f32.mrb[28].mxu0  ;;  %9158 = vmatprep.mubr.msk.f32.mxu1 %vm461_vm2, %v11620_v35  ;;  %v11779_v8 = vld [vmem:[#allocation2 + $0xd8] sm:$0xff]  ;;  %v11783_v20 = vld [vmem:[#allocation2 + $0xe0] sm:$0xff] }
 0x33d   : > { %v3386_v14 = vmax.f32 %v3350_v31, 0.0  ;;  %v9589_v5 = vadd.f32 %v9116_v26, %v11476_v23  ;;  %v3233_v22 = vpop.f32.mrb[29].mxu0  ;;  %9159 = vmatmul.mubr.msk.f32.gmra.mrb[36].mxu1 %vm461_vm2, %v11626_v3 }
 0x33e   : > { %v3385_v10 = vmax.f32 %v3349_v19, 0.0  ;;  %v9590_v38 = vadd.f32 %v3233_v22, %v11478_v32  ;;  %v11640_v23 = vld [vmem:[#allocation2 + $0xf9] sm:$0xff] }
 0x33f   : > { %3622 = vst.msk [vmem:[#allocation2 + $0x129] sm:$0xff] %vm461_vm2, %v3386_v14  ;;  %v3352_v9 = vadd.f32 %v9589_v5, %v11502_v56  ;;  %v11634_v13 = vld [vmem:[#allocation2 + $0xf1] sm:$0xff] }
 0x340   : > { %3621 = vst.msk [vmem:[#allocation2 + $0x121] sm:$0xff] %vm461_vm2, %v3385_v10  ;;  %v3351_v21 = vadd.f32 %v9590_v38, %v11502_v56  ;;  %v9119_v28 = vpop.f32.mrb[30].mxu0  ;;  %9161 = vmatprep.mubr.msk.f32.mxu1 %vm461_vm2, %v11634_v13  ;;  %v11787_v25 = vld [vmem:[#allocation2 + $0xf0] sm:$0xff]  ;;  %v11791_v6 = vld [vmem:[#allocation2 + $0xf8] sm:$0xff] }
 0x341   : > { %v3388_v43 = vmax.f32 %v3352_v9, 0.0  ;;  %v9591_v31 = vadd.f32 %v9119_v28, %v11480_v55  ;;  %v3243_v32 = vpop.f32.mrb[31].mxu0  ;;  %9162 = vmatmul.mubr.msk.f32.gmra.mrb[38].mxu1 %vm461_vm2, %v11640_v23 }
 0x342   : > { %v3387_v19 = vmax.f32 %v3351_v21, 0.0  ;;  %v9592_v26 = vadd.f32 %v3243_v32, %v11482_v58  ;;  %v11654_v55 = vld [vmem:[#allocation2 + $0x111] sm:$0xff] }
 0x343   : > { %3624 = vst.msk [vmem:[#allocation2 + $0x141] sm:$0xff] %vm461_vm2, %v3388_v43  ;;  %v3354_v14 = vadd.f32 %v9591_v31, %v11502_v56  ;;  %v11648_v5 = vld [vmem:[#allocation2 + $0x109] sm:$0xff] }
 0x344   : > { %3623 = vst.msk [vmem:[#allocation2 + $0x139] sm:$0xff] %vm461_vm2, %v3387_v19  ;;  %v3353_v22 = vadd.f32 %v9592_v26, %v11502_v56  ;;  %v9122_v10 = vpop.f32.mrb[32].mxu0  ;;  %9164 = vmatprep.mubr.msk.f32.mxu1 %vm461_vm2, %v11648_v5  ;;  %v11795_v54 = vld [vmem:[#allocation2 + $0x108] sm:$0xff]  ;;  %v11799_v60 = vld [vmem:[#allocation2 + $0x110] sm:$0xff] }
 0x345   : > { %v3390_v38 = vmax.f32 %v3354_v14, 0.0  ;;  %v9593_v9 = vadd.f32 %v9122_v10, %v11484_v1  ;;  %v3253_v58 = vpop.f32.mrb[33].mxu0  ;;  %9165 = vmatmul.mubr.msk.f32.gmra.mrb[40].mxu1 %vm461_vm2, %v11654_v55 }
 0x346   : > { %v3389_v21 = vmax.f32 %v3353_v22, 0.0  ;;  %v9594_v28 = vadd.f32 %v3253_v58, %v11486_v4  ;;  %v11668_v1 = vld [vmem:[#allocation2 + $0x129] sm:$0xff] }
 0x347   : > { %3626 = vst.msk [vmem:[#allocation2 + $0x159] sm:$0xff] %vm461_vm2, %v3390_v38  ;;  %v3356_v43 = vadd.f32 %v9593_v9, %v11502_v56  ;;  %v11662_v31 = vld [vmem:[#allocation2 + $0x121] sm:$0xff] }
 0x348   : > { %3625 = vst.msk [vmem:[#allocation2 + $0x151] sm:$0xff] %vm461_vm2, %v3389_v21  ;;  %v3355_v32 = vadd.f32 %v9594_v28, %v11502_v56  ;;  %v9125_v19 = vpop.f32.mrb[34].mxu0  ;;  %9167 = vmatprep.mubr.msk.f32.mxu1 %vm461_vm2, %v11662_v31  ;;  %v11803_v61 = vld [vmem:[#allocation2 + $0x120] sm:$0xff]  ;;  %v11807_v53 = vld [vmem:[#allocation2 + $0x128] sm:$0xff] }
 0x349   : > { %v3392_v26 = vmax.f32 %v3356_v43, 0.0  ;;  %v9595_v14 = vadd.f32 %v9125_v19, %v11488_v11  ;;  %v3263_v4 = vpop.f32.mrb[35].mxu0  ;;  %9168 = vmatmul.mubr.msk.f32.gmra.mrb[42].mxu1 %vm461_vm2, %v11668_v1 }
 0x34a   : > { %v3391_v22 = vmax.f32 %v3355_v32, 0.0  ;;  %v9596_v10 = vadd.f32 %v3263_v4, %v11490_v18  ;;  %v11682_v11 = vld [vmem:[#allocation2 + $0x141] sm:$0xff]  ;;  %v11711_v4 = vld [vmem:[#allocation2 + $0x18] sm:$0xff] }
 0x34b   : > { %3628 = vst.msk [vmem:[#allocation2 + $0x171] sm:$0xff] %vm461_vm2, %v3392_v26  ;;  %v3358_v38 = vadd.f32 %v9595_v14, %v11502_v56  ;;  %v11676_v9 = vld [vmem:[#allocation2 + $0x139] sm:$0xff]  ;;  %v3634_v26 = vld [vmem:[#allocation2 + $0x8] sm:$0xff] }
 0x34c   : > { %3627 = vst.msk [vmem:[#allocation2 + $0x169] sm:$0xff] %vm461_vm2, %v3391_v22  ;;  %v3357_v58 = vadd.f32 %v9596_v10, %v11502_v56  ;;  %9170 = vmatprep.mubr.msk.f32.mxu1 %vm461_vm2, %v11676_v9  ;;  %v3633_v32 = vld [vmem:[#allocation2] sm:$0xff]  ;;  %v11708_v14 = vld [vmem:[%s12522_s3 + $0xc] sm:$0xf]  ;;  %v11723_v10 = vld [vmem:[#allocation2 + $0x30] sm:$0xff] }
 0x34d   : > { %v3394_v21 = vmax.f32 %v3358_v38, 0.0  ;;  %9171 = vmatmul.mubr.msk.f32.gmra.mrb[44].mxu1 %vm461_vm2, %v11682_v11  ;;  %v11719_v22 = vld [vmem:[#allocation2 + $0x20] sm:$0xff]  ;;  %v11727_v38 = vld [vmem:[#allocation2 + $0x38] sm:$0xff] }
 0x34e   : > { %v3393_v18 = vmax.f32 %v3357_v58, 0.0  ;;  %v11692_v56 = vld [vmem:[#allocation2 + $0x159] sm:$0xff]  ;;  %v11735_v58 = vld [vmem:[#allocation2 + $0x50] sm:$0xff] }
 0x34f   : > { %3630 = vst.msk [vmem:[#allocation2 + $0x189] sm:$0xff] %vm461_vm2, %v3394_v21  ;;  %v11687_v28 = vld [vmem:[#allocation2 + $0x151] sm:$0xff]  ;;  %v11739_v21 = vld [vmem:[#allocation2 + $0x60] sm:$0xff] }
 0x350   : > { %3629 = vst.msk [vmem:[#allocation2 + $0x181] sm:$0xff] %vm461_vm2, %v3393_v18  ;;  %9173 = vmatprep.mubr.msk.f32.mxu1 %vm461_vm2, %v11687_v28  ;;  %v11743_v18 = vld [vmem:[#allocation2 + $0x68] sm:$0xff]  ;;  %v11811_v16 = vld [vmem:[#allocation2 + $0x138] sm:$0xff]  ;;  %v11815_v41 = vld [vmem:[#allocation2 + $0x140] sm:$0xff] }
 0x351   : > { %9174 = vmatmul.mubr.msk.f32.gmra.mrb[46].mxu1 %vm461_vm2, %v11692_v56  ;;  %v11819_v52 = vld [vmem:[#allocation2 + $0x150] sm:$0xff]  ;;  %v11823_v48 = vld [vmem:[#allocation2 + $0x158] sm:$0xff] }
 0x352   : > { %v11700_v19 = vld [vmem:[#allocation2 + $0x171] sm:$0xff] }
 0x353   : > { %v11696_v43 = vld [vmem:[#allocation2 + $0x169] sm:$0xff]  ;;  %12864 = vst [vmem:[#allocation18_spill] sm:$0xff] %v11700_v19 }
 0x354   : > { %12863 = vst [vmem:[#allocation17_spill] sm:$0xff] %v11696_v43  ;;  %9176 = vmatprep.mubr.msk.f32.mxu1 %vm461_vm2, %v11696_v43  ;;  %v11827_v40 = vld [vmem:[#allocation2 + $0x168] sm:$0xff]  ;;  %v11831_v44 = vld [vmem:[#allocation2 + $0x170] sm:$0xff] }
 0x355   : > { %9177 = vmatmul.mubr.msk.f32.gmra.mrb[48].mxu1 %vm461_vm2, %v11700_v19  ;;  %v11842_v19 = vld [vmem:[#allocation2 + $0x1a] sm:$0xff]  ;;  %v11854_v43 = vld [vmem:[#allocation2 + $0x32] sm:$0xff] }
 0x356   : > { %9181 = vmatprep.mubr.msk.f32.mxu1 %vm461_vm2, %v3633_v32  ;;  %v11747_v32 = vld [vmem:[#allocation2 + $0x78] sm:$0xff]  ;;  %12865 = vst [vmem:[#allocation37_spill] sm:$0xff] %v11842_v19  ;;  %12867 = vst [vmem:[#allocation19_spill] sm:$0xff] %v11854_v43 }
 0x359   : > { %9182 = vmatmul.mubr.msk.f32.vlgmr.msra.gmra.mrb[18].mxu1 %vm461_vm2, %v3634_v26  ;;  %v11751_v26 = vld [vmem:[#allocation2 + $0x80] sm:$0xff] }
 0x35a   : > { %9230 = vmatpush3.msk.msra.mxu1 %vm534_vm0, %v11495_v62  ;;  %9184 = vmatprep.mubr.msk.f32.mxu1 %vm461_vm2, %v11711_v4  ;;  %v11731_v62 = vld [vmem:[#allocation2 + $0x48] sm:$0xff] }
 0x35b   : > { %9279 = vmatprep.subr.msk.mxu1 %vm534_vm0, %v11708_v14 }
 0x35d   : > { %9185 = vmatmul.mubr.msk.f32.gmra.mrb[20].mxu1 %vm461_vm2, %v11719_v22 }
 0x35e   : > { %9187 = vmatprep.mubr.msk.f32.mxu1 %vm461_vm2, %v11723_v10 }
 0x361   : > { %9188 = vmatmul.mubr.msk.f32.gmra.mrb[22].mxu1 %vm461_vm2, %v11727_v38 }
 0x362   : > { %9190 = vmatprep.mubr.msk.f32.mxu1 %vm461_vm2, %v11731_v62 }
 0x365   : > { %9191 = vmatmul.mubr.msk.f32.gmra.mrb[24].mxu1 %vm461_vm2, %v11735_v58 }
 0x366   : > { %9193 = vmatprep.mubr.msk.f32.mxu1 %vm461_vm2, %v11739_v21 }
 0x369   : > { %9194 = vmatmul.mubr.msk.f32.gmra.mrb[26].mxu1 %vm461_vm2, %v11743_v18 }
 0x36a   : > { %9196 = vmatprep.mubr.msk.f32.mxu1 %vm461_vm2, %v11747_v32 }
 0x36d   : > { %9197 = vmatmul.mubr.msk.f32.gmra.mrb[28].mxu1 %vm461_vm2, %v11751_v26 }
 0x36e   : > { %9199 = vmatprep.mubr.msk.f32.mxu1 %vm461_vm2, %v11755_v24 }
 0x371   : > { %9200 = vmatmul.mubr.msk.f32.gmra.mrb[30].mxu1 %vm461_vm2, %v11759_v7 }
 0x372   : > { %9202 = vmatprep.mubr.msk.f32.mxu1 %vm461_vm2, %v11763_v2 }
 0x375   : > { %9203 = vmatmul.mubr.msk.f32.gmra.mrb[32].mxu1 %vm461_vm2, %v11767_v15 }
 0x376   : > { %9205 = vmatprep.mubr.msk.f32.mxu1 %vm461_vm2, %v11771_v30 }
 0x379   : > { %9206 = vmatmul.mubr.msk.f32.gmra.mrb[34].mxu1 %vm461_vm2, %v11775_v59 }
 0x37a   : > { %9208 = vmatprep.mubr.msk.f32.mxu1 %vm461_vm2, %v11779_v8 }
 0x37d   : > { %9209 = vmatmul.mubr.msk.f32.gmra.mrb[36].mxu1 %vm461_vm2, %v11783_v20 }
 0x37e   : > { %9211 = vmatprep.mubr.msk.f32.mxu1 %vm461_vm2, %v11787_v25 }
 0x381   : > { %9212 = vmatmul.mubr.msk.f32.gmra.mrb[38].mxu1 %vm461_vm2, %v11791_v6 }
 0x382   : > { %9214 = vmatprep.mubr.msk.f32.mxu1 %vm461_vm2, %v11795_v54 }
 0x385   : > { %9215 = vmatmul.mubr.msk.f32.gmra.mrb[40].mxu1 %vm461_vm2, %v11799_v60 }
 0x386   : > { %9217 = vmatprep.mubr.msk.f32.mxu1 %vm461_vm2, %v11803_v61 }
 0x389   : > { %9218 = vmatmul.mubr.msk.f32.gmra.mrb[42].mxu1 %vm461_vm2, %v11807_v53 }
 0x38a   : > { %9220 = vmatprep.mubr.msk.f32.mxu1 %vm461_vm2, %v11811_v16 }
 0x38d   : > { %9221 = vmatmul.mubr.msk.f32.gmra.mrb[44].mxu1 %vm461_vm2, %v11815_v41 }
 0x38e   : > { %9223 = vmatprep.mubr.msk.f32.mxu1 %vm461_vm2, %v11819_v52 }
 0x391   : > { %9224 = vmatmul.mubr.msk.f32.gmra.mrb[46].mxu1 %vm461_vm2, %v11823_v48 }
 0x392   : > { %9226 = vmatprep.mubr.msk.f32.mxu1 %vm461_vm2, %v11827_v40 }
 0x395   : > { %9227 = vmatmul.mubr.msk.f32.gmra.mrb[48].mxu1 %vm461_vm2, %v11831_v44 }
 0x396   : > { %9231 = vmatprep.mubr.msk.f32.mxu1 %vm461_vm2, %v4348_v36  ;;  %v11850_v36 = vld [vmem:[#allocation2 + $0x22] sm:$0xff] }
 0x397   : > { %12866 = vst [vmem:[#allocation57_spill] sm:$0xff] %v11850_v36 }
 0x399   : > { %9232 = vmatmul.mubr.msk.f32.vlgmr.msra.gmra.mrb[18].mxu1 %vm461_vm2, %v4349_v27  ;;  %v11858_v27 = vld [vmem:[#allocation2 + $0x3a] sm:$0xff] }
 0x39a   : > { %9280 = vmatpush3.msk.msra.mxu1 %vm534_vm0, %v11708_v14  ;;  %9234 = vmatprep.mubr.msk.f32.mxu1 %vm461_vm2, %v11842_v19  ;;  %12868 = vst [vmem:[#allocation20_spill] sm:$0xff] %v11858_v27  ;;  %v11862_v14 = vld [vmem:[#allocation2 + $0x4a] sm:$0xff]  ;;  %v11866_v19 = vld [vmem:[#allocation2 + $0x52] sm:$0xff] }
 0x39b   : > { %9329 = vmatprep.subr.msk.mxu1 %vm534_vm0, %v11839_v34  ;;  %12869 = vst [vmem:[#allocation21_spill] sm:$0xff] %v11862_v14  ;;  %12870 = vst [vmem:[#allocation22_spill] sm:$0xff] %v11866_v19 }
 0x39d   : > { %9235 = vmatmul.mubr.msk.f32.gmra.mrb[20].mxu1 %vm461_vm2, %v11850_v36  ;;  %v11870_v36 = vld [vmem:[#allocation2 + $0x62] sm:$0xff] }
 0x39e   : > { %9237 = vmatprep.mubr.msk.f32.mxu1 %vm461_vm2, %v11854_v43  ;;  %12871 = vst [vmem:[#allocation23_spill] sm:$0xff] %v11870_v36  ;;  %v11874_v43 = vld [vmem:[#allocation2 + $0x6a] sm:$0xff] }
 0x39f   : > { %12872 = vst [vmem:[#allocation24_spill] sm:$0xff] %v11874_v43 }
 0x3a1   : > { %9238 = vmatmul.mubr.msk.f32.gmra.mrb[22].mxu1 %vm461_vm2, %v11858_v27  ;;  %v11878_v27 = vld [vmem:[#allocation2 + $0x7a] sm:$0xff] }
 0x3a2   : > { %9240 = vmatprep.mubr.msk.f32.mxu1 %vm461_vm2, %v11862_v14  ;;  %12873 = vst [vmem:[#allocation25_spill] sm:$0xff] %v11878_v27  ;;  %v11882_v14 = vld [vmem:[#allocation2 + $0x82] sm:$0xff] }
 0x3a3   : > { %12874 = vst [vmem:[#allocation26_spill] sm:$0xff] %v11882_v14 }
 0x3a5   : > { %9241 = vmatmul.mubr.msk.f32.gmra.mrb[24].mxu1 %vm461_vm2, %v11866_v19  ;;  %v11886_v19 = vld [vmem:[#allocation2 + $0x92] sm:$0xff] }
 0x3a6   : > { %9243 = vmatprep.mubr.msk.f32.mxu1 %vm461_vm2, %v11870_v36  ;;  %12875 = vst [vmem:[#allocation27_spill] sm:$0xff] %v11886_v19  ;;  %v11890_v36 = vld [vmem:[#allocation2 + $0x9a] sm:$0xff] }
 0x3a7   : > { %12876 = vst [vmem:[#allocation28_spill] sm:$0xff] %v11890_v36 }
 0x3a9   : > { %9244 = vmatmul.mubr.msk.f32.gmra.mrb[26].mxu1 %vm461_vm2, %v11874_v43  ;;  %v11894_v43 = vld [vmem:[#allocation2 + $0xaa] sm:$0xff] }
 0x3aa   : > { %9246 = vmatprep.mubr.msk.f32.mxu1 %vm461_vm2, %v11878_v27  ;;  %12877 = vst [vmem:[#allocation29_spill] sm:$0xff] %v11894_v43  ;;  %v11898_v27 = vld [vmem:[#allocation2 + $0xb2] sm:$0xff] }
 0x3ab   : > { %12878 = vst [vmem:[#allocation30_spill] sm:$0xff] %v11898_v27 }
 0x3ad   : > { %9247 = vmatmul.mubr.msk.f32.gmra.mrb[28].mxu1 %vm461_vm2, %v11882_v14  ;;  %v11902_v14 = vld [vmem:[#allocation2 + $0xc2] sm:$0xff] }
 0x3ae   : > { %9249 = vmatprep.mubr.msk.f32.mxu1 %vm461_vm2, %v11886_v19  ;;  %12879 = vst [vmem:[#allocation31_spill] sm:$0xff] %v11902_v14  ;;  %v11906_v19 = vld [vmem:[#allocation2 + $0xca] sm:$0xff] }
 0x3af   : > { %12880 = vst [vmem:[#allocation32_spill] sm:$0xff] %v11906_v19 }
 0x3b1   : > { %9250 = vmatmul.mubr.msk.f32.gmra.mrb[30].mxu1 %vm461_vm2, %v11890_v36  ;;  %v11910_v36 = vld [vmem:[#allocation2 + $0xda] sm:$0xff] }
 0x3b2   : > { %9252 = vmatprep.mubr.msk.f32.mxu1 %vm461_vm2, %v11894_v43  ;;  %12881 = vst [vmem:[#allocation33_spill] sm:$0xff] %v11910_v36  ;;  %v11914_v43 = vld [vmem:[#allocation2 + $0xe2] sm:$0xff] }
 0x3b3   : > { %12882 = vst [vmem:[#allocation34_spill] sm:$0xff] %v11914_v43 }
 0x3b5   : > { %9253 = vmatmul.mubr.msk.f32.gmra.mrb[32].mxu1 %vm461_vm2, %v11898_v27  ;;  %v11918_v27 = vld [vmem:[#allocation2 + $0xf2] sm:$0xff] }
 0x3b6   : > { %9255 = vmatprep.mubr.msk.f32.mxu1 %vm461_vm2, %v11902_v14  ;;  %12883 = vst [vmem:[#allocation35_spill] sm:$0xff] %v11918_v27  ;;  %v11922_v14 = vld [vmem:[#allocation2 + $0xfa] sm:$0xff] }
 0x3b7   : > { %12884 = vst [vmem:[#allocation36_spill] sm:$0xff] %v11922_v14 }
 0x3b9   : > { %9256 = vmatmul.mubr.msk.f32.gmra.mrb[34].mxu1 %vm461_vm2, %v11906_v19  ;;  %v11926_v19 = vld [vmem:[#allocation2 + $0x10a] sm:$0xff] }
 0x3ba   : > { %9258 = vmatprep.mubr.msk.f32.mxu1 %vm461_vm2, %v11910_v36  ;;  %12885 = vst [vmem:[#allocation38_spill] sm:$0xff] %v11926_v19  ;;  %v11930_v36 = vld [vmem:[#allocation2 + $0x112] sm:$0xff] }
 0x3bb   : > { %12886 = vst [vmem:[#allocation39_spill] sm:$0xff] %v11930_v36 }
 0x3bd   : > { %9259 = vmatmul.mubr.msk.f32.gmra.mrb[36].mxu1 %vm461_vm2, %v11914_v43  ;;  %v11934_v43 = vld [vmem:[#allocation2 + $0x122] sm:$0xff] }
 0x3be   : > { %9261 = vmatprep.mubr.msk.f32.mxu1 %vm461_vm2, %v11918_v27  ;;  %12887 = vst [vmem:[#allocation40_spill] sm:$0xff] %v11934_v43  ;;  %v11938_v27 = vld [vmem:[#allocation2 + $0x12a] sm:$0xff] }
 0x3bf   : > { %12888 = vst [vmem:[#allocation41_spill] sm:$0xff] %v11938_v27 }
 0x3c1   : > { %9262 = vmatmul.mubr.msk.f32.gmra.mrb[38].mxu1 %vm461_vm2, %v11922_v14  ;;  %v11942_v14 = vld [vmem:[#allocation2 + $0x13a] sm:$0xff] }
 0x3c2   : > { %9264 = vmatprep.mubr.msk.f32.mxu1 %vm461_vm2, %v11926_v19  ;;  %12889 = vst [vmem:[#allocation44_spill] sm:$0xff] %v11942_v14  ;;  %v11946_v19 = vld [vmem:[#allocation2 + $0x142] sm:$0xff] }
 0x3c5   : > { %9265 = vmatmul.mubr.msk.f32.gmra.mrb[40].mxu1 %vm461_vm2, %v11930_v36  ;;  %v11950_v36 = vld [vmem:[#allocation2 + $0x152] sm:$0xff] }
 0x3c6   : > { %9267 = vmatprep.mubr.msk.f32.mxu1 %vm461_vm2, %v11934_v43  ;;  %12890 = vst [vmem:[#allocation45_spill] sm:$0xff] %v11950_v36  ;;  %v11954_v43 = vld [vmem:[#allocation2 + $0x15a] sm:$0xff] }
 0x3c9   : > { %9268 = vmatmul.mubr.msk.f32.gmra.mrb[42].mxu1 %vm461_vm2, %v11938_v27  ;;  %v11958_v27 = vld [vmem:[#allocation2 + $0x16a] sm:$0xff] }
 0x3ca   : > { %9270 = vmatprep.mubr.msk.f32.mxu1 %vm461_vm2, %v11942_v14  ;;  %12891 = vst [vmem:[#allocation48_spill] sm:$0xff] %v11958_v27  ;;  %v11962_v14 = vld [vmem:[#allocation2 + $0x172] sm:$0xff] }
 0x3cd   : > { %9271 = vmatmul.mubr.msk.f32.gmra.mrb[44].mxu1 %vm461_vm2, %v11946_v19 }
 0x3ce   : > { %9273 = vmatprep.mubr.msk.f32.mxu1 %vm461_vm2, %v11950_v36  ;;  %v7855_v36 = vld [vmem:[%s12522_s3 + $0x14] sm:$0xf] }
 0x3d1   : > { %9274 = vmatmul.mubr.msk.f32.gmra.mrb[46].mxu1 %vm461_vm2, %v11954_v43 }
 0x3d2   : > { %9276 = vmatprep.mubr.msk.f32.mxu1 %vm461_vm2, %v11958_v27 }
 0x3d5   : > { %9277 = vmatmul.mubr.msk.f32.gmra.mrb[48].mxu1 %vm461_vm2, %v11962_v14 }
 0x3d6   : > { %9281 = vmatprep.mubr.msk.f32.mxu1 %vm461_vm2, %v11711_v4  ;;  %v12036_v4 = vld [vmem:[#allocation2 + $0x188] sm:$0xff] }
 0x3d9   : > { %9282 = vmatmul.mubr.msk.f32.vlgmr.msra.gmra.mrb[18].mxu1 %vm461_vm2, %v11719_v22  ;;  %v7889_v22 = vld [vmem:[%s12522_s3 + $0x18] sm:$0xf] }
 0x3da   : > { %9330 = vmatpush3.msk.msra.mxu1 %vm534_vm0, %v11839_v34  ;;  %9284 = vmatprep.mubr.msk.f32.mxu1 %vm461_vm2, %v11723_v10  ;;  %v12032_v34 = vld [vmem:[#allocation2 + $0x180] sm:$0xff] }
 0x3db   : > { %9379 = vmatprep.subr.msk.mxu1 %vm534_vm0, %v7855_v36 }
 0x3dd   : > { %9285 = vmatmul.mubr.msk.f32.gmra.mrb[20].mxu1 %vm461_vm2, %v11727_v38 }
 0x3de   : > { %9287 = vmatprep.mubr.msk.f32.mxu1 %vm461_vm2, %v11731_v62 }
 0x3e1   : > { %9288 = vmatmul.mubr.msk.f32.gmra.mrb[22].mxu1 %vm461_vm2, %v11735_v58 }
 0x3e2   : > { %9290 = vmatprep.mubr.msk.f32.mxu1 %vm461_vm2, %v11739_v21 }
 0x3e5   : > { %9291 = vmatmul.mubr.msk.f32.gmra.mrb[24].mxu1 %vm461_vm2, %v11743_v18 }
 0x3e6   : > { %9293 = vmatprep.mubr.msk.f32.mxu1 %vm461_vm2, %v11747_v32 }
 0x3e9   : > { %9294 = vmatmul.mubr.msk.f32.gmra.mrb[26].mxu1 %vm461_vm2, %v11751_v26 }
 0x3ea   : > { %9296 = vmatprep.mubr.msk.f32.mxu1 %vm461_vm2, %v11755_v24 }
 0x3ed   : > { %9297 = vmatmul.mubr.msk.f32.gmra.mrb[28].mxu1 %vm461_vm2, %v11759_v7 }
 0x3ee   : > { %9299 = vmatprep.mubr.msk.f32.mxu1 %vm461_vm2, %v11763_v2 }
 0x3f1   : > { %9300 = vmatmul.mubr.msk.f32.gmra.mrb[30].mxu1 %vm461_vm2, %v11767_v15 }
 0x3f2   : > { %9302 = vmatprep.mubr.msk.f32.mxu1 %vm461_vm2, %v11771_v30 }
 0x3f5   : > { %9303 = vmatmul.mubr.msk.f32.gmra.mrb[32].mxu1 %vm461_vm2, %v11775_v59 }
 0x3f6   : > { %9305 = vmatprep.mubr.msk.f32.mxu1 %vm461_vm2, %v11779_v8 }
 0x3f9   : > { %9306 = vmatmul.mubr.msk.f32.gmra.mrb[34].mxu1 %vm461_vm2, %v11783_v20 }
 0x3fa   : > { %9308 = vmatprep.mubr.msk.f32.mxu1 %vm461_vm2, %v11787_v25 }
 0x3fd   : > { %9309 = vmatmul.mubr.msk.f32.gmra.mrb[36].mxu1 %vm461_vm2, %v11791_v6 }
 0x3fe   : > { %9311 = vmatprep.mubr.msk.f32.mxu1 %vm461_vm2, %v11795_v54 }
 0x401   : > { %9312 = vmatmul.mubr.msk.f32.gmra.mrb[38].mxu1 %vm461_vm2, %v11799_v60 }
 0x402   : > { %9314 = vmatprep.mubr.msk.f32.mxu1 %vm461_vm2, %v11803_v61 }
 0x405   : > { %9315 = vmatmul.mubr.msk.f32.gmra.mrb[40].mxu1 %vm461_vm2, %v11807_v53 }
 0x406   : > { %9317 = vmatprep.mubr.msk.f32.mxu1 %vm461_vm2, %v11811_v16 }
 0x409   : > { %9318 = vmatmul.mubr.msk.f32.gmra.mrb[42].mxu1 %vm461_vm2, %v11815_v41 }
 0x40a   : > { %9320 = vmatprep.mubr.msk.f32.mxu1 %vm461_vm2, %v11819_v52 }
 0x40d   : > { %9321 = vmatmul.mubr.msk.f32.gmra.mrb[44].mxu1 %vm461_vm2, %v11823_v48 }
 0x40e   : > { %9323 = vmatprep.mubr.msk.f32.mxu1 %vm461_vm2, %v11827_v40 }
 0x411   : > { %9324 = vmatmul.mubr.msk.f32.gmra.mrb[46].mxu1 %vm461_vm2, %v11831_v44 }
 0x412   : > { %9326 = vmatprep.mubr.msk.f32.mxu1 %vm461_vm2, %v12032_v34 }
 0x415   : > { %9327 = vmatmul.mubr.msk.f32.gmra.mrb[48].mxu1 %vm461_vm2, %v12036_v4 }
 0x416   : > { %9331 = vmatprep.mubr.msk.f32.mxu1 %vm461_vm2, %v11516_v63  ;;  %v12894_v63 = vld [vmem:[#allocation37_spill] sm:$0xff] }
 0x419   : > { %9332 = vmatmul.mubr.msk.f32.vlgmr.msra.gmra.mrb[18].mxu1 %vm461_vm2, %v11522_v0  ;;  %v7923_v0 = vld [vmem:[%s12522_s3 + $0x1c] sm:$0xf] }
 0x41a   : > { %9380 = vmatpush3.msk.msra.mxu1 %vm534_vm0, %v7855_v36  ;;  %9334 = vmatprep.mubr.msk.f32.mxu1 %vm461_vm2, %v11528_v39  ;;  %v12895_v39 = vld [vmem:[#allocation57_spill] sm:$0xff]  ;;  %v12905_v36 = vld [vmem:[#allocation28_spill] sm:$0xff] }
 0x41b   : > { %9429 = vmatprep.subr.msk.mxu1 %vm534_vm0, %v7889_v22 }
 0x41d   : > { %9335 = vmatmul.mubr.msk.f32.gmra.mrb[20].mxu1 %vm461_vm2, %v11534_v46  ;;  %v12896_v46 = vld [vmem:[#allocation19_spill] sm:$0xff] }
 0x41e   : > { %9337 = vmatprep.mubr.msk.f32.mxu1 %vm461_vm2, %v11540_v12  ;;  %v12897_v12 = vld [vmem:[#allocation20_spill] sm:$0xff] }
 0x421   : > { %9338 = vmatmul.mubr.msk.f32.gmra.mrb[22].mxu1 %vm461_vm2, %v11546_v51  ;;  %v12898_v51 = vld [vmem:[#allocation21_spill] sm:$0xff] }
 0x422   : > { %9340 = vmatprep.mubr.msk.f32.mxu1 %vm461_vm2, %v11552_v29  ;;  %v12892_v29 = vld [vmem:[#allocation17_spill] sm:$0xff] }
 0x425   : > { %9341 = vmatmul.mubr.msk.f32.gmra.mrb[24].mxu1 %vm461_vm2, %v11558_v17  ;;  %v12899_v17 = vld [vmem:[#allocation22_spill] sm:$0xff] }
 0x426   : > { %9343 = vmatprep.mubr.msk.f32.mxu1 %vm461_vm2, %v11564_v45  ;;  %v12109_v45 = vld [vmem:[#allocation2 + $0x189] sm:$0xff] }
 0x429   : > { %9344 = vmatmul.mubr.msk.f32.gmra.mrb[26].mxu1 %vm461_vm2, %v11570_v47  ;;  %v12900_v47 = vld [vmem:[#allocation23_spill] sm:$0xff] }
 0x42a   : > { %9346 = vmatprep.mubr.msk.f32.mxu1 %vm461_vm2, %v11576_v42  ;;  %v12105_v42 = vld [vmem:[#allocation2 + $0x181] sm:$0xff] }
 0x42d   : > { %9347 = vmatmul.mubr.msk.f32.gmra.mrb[28].mxu1 %vm461_vm2, %v11582_v33  ;;  %v12901_v33 = vld [vmem:[#allocation24_spill] sm:$0xff] }
 0x42e   : > { %9349 = vmatprep.mubr.msk.f32.mxu1 %vm461_vm2, %v11589_v50  ;;  %v12902_v50 = vld [vmem:[#allocation25_spill] sm:$0xff] }
 0x431   : > { %9350 = vmatmul.mubr.msk.f32.gmra.mrb[30].mxu1 %vm461_vm2, %v11594_v37  ;;  %v12893_v37 = vld [vmem:[#allocation18_spill] sm:$0xff] }
 0x432   : > { %9352 = vmatprep.mubr.msk.f32.mxu1 %vm461_vm2, %v11603_v49  ;;  %v12903_v49 = vld [vmem:[#allocation26_spill] sm:$0xff] }
 0x435   : > { %9353 = vmatmul.mubr.msk.f32.gmra.mrb[32].mxu1 %vm461_vm2, %v11608_v57  ;;  %v12904_v57 = vld [vmem:[#allocation27_spill] sm:$0xff] }
 0x436   : > { %9355 = vmatprep.mubr.msk.f32.mxu1 %vm461_vm2, %v11620_v35 }
 0x439   : > { %9356 = vmatmul.mubr.msk.f32.gmra.mrb[34].mxu1 %vm461_vm2, %v11626_v3 }
 0x43a   : > { %9358 = vmatprep.mubr.msk.f32.mxu1 %vm461_vm2, %v11634_v13 }
 0x43d   : > { %9359 = vmatmul.mubr.msk.f32.gmra.mrb[36].mxu1 %vm461_vm2, %v11640_v23 }
 0x43e   : > { %9361 = vmatprep.mubr.msk.f32.mxu1 %vm461_vm2, %v11648_v5 }
 0x441   : > { %9362 = vmatmul.mubr.msk.f32.gmra.mrb[38].mxu1 %vm461_vm2, %v11654_v55 }
 0x442   : > { %9364 = vmatprep.mubr.msk.f32.mxu1 %vm461_vm2, %v11662_v31 }
 0x445   : > { %9365 = vmatmul.mubr.msk.f32.gmra.mrb[40].mxu1 %vm461_vm2, %v11668_v1 }
 0x446   : > { %9367 = vmatprep.mubr.msk.f32.mxu1 %vm461_vm2, %v11676_v9 }
 0x449   : > { %9368 = vmatmul.mubr.msk.f32.gmra.mrb[42].mxu1 %vm461_vm2, %v11682_v11 }
 0x44a   : > { %9370 = vmatprep.mubr.msk.f32.mxu1 %vm461_vm2, %v11687_v28 }
 0x44d   : > { %9371 = vmatmul.mubr.msk.f32.gmra.mrb[44].mxu1 %vm461_vm2, %v11692_v56 }
 0x44e   : > { %9373 = vmatprep.mubr.msk.f32.mxu1 %vm461_vm2, %v12892_v29 }
 0x451   : > { %9374 = vmatmul.mubr.msk.f32.gmra.mrb[46].mxu1 %vm461_vm2, %v12893_v37 }
 0x452   : > { %9376 = vmatprep.mubr.msk.f32.mxu1 %vm461_vm2, %v12105_v42 }
 0x455   : > { %9377 = vmatmul.mubr.msk.f32.gmra.mrb[48].mxu1 %vm461_vm2, %v12109_v45 }
 0x456   : > { %9381 = vmatprep.mubr.msk.f32.mxu1 %vm461_vm2, %v12894_v63  ;;  %v12907_v63 = vld [vmem:[#allocation30_spill] sm:$0xff] }
 0x459   : > { %9382 = vmatmul.mubr.msk.f32.vlgmr.msra.gmra.mrb[18].mxu1 %vm461_vm2, %v12895_v39  ;;  %v12908_v39 = vld [vmem:[#allocation31_spill] sm:$0xff] }
 0x45a   : > { %9430 = vmatpush3.msk.msra.mxu1 %vm534_vm0, %v7889_v22  ;;  %9384 = vmatprep.mubr.msk.f32.mxu1 %vm461_vm2, %v12896_v46  ;;  %v12906_v22 = vld [vmem:[#allocation29_spill] sm:$0xff] }
 0x45b   : > { %9479 = vmatprep.subr.msk.mxu1 %vm534_vm0, %v7923_v0 }
 0x45d   : > { %9385 = vmatmul.mubr.msk.f32.gmra.mrb[20].mxu1 %vm461_vm2, %v12897_v12 }
 0x45e   : > { %9387 = vmatprep.mubr.msk.f32.mxu1 %vm461_vm2, %v12898_v51 }
 0x461   : > { %9388 = vmatmul.mubr.msk.f32.gmra.mrb[22].mxu1 %vm461_vm2, %v12899_v17 }
 0x462   : > { %9390 = vmatprep.mubr.msk.f32.mxu1 %vm461_vm2, %v12900_v47 }
 0x465   : > { %9391 = vmatmul.mubr.msk.f32.gmra.mrb[24].mxu1 %vm461_vm2, %v12901_v33  ;;  %v12909_v33 = vld [vmem:[#allocation32_spill] sm:$0xff] }
 0x466   : > { %9393 = vmatprep.mubr.msk.f32.mxu1 %vm461_vm2, %v12902_v50  ;;  %v12910_v50 = vld [vmem:[#allocation33_spill] sm:$0xff] }
 0x469   : > { %9394 = vmatmul.mubr.msk.f32.gmra.mrb[26].mxu1 %vm461_vm2, %v12903_v49  ;;  %v12911_v49 = vld [vmem:[#allocation34_spill] sm:$0xff] }
 0x46a   : > { %9396 = vmatprep.mubr.msk.f32.mxu1 %vm461_vm2, %v12904_v57  ;;  %v12912_v57 = vld [vmem:[#allocation35_spill] sm:$0xff] }
 0x46d   : > { %9397 = vmatmul.mubr.msk.f32.gmra.mrb[28].mxu1 %vm461_vm2, %v12905_v36  ;;  %v12913_v36 = vld [vmem:[#allocation36_spill] sm:$0xff] }
 0x46e   : > { %9399 = vmatprep.mubr.msk.f32.mxu1 %vm461_vm2, %v12906_v22  ;;  %v12914_v22 = vld [vmem:[#allocation38_spill] sm:$0xff] }
 0x471   : > { %9400 = vmatmul.mubr.msk.f32.gmra.mrb[30].mxu1 %vm461_vm2, %v12907_v63  ;;  %v12915_v63 = vld [vmem:[#allocation39_spill] sm:$0xff] }
 0x472   : > { %9402 = vmatprep.mubr.msk.f32.mxu1 %vm461_vm2, %v12908_v39  ;;  %v12916_v39 = vld [vmem:[#allocation40_spill] sm:$0xff] }
 0x475   : > { %9403 = vmatmul.mubr.msk.f32.gmra.mrb[32].mxu1 %vm461_vm2, %v12909_v33  ;;  %v12917_v33 = vld [vmem:[#allocation41_spill] sm:$0xff] }
 0x476   : > { %9405 = vmatprep.mubr.msk.f32.mxu1 %vm461_vm2, %v12910_v50  ;;  %v12918_v50 = vld [vmem:[#allocation44_spill] sm:$0xff] }
 0x479   : > { %9406 = vmatmul.mubr.msk.f32.gmra.mrb[34].mxu1 %vm461_vm2, %v12911_v49 }
 0x47a   : > { %9408 = vmatprep.mubr.msk.f32.mxu1 %vm461_vm2, %v12912_v57  ;;  %v12919_v57 = vld [vmem:[#allocation45_spill] sm:$0xff] }
 0x47d   : > { %9409 = vmatmul.mubr.msk.f32.gmra.mrb[36].mxu1 %vm461_vm2, %v12913_v36 }
 0x47e   : > { %9411 = vmatprep.mubr.msk.f32.mxu1 %vm461_vm2, %v12914_v22 }
 0x481   : > { %9412 = vmatmul.mubr.msk.f32.gmra.mrb[38].mxu1 %vm461_vm2, %v12915_v63 }
 0x482   : > { %9414 = vmatprep.mubr.msk.f32.mxu1 %vm461_vm2, %v12916_v39  ;;  %v12178_v39 = vld [vmem:[#allocation2 + $0x182] sm:$0xff] }
 0x485   : > { %9415 = vmatmul.mubr.msk.f32.gmra.mrb[40].mxu1 %vm461_vm2, %v12917_v33 }
 0x486   : > { %9417 = vmatprep.mubr.msk.f32.mxu1 %vm461_vm2, %v12918_v50  ;;  %v12182_v50 = vld [vmem:[#allocation2 + $0x18a] sm:$0xff] }
 0x489   : > { %9418 = vmatmul.mubr.msk.f32.gmra.mrb[42].mxu1 %vm461_vm2, %v11946_v19 }
 0x48a   : > { %9420 = vmatprep.mubr.msk.f32.mxu1 %vm461_vm2, %v12919_v57 }
 0x48d   : > { %9421 = vmatmul.mubr.msk.f32.gmra.mrb[44].mxu1 %vm461_vm2, %v11954_v43 }
 0x48e   : > { %9423 = vmatprep.mubr.msk.f32.mxu1 %vm461_vm2, %v11958_v27  ;;  %v7957_v27 = vld [vmem:[%s12522_s3 + $0x20] sm:$0xf] }
 0x491   : > { %9424 = vmatmul.mubr.msk.f32.gmra.mrb[46].mxu1 %vm461_vm2, %v11962_v14 }
 0x492   : > { %9426 = vmatprep.mubr.msk.f32.mxu1 %vm461_vm2, %v12178_v39 }
 0x495   : > { %9427 = vmatmul.mubr.msk.f32.gmra.mrb[48].mxu1 %vm461_vm2, %v12182_v50 }
 0x496   : > { %9431 = vmatprep.mubr.msk.f32.mxu1 %vm461_vm2, %v11723_v10  ;;  %v6310_v10 = vld [vmem:[#allocation2 + $0xa9] sm:$0xff] }
 0x499   : > { %9432 = vmatmul.mubr.msk.f32.vlgmr.msra.gmra.mrb[18].mxu1 %vm461_vm2, %v11727_v38  ;;  %v6311_v38 = vld [vmem:[#allocation2 + $0xb1] sm:$0xff] }
 0x49a   : > { %9480 = vmatpush3.msk.msra.mxu1 %vm534_vm0, %v7923_v0  ;;  %9434 = vmatprep.mubr.msk.f32.mxu1 %vm461_vm2, %v11731_v62  ;;  %v6312_v62 = vld [vmem:[#allocation2 + $0xc1] sm:$0xff] }
 0x49b   : > { %9529 = vmatprep.subr.msk.mxu1 %vm534_vm0, %v7957_v27 }
 0x49d   : > { %9435 = vmatmul.mubr.msk.f32.gmra.mrb[20].mxu1 %vm461_vm2, %v11735_v58  ;;  %v6313_v58 = vld [vmem:[#allocation2 + $0xc9] sm:$0xff] }
 0x49e   : > { %9437 = vmatprep.mubr.msk.f32.mxu1 %vm461_vm2, %v11739_v21  ;;  %v12930_v21 = vld [vmem:[#allocation35_spill] sm:$0xff] }
 0x4a1   : > { %9438 = vmatmul.mubr.msk.f32.gmra.mrb[22].mxu1 %vm461_vm2, %v11743_v18  ;;  %v12931_v18 = vld [vmem:[#allocation40_spill] sm:$0xff] }
 0x4a2   : > { %9440 = vmatprep.mubr.msk.f32.mxu1 %vm461_vm2, %v11747_v32  ;;  %v12932_v32 = vld [vmem:[#allocation44_spill] sm:$0xff] }
 0x4a5   : > { %9441 = vmatmul.mubr.msk.f32.gmra.mrb[24].mxu1 %vm461_vm2, %v11751_v26  ;;  %v12933_v26 = vld [vmem:[#allocation48_spill] sm:$0xff] }
 0x4a6   : > { %9443 = vmatprep.mubr.msk.f32.mxu1 %vm461_vm2, %v11755_v24  ;;  %v6309_v24 = vld [vmem:[#allocation2 + $0x99] sm:$0xff] }
 0x4a9   : > { %9444 = vmatmul.mubr.msk.f32.gmra.mrb[26].mxu1 %vm461_vm2, %v11759_v7  ;;  %v6307_v7 = vld [vmem:[#allocation2 + $0x81] sm:$0xff] }
 0x4aa   : > { %9446 = vmatprep.mubr.msk.f32.mxu1 %vm461_vm2, %v11763_v2  ;;  %v6308_v2 = vld [vmem:[#allocation2 + $0x91] sm:$0xff] }
 0x4ad   : > { %9447 = vmatmul.mubr.msk.f32.gmra.mrb[28].mxu1 %vm461_vm2, %v11767_v15 }
 0x4ae   : > { %9449 = vmatprep.mubr.msk.f32.mxu1 %vm461_vm2, %v11771_v30 }
 0x4b1   : > { %9450 = vmatmul.mubr.msk.f32.gmra.mrb[30].mxu1 %vm461_vm2, %v11775_v59  ;;  %v10120_v59 = vld [vmem:[%s10212_s29 + $0x1d0] sm:$0xff] }
 0x4b2   : > { %9452 = vmatprep.mubr.msk.f32.mxu1 %vm461_vm2, %v11779_v8  ;;  %v6300_v8 = vld [vmem:[#allocation2 + $0x31] sm:$0xff] }
 0x4b5   : > { %9453 = vmatmul.mubr.msk.f32.gmra.mrb[32].mxu1 %vm461_vm2, %v11783_v20  ;;  %v10119_v20 = vld [vmem:[%s10212_s29 + $0x1c8] sm:$0xff] }
 0x4b6   : > { %9455 = vmatprep.mubr.msk.f32.mxu1 %vm461_vm2, %v11787_v25  ;;  %v3023_v25 = vrot.slane %v10119_v20, 2 }
 0x4b9   : > { %9456 = vmatmul.mubr.msk.f32.gmra.mrb[34].mxu1 %vm461_vm2, %v11791_v6  ;;  %v6306_v6 = vld [vmem:[#allocation2 + $0x79] sm:$0xff] }
 0x4ba   : > { %9458 = vmatprep.mubr.msk.f32.mxu1 %vm461_vm2, %v11795_v54  ;;  %v5940_v54 = vld [vmem:[#allocation2 + $0x198] sm:$0xff] }
 0x4bd   : > { %9459 = vmatmul.mubr.msk.f32.gmra.mrb[36].mxu1 %vm461_vm2, %v11799_v60  ;;  %v6304_v60 = vld [vmem:[#allocation2 + $0x61] sm:$0xff] }
 0x4be   : > { %9461 = vmatprep.mubr.msk.f32.mxu1 %vm461_vm2, %v11803_v61  ;;  %v6305_v61 = vld [vmem:[#allocation2 + $0x69] sm:$0xff] }
 0x4c1   : > { %9462 = vmatmul.mubr.msk.f32.gmra.mrb[38].mxu1 %vm461_vm2, %v11807_v53  ;;  %v6303_v53 = vld [vmem:[#allocation2 + $0x51] sm:$0xff] }
 0x4c2   : > { %9464 = vmatprep.mubr.msk.f32.mxu1 %vm461_vm2, %v11811_v16  ;;  %v3024_v16 = vrot.slane %v10120_v59, 2 }
 0x4c4   : > { %v3025_v15 = vsel %vm1103_vm3, %v3023_v25, %v3024_v16 }
 0x4c5   : > { %9465 = vmatmul.mubr.msk.f32.gmra.mrb[40].mxu1 %vm461_vm2, %v11815_v41  ;;  %9126 = vmatprep.mubr.msk.f32.mxu0 %vm461_vm2, %v3025_v15  ;;  %v6301_v41 = vld [vmem:[#allocation2 + $0x39] sm:$0xff]  ;;  %v12939_v15 = vld [vmem:[#allocation7_spill] sm:$0xff] }
 0x4c6   : > { %9467 = vmatprep.mubr.msk.f32.mxu1 %vm461_vm2, %v11819_v52  ;;  %v6302_v52 = vld [vmem:[#allocation2 + $0x49] sm:$0xff] }
 0x4c9   : > { %9468 = vmatmul.mubr.msk.f32.gmra.mrb[42].mxu1 %vm461_vm2, %v11823_v48  ;;  %v5941_v48 = vld [vmem:[#allocation2 + $0x1a0] sm:$0xff] }
 0x4ca   : > { %9470 = vmatprep.mubr.msk.f32.mxu1 %vm461_vm2, %v11827_v40 }
 0x4cd   : > { %9471 = vmatmul.mubr.msk.f32.gmra.mrb[44].mxu1 %vm461_vm2, %v11831_v44  ;;  %v10121_v44 = vld [vmem:[%s10212_s29 + $0x1d8] sm:$0x3] }
 0x4ce   : > { %9473 = vmatprep.mubr.msk.f32.mxu1 %vm461_vm2, %v12032_v34  ;;  %v3026_v30 = vrot.slane %v10121_v44, 2 }
 0x4d0   : > { %v3027_v40 = vsel %vm1103_vm3, %v3024_v16, %v3026_v30 }
 0x4d1   : > { %9474 = vmatmul.mubr.msk.f32.gmra.mrb[46].mxu1 %vm461_vm2, %v12036_v4  ;;  %9127 = vmatmul.mubr.msk.f32.gmra.mrb[64].mxu0 %vm461_vm2, %v3027_v40  ;;  %v12374_v4 = vld [vmem:[%s12523_s4] ss:$0 sm:$0xff] }
 0x4d2   : > { %9476 = vmatprep.mubr.msk.f32.mxu1 %vm461_vm2, %v5940_v54 }
 0x4d5   : > { %9477 = vmatmul.mubr.msk.f32.gmra.mrb[48].mxu1 %vm461_vm2, %v5941_v48  ;;  %v12938_v48 = vld [vmem:[#allocation8_spill] sm:$0xff] }
 0x4d6   : > { %9481 = vmatprep.mubr.msk.f32.mxu1 %vm461_vm2, %v6300_v8 }
 0x4d9   : > { %9482 = vmatmul.mubr.msk.f32.vlgmr.msra.gmra.mrb[18].mxu1 %vm461_vm2, %v6301_v41 }
 0x4da   : > { %9530 = vmatpush3.msk.msra.mxu1 %vm534_vm0, %v7957_v27  ;;  %9484 = vmatprep.mubr.msk.f32.mxu1 %vm461_vm2, %v6302_v52  ;;  %v6720_v27 = vld [vmem:[#allocation2 + $0x19a] sm:$0xff] }
 0x4dd   : > { %9485 = vmatmul.mubr.msk.f32.gmra.mrb[20].mxu1 %vm461_vm2, %v6303_v53 }
 0x4de   : > { %9487 = vmatprep.mubr.msk.f32.mxu1 %vm461_vm2, %v6304_v60 }
 0x4e1   : > { %9488 = vmatmul.mubr.msk.f32.gmra.mrb[22].mxu1 %vm461_vm2, %v6305_v61  ;;  %v12940_v61 = vld [vmem:[#allocation10_spill] sm:$0xff] }
 0x4e2   : > { %9490 = vmatprep.mubr.msk.f32.mxu1 %vm461_vm2, %v6306_v6 }
 0x4e5   : > { %9491 = vmatmul.mubr.msk.f32.gmra.mrb[24].mxu1 %vm461_vm2, %v6307_v7  ;;  %v12941_v7 = vld [vmem:[#allocation9_spill] sm:$0xff] }
 0x4e6   : > { %9493 = vmatprep.mubr.msk.f32.mxu1 %vm461_vm2, %v6308_v2 }
 0x4e9   : > { %9494 = vmatmul.mubr.msk.f32.gmra.mrb[26].mxu1 %vm461_vm2, %v6309_v24 }
 0x4ea   : > { %9496 = vmatprep.mubr.msk.f32.mxu1 %vm461_vm2, %v6310_v10 }
 0x4ed   : > { %9497 = vmatmul.mubr.msk.f32.gmra.mrb[28].mxu1 %vm461_vm2, %v6311_v38 }
 0x4ee   : > { %9499 = vmatprep.mubr.msk.f32.mxu1 %vm461_vm2, %v6312_v62 }
 0x4f1   : > { %9500 = vmatmul.mubr.msk.f32.gmra.mrb[30].mxu1 %vm461_vm2, %v6313_v58 }
 0x4f2   : > { %9502 = vmatprep.mubr.msk.f32.mxu1 %vm461_vm2, %v11620_v35  ;;  %v6330_v35 = vld [vmem:[#allocation2 + $0x199] sm:$0xff] }
 0x4f5   : > { %9503 = vmatmul.mubr.msk.f32.gmra.mrb[32].mxu1 %vm461_vm2, %v11626_v3  ;;  %v6331_v3 = vld [vmem:[#allocation2 + $0x1a1] sm:$0xff] }
 0x4f6   : > { %9505 = vmatprep.mubr.msk.f32.mxu1 %vm461_vm2, %v11634_v13  ;;  %v12920_v13 = vld [vmem:[#allocation24_spill] sm:$0xff] }
 0x4f9   : > { %9506 = vmatmul.mubr.msk.f32.gmra.mrb[34].mxu1 %vm461_vm2, %v11640_v23  ;;  %v12921_v23 = vld [vmem:[#allocation25_spill] sm:$0xff] }
 0x4fa   : > { %9508 = vmatprep.mubr.msk.f32.mxu1 %vm461_vm2, %v11648_v5  ;;  %v12922_v5 = vld [vmem:[#allocation26_spill] sm:$0xff] }
 0x4fd   : > { %9509 = vmatmul.mubr.msk.f32.gmra.mrb[36].mxu1 %vm461_vm2, %v11654_v55  ;;  %v12923_v55 = vld [vmem:[#allocation27_spill] sm:$0xff] }
 0x4fe   : > { %9511 = vmatprep.mubr.msk.f32.mxu1 %vm461_vm2, %v11662_v31  ;;  %v12924_v31 = vld [vmem:[#allocation28_spill] sm:$0xff] }
 0x501   : > { %9512 = vmatmul.mubr.msk.f32.gmra.mrb[38].mxu1 %vm461_vm2, %v11668_v1  ;;  %v12925_v1 = vld [vmem:[#allocation29_spill] sm:$0xff] }
 0x502   : > { %9514 = vmatprep.mubr.msk.f32.mxu1 %vm461_vm2, %v11676_v9  ;;  %v12926_v9 = vld [vmem:[#allocation30_spill] sm:$0xff] }
 0x505   : > { %9515 = vmatmul.mubr.msk.f32.gmra.mrb[40].mxu1 %vm461_vm2, %v11682_v11  ;;  %v12927_v11 = vld [vmem:[#allocation31_spill] sm:$0xff] }
 0x506   : > { %9517 = vmatprep.mubr.msk.f32.mxu1 %vm461_vm2, %v11687_v28  ;;  %v12928_v28 = vld [vmem:[#allocation32_spill] sm:$0xff] }
 0x509   : > { %9518 = vmatmul.mubr.msk.f32.gmra.mrb[42].mxu1 %vm461_vm2, %v11692_v56  ;;  %v12929_v56 = vld [vmem:[#allocation33_spill] sm:$0xff] }
 0x50a   : > { %9520 = vmatprep.mubr.msk.f32.mxu1 %vm461_vm2, %v12892_v29 }
 0x50d   : > { %9521 = vmatmul.mubr.msk.f32.gmra.mrb[44].mxu1 %vm461_vm2, %v12893_v37 }
 0x50e   : > { %9523 = vmatprep.mubr.msk.f32.mxu1 %vm461_vm2, %v12105_v42 }
 0x511   : > { %9524 = vmatmul.mubr.msk.f32.gmra.mrb[46].mxu1 %vm461_vm2, %v12109_v45  ;;  %v12934_v45 = vld [vmem:[#allocation4_spill] sm:$0xff] }
 0x512   : > { %9526 = vmatprep.mubr.msk.f32.mxu1 %vm461_vm2, %v6330_v35 }
 0x515   : > { %9527 = vmatmul.mubr.msk.f32.gmra.mrb[48].mxu1 %vm461_vm2, %v6331_v3  ;;  %v12942_v3 = vld [vmem:[#allocation12_spill] sm:$0xff] }
 0x516   : > { %9531 = vmatprep.mubr.msk.f32.mxu1 %vm461_vm2, %v12896_v46  ;;  %v12935_v46 = vld [vmem:[#allocation3_spill] sm:$0xff] }
 0x519   : > { %9532 = vmatmul.mubr.msk.f32.vlgmr.msra.gmra.mrb[18].mxu1 %vm461_vm2, %v12897_v12 }
 0x51a   : > { %9534 = vmatprep.mubr.msk.f32.mxu1 %vm461_vm2, %v12898_v51 }
 0x51d   : > { %9535 = vmatmul.mubr.msk.f32.gmra.mrb[20].mxu1 %vm461_vm2, %v12899_v17 }
 0x51e   : > { %9537 = vmatprep.mubr.msk.f32.mxu1 %vm461_vm2, %v12900_v47 }
 0x521   : > { %9538 = vmatmul.mubr.msk.f32.gmra.mrb[22].mxu1 %vm461_vm2, %v12920_v13 }
 0x522   : > { %9540 = vmatprep.mubr.msk.f32.mxu1 %vm461_vm2, %v12921_v23  ;;  %v12943_v23 = vld [vmem:[#allocation11_spill] sm:$0xff] }
 0x525   : > { %9541 = vmatmul.mubr.msk.f32.gmra.mrb[24].mxu1 %vm461_vm2, %v12922_v5 }
 0x526   : > { %9543 = vmatprep.mubr.msk.f32.mxu1 %vm461_vm2, %v12923_v55 }
 0x529   : > { %9544 = vmatmul.mubr.msk.f32.gmra.mrb[26].mxu1 %vm461_vm2, %v12924_v31 }
 0x52a   : > { %9546 = vmatprep.mubr.msk.f32.mxu1 %vm461_vm2, %v12925_v1 }
 0x52d   : > { %9547 = vmatmul.mubr.msk.f32.gmra.mrb[28].mxu1 %vm461_vm2, %v12926_v9 }
 0x52e   : > { %9549 = vmatprep.mubr.msk.f32.mxu1 %vm461_vm2, %v12927_v11 }
 0x531   : > { %9550 = vmatmul.mubr.msk.f32.gmra.mrb[30].mxu1 %vm461_vm2, %v12928_v28 }
 0x532   : > { %9552 = vmatprep.mubr.msk.f32.mxu1 %vm461_vm2, %v12929_v56  ;;  %v12944_v56 = vld [vmem:[#allocation14_spill] sm:$0xff] }
 0x535   : > { %9553 = vmatmul.mubr.msk.f32.gmra.mrb[32].mxu1 %vm461_vm2, %v12911_v49 }
 0x536   : > { %9555 = vmatprep.mubr.msk.f32.mxu1 %vm461_vm2, %v12930_v21 }
 0x539   : > { %9556 = vmatmul.mubr.msk.f32.gmra.mrb[34].mxu1 %vm461_vm2, %v12913_v36 }
 0x53a   : > { %9558 = vmatprep.mubr.msk.f32.mxu1 %vm461_vm2, %v12914_v22  ;;  %v12937_v22 = vld [vmem:[#allocation5_spill] sm:$0xff] }
 0x53d   : > { %9559 = vmatmul.mubr.msk.f32.gmra.mrb[36].mxu1 %vm461_vm2, %v12915_v63 }
 0x53e   : > { %9561 = vmatprep.mubr.msk.f32.mxu1 %vm461_vm2, %v12931_v18  ;;  %v12945_v18 = vld [vmem:[#allocation13_spill] sm:$0xff] }
 0x541   : > { %9562 = vmatmul.mubr.msk.f32.gmra.mrb[38].mxu1 %vm461_vm2, %v12917_v33 }
 0x542   : > { %9564 = vmatprep.mubr.msk.f32.mxu1 %vm461_vm2, %v12932_v32 }
 0x545   : > { %9565 = vmatmul.mubr.msk.f32.gmra.mrb[40].mxu1 %vm461_vm2, %v11946_v19  ;;  %v6721_v19 = vld [vmem:[#allocation2 + $0x1a2] sm:$0xff] }
 0x546   : > { %9567 = vmatprep.mubr.msk.f32.mxu1 %vm461_vm2, %v12919_v57  ;;  %v12936_v57 = vld [vmem:[#allocation6_spill] sm:$0xff] }
 0x549   : > { %9568 = vmatmul.mubr.msk.f32.gmra.mrb[42].mxu1 %vm461_vm2, %v11954_v43 }
 0x54a   : > { %9570 = vmatprep.mubr.msk.f32.mxu1 %vm461_vm2, %v12933_v26 }
 0x54d   : > { %9571 = vmatmul.mubr.msk.f32.gmra.mrb[44].mxu1 %vm461_vm2, %v11962_v14 }
 0x54e   : > { %9573 = vmatprep.mubr.msk.f32.mxu1 %vm461_vm2, %v12178_v39 }
 0x551   : > { %9574 = vmatmul.mubr.msk.f32.gmra.mrb[46].mxu1 %vm461_vm2, %v12182_v50 }
 0x552   : > { %9576 = vmatprep.mubr.msk.f32.mxu1 %vm461_vm2, %v6720_v27 }
 0x555   : > { %9577 = vmatmul.mubr.msk.f32.gmra.mrb[48].mxu1 %vm461_vm2, %v6721_v19 }
 0x5a4   : > { %v9128_v34 = vpop.f32.mrb[64].mxu0 }
 0x5a5   : > { %v3273_v43 = vpop.f32.mrb[65].mxu0 }
 0x5ec   : > { %v9533_v14 = vpop.f32.mrb[18].mxu1 }
 0x5ed   : > { %v7088_v29 = vadd.f32 %v9533_v14, %v12374_v4  ;;  %v6889_v37 = vpop.f32.mrb[19].mxu1 }
 0x5ee   : > { %v7087_v42 = vadd.f32 %v12374_v4, %v6889_v37 }
 0x5ef   : > { %v7152_v0 = vadd.f32 %v7088_v29, %v12934_v45  ;;  %v12946_v29 = vld [vmem:[#allocation16_spill] sm:$0xff] }
 0x5f0   : > { %v7151_v12 = vadd.f32 %v7087_v42, %v12935_v46  ;;  %v9536_v51 = vpop.f32.mrb[20].mxu1  ;;  %v12947_v42 = vld [vmem:[#allocation15_spill] sm:$0xff] }
 0x5f1   : > { %v7184_v17 = vmax.f32 %v7152_v0, 0.0  ;;  %v7090_v47 = vadd.f32 %v9536_v51, %v12374_v4  ;;  %v6899_v33 = vpop.f32.mrb[21].mxu1 }
 0x5f2   : > { %v7183_v50 = vmax.f32 %v7151_v12, 0.0  ;;  %v7089_v49 = vadd.f32 %v12374_v4, %v6899_v33  ;;  %v12948_v33 = vld [vmem:[#allocation43_spill] sm:$0xff] }
 0x5f3   : > { %7216 = vst.msk [vmem:[%s12383_s27 + $0x8] sm:$0xff] %vm461_vm2, %v7184_v17  ;;  %v7154_v36 = vadd.f32 %v7090_v47, %v12936_v57 }
 0x5f4   : > { %7215 = vst.msk [vmem:[%s12383_s27] sm:$0xff] %vm461_vm2, %v7183_v50  ;;  %v7153_v63 = vadd.f32 %v7089_v49, %v12937_v22  ;;  %v9539_v39 = vpop.f32.mrb[22].mxu1  ;;  %v12949_v49 = vld [vmem:[#allocation42_spill] sm:$0xff] }
 0x5f5   : > { %v7186_v54 = vmax.f32 %v7154_v36, 0.0  ;;  %v7092_v20 = vadd.f32 %v9539_v39, %v12374_v4  ;;  %v6909_v25 = vpop.f32.mrb[23].mxu1 }
 0x5f6   : > { %v7185_v59 = vmax.f32 %v7153_v63, 0.0  ;;  %v7091_v16 = vadd.f32 %v12374_v4, %v6909_v25  ;;  %v12950_v25 = vld [vmem:[#allocation47_spill] sm:$0xff] }
 0x5f7   : > { %7218 = vst.msk [vmem:[%s12383_s27 + $0x18] sm:$0xff] %vm461_vm2, %v7186_v54  ;;  %v7156_v8 = vadd.f32 %v7092_v20, %v12938_v48 }
 0x5f8   : > { %7217 = vst.msk [vmem:[%s12383_s27 + $0x10] sm:$0xff] %vm461_vm2, %v7185_v59  ;;  %v7155_v44 = vadd.f32 %v7091_v16, %v12939_v15  ;;  %v9542_v30 = vpop.f32.mrb[24].mxu1  ;;  %v12951_v16 = vld [vmem:[#allocation46_spill] sm:$0xff] }
 0x5f9   : > { %v7188_v40 = vmax.f32 %v7156_v8, 0.0  ;;  %v7094_v41 = vadd.f32 %v9542_v30, %v12374_v4  ;;  %v6919_v52 = vpop.f32.mrb[25].mxu1 }
 0x5fa   : > { %v7187_v53 = vmax.f32 %v7155_v44, 0.0  ;;  %v7093_v60 = vadd.f32 %v12374_v4, %v6919_v52  ;;  %v12952_v52 = vld [vmem:[#allocation51_spill] sm:$0xff] }
 0x5fb   : > { %7220 = vst.msk [vmem:[%s12383_s27 + $0x28] sm:$0xff] %vm461_vm2, %v7188_v40  ;;  %v7158_v6 = vadd.f32 %v7094_v41, %v12940_v61 }
 0x5fc   : > { %7219 = vst.msk [vmem:[%s12383_s27 + $0x20] sm:$0xff] %vm461_vm2, %v7187_v53  ;;  %v7157_v2 = vadd.f32 %v7093_v60, %v12941_v7  ;;  %v9545_v24 = vpop.f32.mrb[26].mxu1  ;;  %v12953_v60 = vld [vmem:[#allocation50_spill] sm:$0xff] }
 0x5fd   : > { %v7190_v10 = vmax.f32 %v7158_v6, 0.0  ;;  %v7096_v38 = vadd.f32 %v9545_v24, %v12374_v4  ;;  %v6929_v62 = vpop.f32.mrb[27].mxu1 }
 0x5fe   : > { %v7189_v58 = vmax.f32 %v7157_v2, 0.0  ;;  %v7095_v35 = vadd.f32 %v12374_v4, %v6929_v62  ;;  %v12954_v62 = vld [vmem:[#allocation55_spill] sm:$0xff] }
 0x5ff   : > { %7222 = vst.msk [vmem:[%s12383_s27 + $0x38] sm:$0xff] %vm461_vm2, %v7190_v10  ;;  %v7160_v13 = vadd.f32 %v7096_v38, %v12942_v3 }
 0x600   : > { %7221 = vst.msk [vmem:[%s12383_s27 + $0x30] sm:$0xff] %vm461_vm2, %v7189_v58  ;;  %v7159_v5 = vadd.f32 %v7095_v35, %v12943_v23  ;;  %v9548_v55 = vpop.f32.mrb[28].mxu1  ;;  %v12955_v35 = vld [vmem:[#allocation54_spill] sm:$0xff] }
 0x601   : > { %v7192_v31 = vmax.f32 %v7160_v13, 0.0  ;;  %v7098_v1 = vadd.f32 %v9548_v55, %v12374_v4  ;;  %v6939_v9 = vpop.f32.mrb[29].mxu1 }
 0x602   : > { %v7191_v11 = vmax.f32 %v7159_v5, 0.0  ;;  %v7097_v28 = vadd.f32 %v12374_v4, %v6939_v9  ;;  %v12956_v9 = vld [vmem:[#allocation59_spill] sm:$0xff] }
 0x603   : > { %7224 = vst.msk [vmem:[%s12383_s27 + $0x48] sm:$0xff] %vm461_vm2, %v7192_v31  ;;  %v7162_v21 = vadd.f32 %v7098_v1, %v12944_v56 }
 0x604   : > { %7223 = vst.msk [vmem:[%s12383_s27 + $0x40] sm:$0xff] %vm461_vm2, %v7191_v11  ;;  %v7161_v32 = vadd.f32 %v7097_v28, %v12945_v18  ;;  %v9551_v26 = vpop.f32.mrb[30].mxu1  ;;  %v12957_v28 = vld [vmem:[#allocation58_spill] sm:$0xff] }
 0x605   : > { %v7194_v27 = vmax.f32 %v7162_v21, 0.0  ;;  %v7100_v19 = vadd.f32 %v9551_v26, %v12374_v4  ;;  %v6949_v34 = vpop.f32.mrb[31].mxu1 }
 0x606   : > { %v7193_v43 = vmax.f32 %v7161_v32, 0.0  ;;  %v7099_v14 = vadd.f32 %v12374_v4, %v6949_v34  ;;  %v12958_v34 = vld [vmem:[#allocation61_spill] sm:$0xff] }
 0x607   : > { %7226 = vst.msk [vmem:[%s12383_s27 + $0x58] sm:$0xff] %vm461_vm2, %v7194_v27  ;;  %v7164_v37 = vadd.f32 %v7100_v19, %v12946_v29 }
 0x608   : > { %7225 = vst.msk [vmem:[%s12383_s27 + $0x50] sm:$0xff] %vm461_vm2, %v7193_v43  ;;  %v7163_v45 = vadd.f32 %v7099_v14, %v12947_v42  ;;  %v9554_v0 = vpop.f32.mrb[32].mxu1  ;;  %v12959_v14 = vld [vmem:[#allocation60_spill] sm:$0xff] }
 0x609   : > { %v7196_v46 = vmax.f32 %v7164_v37, 0.0  ;;  %v7102_v12 = vadd.f32 %v9554_v0, %v12374_v4  ;;  %v6959_v51 = vpop.f32.mrb[33].mxu1 }
 0x60a   : > { %v7195_v17 = vmax.f32 %v7163_v45, 0.0  ;;  %v7101_v47 = vadd.f32 %v12374_v4, %v6959_v51  ;;  %v12960_v51 = vld [vmem:[#allocation63_spill] sm:$0xff] }
 0x60b   : > { %7228 = vst.msk [vmem:[%s12383_s27 + $0x68] sm:$0xff] %vm461_vm2, %v7196_v46  ;;  %v7166_v50 = vadd.f32 %v7102_v12, %v12948_v33 }
 0x60c   : > { %7227 = vst.msk [vmem:[%s12383_s27 + $0x60] sm:$0xff] %vm461_vm2, %v7195_v17  ;;  %v7165_v57 = vadd.f32 %v7101_v47, %v12949_v49  ;;  %v9557_v36 = vpop.f32.mrb[34].mxu1  ;;  %v12961_v47 = vld [vmem:[#allocation62_spill] sm:$0xff] }
 0x60d   : > { %v7198_v22 = vmax.f32 %v7166_v50, 0.0  ;;  %v7104_v63 = vadd.f32 %v9557_v36, %v12374_v4  ;;  %v6969_v39 = vpop.f32.mrb[35].mxu1 }
 0x60e   : > { %v7197_v54 = vmax.f32 %v7165_v57, 0.0  ;;  %v7103_v20 = vadd.f32 %v12374_v4, %v6969_v39  ;;  %v12962_v39 = vld [vmem:[#allocation65_spill] sm:$0xff] }
 0x60f   : > { %7230 = vst.msk [vmem:[%s12383_s27 + $0x78] sm:$0xff] %vm461_vm2, %v7198_v22  ;;  %v7168_v59 = vadd.f32 %v7104_v63, %v12950_v25 }
 0x610   : > { %7229 = vst.msk [vmem:[%s12383_s27 + $0x70] sm:$0xff] %vm461_vm2, %v7197_v54  ;;  %v7167_v48 = vadd.f32 %v7103_v20, %v12951_v16  ;;  %v9560_v8 = vpop.f32.mrb[36].mxu1  ;;  %v12963_v20 = vld [vmem:[#allocation64_spill] sm:$0xff] }
 0x611   : > { %v7200_v15 = vmax.f32 %v7168_v59, 0.0  ;;  %v7106_v44 = vadd.f32 %v9560_v8, %v12374_v4  ;;  %v6979_v30 = vpop.f32.mrb[37].mxu1 }
 0x612   : > { %v7199_v40 = vmax.f32 %v7167_v48, 0.0  ;;  %v7105_v41 = vadd.f32 %v12374_v4, %v6979_v30  ;;  %v12964_v30 = vld [vmem:[#allocation67_spill] sm:$0xff] }
 0x613   : > { %7232 = vst.msk [vmem:[%s12383_s27 + $0x88] sm:$0xff] %vm461_vm2, %v7200_v15  ;;  %v7170_v53 = vadd.f32 %v7106_v44, %v12952_v52 }
 0x614   : > { %7231 = vst.msk [vmem:[%s12383_s27 + $0x80] sm:$0xff] %vm461_vm2, %v7199_v40  ;;  %v7169_v61 = vadd.f32 %v7105_v41, %v12953_v60  ;;  %v9563_v6 = vpop.f32.mrb[38].mxu1  ;;  %v12965_v41 = vld [vmem:[#allocation66_spill] sm:$0xff] }
 0x615   : > { %v7202_v7 = vmax.f32 %v7170_v53, 0.0  ;;  %v7108_v2 = vadd.f32 %v9563_v6, %v12374_v4  ;;  %v6989_v24 = vpop.f32.mrb[39].mxu1 }
 0x616   : > { %v7201_v10 = vmax.f32 %v7169_v61, 0.0  ;;  %v7107_v38 = vadd.f32 %v12374_v4, %v6989_v24 }
 0x617   : > { %7234 = vst.msk [vmem:[%s12383_s27 + $0x98] sm:$0xff] %vm461_vm2, %v7202_v7  ;;  %v7172_v58 = vadd.f32 %v7108_v2, %v12954_v62 }
 0x618   : > { %7233 = vst.msk [vmem:[%s12383_s27 + $0x90] sm:$0xff] %vm461_vm2, %v7201_v10  ;;  %v7171_v3 = vadd.f32 %v7107_v38, %v12955_v35  ;;  %v9566_v13 = vpop.f32.mrb[40].mxu1 }
 0x619   : > { %v7204_v23 = vmax.f32 %v7172_v58, 0.0  ;;  %v7110_v5 = vadd.f32 %v9566_v13, %v12374_v4  ;;  %v6999_v55 = vpop.f32.mrb[41].mxu1 }
 0x61a   : > { %v7203_v31 = vmax.f32 %v7171_v3, 0.0  ;;  %v7109_v1 = vadd.f32 %v12374_v4, %v6999_v55 }
 0x61b   : > { %7236 = vst.msk [vmem:[%s12383_s27 + $0xa8] sm:$0xff] %vm461_vm2, %v7204_v23  ;;  %v7174_v11 = vadd.f32 %v7110_v5, %v12956_v9 }
 0x61c   : > { %7235 = vst.msk [vmem:[%s12383_s27 + $0xa0] sm:$0xff] %vm461_vm2, %v7203_v31  ;;  %v7173_v56 = vadd.f32 %v7109_v1, %v12957_v28  ;;  %v9569_v21 = vpop.f32.mrb[42].mxu1 }
 0x61d   : > { %v7206_v18 = vmax.f32 %v7174_v11, 0.0  ;;  %v7112_v32 = vadd.f32 %v9569_v21, %v12374_v4  ;;  %v7009_v26 = vpop.f32.mrb[43].mxu1 }
 0x61e   : > { %v7205_v27 = vmax.f32 %v7173_v56, 0.0  ;;  %v7111_v19 = vadd.f32 %v12374_v4, %v7009_v26 }
 0x61f   : > { %7238 = vst.msk [vmem:[%s12383_s27 + $0xb8] sm:$0xff] %vm461_vm2, %v7206_v18  ;;  %v7176_v43 = vadd.f32 %v7112_v32, %v12958_v34 }
 0x620   : > { %7237 = vst.msk [vmem:[%s12383_s27 + $0xb0] sm:$0xff] %vm461_vm2, %v7205_v27  ;;  %v7175_v29 = vadd.f32 %v7111_v19, %v12959_v14  ;;  %v9572_v37 = vpop.f32.mrb[44].mxu1 }
 0x621   : > { %v7208_v42 = vmax.f32 %v7176_v43, 0.0  ;;  %v7114_v45 = vadd.f32 %v9572_v37, %v12374_v4  ;;  %v7019_v0 = vpop.f32.mrb[45].mxu1 }
 0x622   : > { %v7207_v46 = vmax.f32 %v7175_v29, 0.0  ;;  %v7113_v12 = vadd.f32 %v12374_v4, %v7019_v0 }
 0x623   : > { %7240 = vst.msk [vmem:[%s12383_s27 + $0xc8] sm:$0xff] %vm461_vm2, %v7208_v42  ;;  %v7178_v17 = vadd.f32 %v7114_v45, %v12960_v51 }
 0x624   : > { %7239 = vst.msk [vmem:[%s12383_s27 + $0xc0] sm:$0xff] %vm461_vm2, %v7207_v46  ;;  %v7177_v33 = vadd.f32 %v7113_v12, %v12961_v47  ;;  %v9575_v50 = vpop.f32.mrb[46].mxu1 }
 0x625   : > { %v7210_v49 = vmax.f32 %v7178_v17, 0.0  ;;  %v7116_v57 = vadd.f32 %v9575_v50, %v12374_v4  ;;  %v7029_v36 = vpop.f32.mrb[47].mxu1 }
 0x626   : > { %v7209_v22 = vmax.f32 %v7177_v33, 0.0  ;;  %v7115_v63 = vadd.f32 %v12374_v4, %v7029_v36 }
 0x627   : > { %7242 = vst.msk [vmem:[%s12383_s27 + $0xd8] sm:$0xff] %vm461_vm2, %v7210_v49  ;;  %v7180_v54 = vadd.f32 %v7116_v57, %v12962_v39 }
 0x628   : > { %7241 = vst.msk [vmem:[%s12383_s27 + $0xd0] sm:$0xff] %vm461_vm2, %v7209_v22  ;;  %v7179_v25 = vadd.f32 %v7115_v63, %v12963_v20  ;;  %v9578_v59 = vpop.f32.mrb[48].mxu1 }
 0x629   : > { %v7212_v16 = vmax.f32 %v7180_v54, 0.0  ;;  %v7118_v48 = vadd.f32 %v9578_v59, %v12374_v4  ;;  %v7039_v8 = vpop.f32.mrb[49].mxu1 }
 0x62a   : > { %v7211_v15 = vmax.f32 %v7179_v25, 0.0  ;;  %v7117_v44 = vadd.f32 %v12374_v4, %v7039_v8 }
 0x62b   : > { %7244 = vst.msk [vmem:[%s12383_s27 + $0xe8] sm:$0xff] %vm461_vm2, %v7212_v16  ;;  %v7182_v40 = vadd.f32 %v7118_v48, %v12964_v30 }
 0x62c   : > { %7243 = vst.msk [vmem:[%s12383_s27 + $0xe0] sm:$0xff] %vm461_vm2, %v7211_v15  ;;  %v7181_v52 = vadd.f32 %v7117_v44, %v12965_v41 }
 0x62d   : > { %v7214_v53 = vmax.f32 %v7182_v40, 0.0 }
 0x62e   : > { %v7213_v60 = vmax.f32 %v7181_v52, 0.0 }
 0x62f   : > { %7246 = vst.msk [vmem:[%s12383_s27 + $0xf8] sm:$0xff] %vm461_vm2, %v7214_v53 }
 0x630   : > { %7245 = vst.msk [vmem:[%s12383_s27 + $0xf0] sm:$0xff] %vm461_vm2, %v7213_v60 }
 0x631 PF: > { %s15_s20 = sadd.s32 1, %s10144_s20   ;;  %s12966_s18 = smov %s10140_s19 }
 0x632   : > { %p12_p5 = scmp.ge.s32.totalorder %s15_s20, 4   ;;  %s12967_s19 = smov %s12969_s21 }
 0x634   :  { %14 = sbr.rel (!%p12_p5) target bundleno = 2 (0x2), region = 89 }

</bundles_post_ra>
